<compile_context>
chip_gen: v7x
topology: tpu7x:2x2x1
jax: 0.10.0
libtpu: 0.0.40
codegen_flags: <defaults>
</compile_context>

<pallas_src>
import functools

import jax
import jax.numpy as jnp
from jax.experimental import pallas as pl
from jax.experimental.pallas import tpu as pltpu

EPS = 1e-5


def _conv_pool_kernel(p_ref, w_ref, b_ref, o_ref):
    """conv(3x3) + folded-BN + bias + ReLU + 2x2 maxpool for one sample block.

    p_ref: (4, 27, nb*256) bf16  im2col patches, one group per pool offset (a,b)
    w_ref: (16, 27)        bf16  conv weight with BN scale folded in
    b_ref: (16, 1)         f32   folded conv-bias + BN shift
    o_ref: (16, nb*256)    bf16  pooled activations, lane = n_local*256 + (h2*16+w2)
    """
    w = w_ref[...]
    # Four independent lane-dense MXU matmuls (one per pool offset), then a tree
    # max so the MXU can stream all pushes before the dependent VPU maxes.
    d0 = jnp.dot(w, p_ref[0], preferred_element_type=jnp.float32)
    d1 = jnp.dot(w, p_ref[1], preferred_element_type=jnp.float32)
    d2 = jnp.dot(w, p_ref[2], preferred_element_type=jnp.float32)
    d3 = jnp.dot(w, p_ref[3], preferred_element_type=jnp.float32)
    m = jnp.maximum(jnp.maximum(d0, d1), jnp.maximum(d2, d3))
    # bias + ReLU commute with the max (both monotone), scale already in `w`.
    o_ref[...] = jnp.maximum(m + b_ref[...], 0.0).astype(o_ref.dtype)


def _linear_kernel(x_ref, w_ref, b_ref, o_ref):
    """Linear(16*16*16 -> 10, padded to 128 lanes) for one sample block.

    x_ref: (16, nb, 256)   bf16  pooled activations (channel, sample, spatial)
    w_ref: (16, 256, 128)  bf16  linear weight, classes padded 10 -> 128
    b_ref: (1, 128)        f32
    o_ref: (nb, 128)       f32   lane-dense scores (first 10 lanes are real)
    """
    nb = x_ref.shape[1]
    acc = jnp.zeros((nb, 128), jnp.float32)
    for c in range(16):
        acc = acc + jnp.dot(x_ref[c], w_ref[c], preferred_element_type=jnp.float32)
    o_ref[...] = acc + b_ref[...]


def _im2col_nchw(x_pad):
    """x_pad: (N, 3, 34, 34) zero-padded NCHW bf16 input.

    Returns (4, 27, N*256) with
      patches[a*2+b, (kh*3+kw)*3+ci, n*256 + h2*16+w2] = x_pad[n, ci, 2*h2+a+kh, 2*w2+b+kw]
    """
    n = x_pad.shape[0]
    groups = []
    for a in range(2):
        for b in range(2):
            rows = []
            for kh in range(3):
                for kw in range(3):
                    for ci in range(3):
                        slab = x_pad[:, ci, a + kh:a + kh + 32:2, b + kw:b + kw + 32:2]
                        rows.append(slab.reshape(n * 256))          # (N*256,)
            groups.append(jnp.stack(rows, axis=0))                  # (27, N*256)
    return jnp.stack(groups, axis=0)                                # (4, 27, N*256)


def _tile_config(n, block_n):
    """Samples-per-grid-step and scoped VMEM limit, per-generation (see header)."""
    if block_n is None:
        try:
            big_vmem = (pltpu.get_tpu_info().vmem_capacity_bytes
                        >= 100 * 1024 * 1024)                        # v5e/v6e: 128 MiB
        except Exception:                                            # conservative (v7x-safe)
            big_vmem = False
        block_n = 256 if big_vmem else 128
    nb = min(block_n, max(n, 8))
    if n >= 16:
        nb = min(nb, (n + 1) // 2)       # keep >=2 grid steps for v7x megacore sharding
    nb = max(8, (nb // 8) * 8)
    vmem_limit = (96 if nb > 128 else 48) * 1024 * 1024
    return nb, vmem_limit


def convnet4_forward(x_nchw, params, *, block_n=None):
    """Pallas implementation of ConvNet4.forward. x_nchw: (N, 3, 32, 32) f32."""
    n = x_nchw.shape[0]
    nb, vmem_limit = _tile_config(n, block_n)
    n_pad = ((n + nb - 1) // nb) * nb
    if n_pad != n:
        x_nchw = jnp.pad(x_nchw, ((0, n_pad - n), (0, 0), (0, 0), (0, 0)))
    grid = (n_pad // nb,)

    # ---- glue: bf16 cast first, then pad + im2col + parameter folding (plain JAX) ----
    x_pad = jnp.pad(x_nchw.astype(jnp.bfloat16), ((0, 0), (0, 0), (1, 1), (1, 1)))
    patches = _im2col_nchw(x_pad)                                    # (4, 27, n_pad*256) bf16

    scale = params["gamma"] / jnp.sqrt(params["var"] + EPS)                      # (16,)
    w_conv = (jnp.transpose(params["wc"], (0, 2, 3, 1)).reshape(16, 27)
              * scale[:, None]).astype(jnp.bfloat16)                             # (16, 27)
    b_conv = ((params["bc"] - params["mean"]) * scale
              + params["beta"]).reshape(16, 1).astype(jnp.float32)               # (16, 1)

    # torch flatten index = c*256 + h*16 + w  ->  w_lin[c, s, j]; pad classes to 128 lanes.
    w_lin = jnp.transpose(params["wl"].reshape(10, 16, 256), (1, 2, 0))
    w_lin = jnp.pad(w_lin, ((0, 0), (0, 0), (0, 118))).astype(jnp.bfloat16)      # (16, 256, 128)
    b_lin = jnp.pad(params["bl"], (0, 118)).reshape(1, 128).astype(jnp.float32)  # (1, 128)

    cparams = pltpu.CompilerParams(dimension_semantics=("parallel",),
                                   vmem_limit_bytes=vmem_limit)

    # ---- kernel 1: conv + BN + ReLU + maxpool, nb samples per grid step ----
    pooled = pl.pallas_call(
        _conv_pool_kernel,
        out_shape=jax.ShapeDtypeStruct((16, n_pad * 256), jnp.bfloat16),
        grid_spec=pltpu.PrefetchScalarGridSpec(
            num_scalar_prefetch=0,
            grid=grid,
            in_specs=[
                pl.BlockSpec((4, 27, nb * 256), lambda i: (0, 0, i)),
                pl.BlockSpec((16, 27), lambda i: (0, 0)),
                pl.BlockSpec((16, 1), lambda i: (0, 0)),
            ],
            out_specs=pl.BlockSpec((16, nb * 256), lambda i: (0, i)),
        ),
        compiler_params=cparams,
    )(patches, w_conv, b_conv)

    # ---- kernel 2: Linear(4096 -> 10), nb samples per grid step ----
    pooled3 = pooled.reshape(16, n_pad, 256)
    out = pl.pallas_call(
        _linear_kernel,
        out_shape=jax.ShapeDtypeStruct((n_pad, 128), jnp.float32),
        grid_spec=pltpu.PrefetchScalarGridSpec(
            num_scalar_prefetch=0,
            grid=grid,
            in_specs=[
                pl.BlockSpec((16, nb, 256), lambda i: (0, i, 0)),
                pl.BlockSpec((16, 256, 128), lambda i: (0, 0, 0)),
                pl.BlockSpec((1, 128), lambda i: (0, 0)),
            ],
            out_specs=pl.BlockSpec((nb, 128), lambda i: (i, 0)),
        ),
        compiler_params=cparams,
    )(pooled3, w_lin, b_lin)

    return out[:n, :10]


def reference_forward(x, params):
    """Pure-JAX reference of the same forward pass (numerical self-check)."""
    hi = jax.lax.Precision.HIGHEST
    y = jax.lax.conv_general_dilated(
        x, params["wc"], window_strides=(1, 1), padding="SAME",
        dimension_numbers=("NCHW", "OIHW", "NCHW"), precision=hi)
    y = y + params["bc"][None, :, None, None]
    inv = 1.0 / jnp.sqrt(params["var"] + EPS)
    y = ((y - params["mean"][None, :, None, None]) * inv[None, :, None, None]
         * params["gamma"][None, :, None, None] + params["beta"][None, :, None, None])
    y = jnp.maximum(y, 0.0)
    n, c, h, w = y.shape
    y = y.reshape(n, c, h // 2, 2, w // 2, 2).max(axis=(3, 5))
    flat = y.reshape(n, -1)
    return jnp.dot(flat, params["wl"].T, precision=hi) + params["bl"]


if __name__ == "__main__":
    key = jax.random.PRNGKey(0)
    ks = jax.random.split(key, 9)
    params = {
        "wc":    jax.random.normal(ks[0], (16, 3, 3, 3), jnp.float32) * 0.1,   # Conv2d weight
        "bc":    jax.random.normal(ks[1], (16,), jnp.float32) * 0.1,           # Conv2d bias
        "gamma": 1.0 + jax.random.normal(ks[2], (16,), jnp.float32) * 0.1,     # BN weight
        "beta":  jax.random.normal(ks[3], (16,), jnp.float32) * 0.1,           # BN bias
        "mean":  jax.random.normal(ks[4], (16,), jnp.float32) * 0.1,           # BN running_mean
        "var":   jax.random.uniform(ks[5], (16,), jnp.float32, 0.5, 1.5),      # BN running_var
        "wl":    jax.random.normal(ks[6], (10, 16 * 16 * 16), jnp.float32) * 0.02,  # Linear weight
        "bl":    jax.random.normal(ks[7], (10,), jnp.float32) * 0.1,           # Linear bias
    }
    # Linear(16*16*16, 10) implies a 32x32 input (pooled to 16x16 with 16 channels).
    x = jax.random.normal(ks[8], (16, 3, 32, 32), jnp.float32)

    # Small demo batch: 16 samples, 8 per grid step -> 2 grid steps per kernel.
    fwd = jax.jit(functools.partial(convnet4_forward, block_n=8))
    out = jax.block_until_ready(fwd(x, params))
    assert out.shape == (16, 10), out.shape

    ref = jax.block_until_ready(reference_forward(x, params))
    assert jnp.allclose(out, ref, rtol=1e-2, atol=1e-2), (out, ref)

    print("KERNEL_OK")
</pallas_src>

<mosaic_0001>
module attributes {stable_mosaic.version = 11 : i64} {
  func.func @_conv_pool_kernel(%arg0: i32, %arg1: memref<4x27x2048xbf16, #tpu.memory_space<vmem>>, %arg2: memref<16x27xbf16, #tpu.memory_space<vmem>>, %arg3: memref<16x1xf32, #tpu.memory_space<vmem>>, %arg4: memref<16x2048xbf16, #tpu.memory_space<vmem>>) attributes {dimension_semantics = [#tpu.dimension_semantics<parallel>], iteration_bounds = array<i64: 2>, scalar_prefetch = 0 : i64, scratch_operands = 0 : i64, tpu.core_type = #tpu.core_type<tc>, window_params = [{transform_indices = @transform_0, window_bounds = array<i64: 4, 27, 2048>}, {pipeline_mode = #tpu.pipeline_mode<synchronous>, transform_indices = @transform_1, window_bounds = array<i64: 16, 27>}, {pipeline_mode = #tpu.pipeline_mode<synchronous>, transform_indices = @transform_2, window_bounds = array<i64: 16, 1>}, {transform_indices = @transform_3, window_bounds = array<i64: 16, 2048>}]} {
    %c0 = arith.constant 0 : index
    %c0_0 = arith.constant 0 : index
    %0 = vector.load %arg2[%c0, %c0_0] : memref<16x27xbf16, #tpu.memory_space<vmem>>, vector<16x27xbf16>
    %c0_1 = arith.constant 0 : index
    %c0_2 = arith.constant 0 : index
    %c0_3 = arith.constant 0 : index
    %1 = vector.load %arg1[%c0_1, %c0_2, %c0_3] : memref<4x27x2048xbf16, #tpu.memory_space<vmem>>, vector<1x27x2048xbf16>
    %2 = vector.shape_cast %1 : vector<1x27x2048xbf16> to vector<27x2048xbf16>
    %cst = arith.constant dense<0.000000e+00> : vector<16x2048xf32>
    %3 = tpu.matmul %0, %2, %cst {dimension_numbers = #tpu.dot_dimension_numbers<[1], [0], [0], [1], [0, 0, 1, 1], [], []>} : vector<16x27xbf16>, vector<27x2048xbf16>, vector<16x2048xf32> -> vector<16x2048xf32>
    %c1 = arith.constant 1 : index
    %c0_4 = arith.constant 0 : index
    %c0_5 = arith.constant 0 : index
    %4 = vector.load %arg1[%c1, %c0_4, %c0_5] : memref<4x27x2048xbf16, #tpu.memory_space<vmem>>, vector<1x27x2048xbf16>
    %5 = vector.shape_cast %4 : vector<1x27x2048xbf16> to vector<27x2048xbf16>
    %cst_6 = arith.constant dense<0.000000e+00> : vector<16x2048xf32>
    %6 = tpu.matmul %0, %5, %cst_6 {dimension_numbers = #tpu.dot_dimension_numbers<[1], [0], [0], [1], [0, 0, 1, 1], [], []>} : vector<16x27xbf16>, vector<27x2048xbf16>, vector<16x2048xf32> -> vector<16x2048xf32>
    %c2 = arith.constant 2 : index
    %c0_7 = arith.constant 0 : index
    %c0_8 = arith.constant 0 : index
    %7 = vector.load %arg1[%c2, %c0_7, %c0_8] : memref<4x27x2048xbf16, #tpu.memory_space<vmem>>, vector<1x27x2048xbf16>
    %8 = vector.shape_cast %7 : vector<1x27x2048xbf16> to vector<27x2048xbf16>
    %cst_9 = arith.constant dense<0.000000e+00> : vector<16x2048xf32>
    %9 = tpu.matmul %0, %8, %cst_9 {dimension_numbers = #tpu.dot_dimension_numbers<[1], [0], [0], [1], [0, 0, 1, 1], [], []>} : vector<16x27xbf16>, vector<27x2048xbf16>, vector<16x2048xf32> -> vector<16x2048xf32>
    %c3 = arith.constant 3 : index
    %c0_10 = arith.constant 0 : index
    %c0_11 = arith.constant 0 : index
    %10 = vector.load %arg1[%c3, %c0_10, %c0_11] : memref<4x27x2048xbf16, #tpu.memory_space<vmem>>, vector<1x27x2048xbf16>
    %11 = vector.shape_cast %10 : vector<1x27x2048xbf16> to vector<27x2048xbf16>
    %cst_12 = arith.constant dense<0.000000e+00> : vector<16x2048xf32>
    %12 = tpu.matmul %0, %11, %cst_12 {dimension_numbers = #tpu.dot_dimension_numbers<[1], [0], [0], [1], [0, 0, 1, 1], [], []>} : vector<16x27xbf16>, vector<27x2048xbf16>, vector<16x2048xf32> -> vector<16x2048xf32>
    %13 = arith.maximumf %3, %6 : vector<16x2048xf32>
    %14 = arith.maximumf %9, %12 : vector<16x2048xf32>
    %15 = arith.maximumf %13, %14 : vector<16x2048xf32>
    %c0_13 = arith.constant 0 : index
    %c0_14 = arith.constant 0 : index
    %16 = vector.load %arg3[%c0_13, %c0_14] : memref<16x1xf32, #tpu.memory_space<vmem>>, vector<16x1xf32>
    %17 = vector.broadcast %16 : vector<16x1xf32> to vector<16x2048xf32>
    %18 = arith.addf %15, %17 : vector<16x2048xf32>
    %cst_15 = arith.constant 0.000000e+00 : f32
    %19 = vector.broadcast %cst_15 : f32 to vector<16x2048xf32>
    %20 = arith.maximumf %18, %19 : vector<16x2048xf32>
    %21 = arith.truncf %20 : vector<16x2048xf32> to vector<16x2048xbf16>
    %c0_16 = arith.constant 0 : index
    %c0_17 = arith.constant 0 : index
    %22 = vector.load %arg4[%c0_16, %c0_17] : memref<16x2048xbf16, #tpu.memory_space<vmem>>, vector<16x2048xbf16>
    tpu.vector_store %arg4[%c0_16, %c0_17], %21 {strides = array<i32>} : memref<16x2048xbf16, #tpu.memory_space<vmem>>, vector<16x2048xbf16>,
    return
  }
  func.func @transform_0(%arg0: i32) -> (i32, i32, i32) {
    %c0_i32 = arith.constant 0 : i32
    %c0_i32_0 = arith.constant 0 : i32
    %c0_i32_1 = arith.constant 0 : i32
    return %c0_i32, %c0_i32_0, %arg0 : i32, i32, i32
  }
  func.func @transform_1(%arg0: i32) -> (i32, i32) {
    %c0_i32 = arith.constant 0 : i32
    %c0_i32_0 = arith.constant 0 : i32
    %c0_i32_1 = arith.constant 0 : i32
    return %c0_i32, %c0_i32_0 : i32, i32
  }
  func.func @transform_2(%arg0: i32) -> (i32, i32) {
    %c0_i32 = arith.constant 0 : i32
    %c0_i32_0 = arith.constant 0 : i32
    %c0_i32_1 = arith.constant 0 : i32
    return %c0_i32, %c0_i32_0 : i32, i32
  }
  func.func @transform_3(%arg0: i32) -> (i32, i32) {
    %c0_i32 = arith.constant 0 : i32
    %c0_i32_0 = arith.constant 0 : i32
    return %c0_i32, %arg0 : i32, i32
  }
}

module attributes {stable_mosaic.version = 11 : i64} {
  func.func @_linear_kernel(%arg0: i32, %arg1: memref<16x8x256xbf16, #tpu.memory_space<vmem>>, %arg2: memref<16x256x128xbf16, #tpu.memory_space<vmem>>, %arg3: memref<1x128xf32, #tpu.memory_space<vmem>>, %arg4: memref<8x128xf32, #tpu.memory_space<vmem>>) attributes {dimension_semantics = [#tpu.dimension_semantics<parallel>], iteration_bounds = array<i64: 2>, scalar_prefetch = 0 : i64, scratch_operands = 0 : i64, tpu.core_type = #tpu.core_type<tc>, window_params = [{transform_indices = @transform_0, window_bounds = array<i64: 16, 8, 256>}, {pipeline_mode = #tpu.pipeline_mode<synchronous>, transform_indices = @transform_1, window_bounds = array<i64: 16, 256, 128>}, {pipeline_mode = #tpu.pipeline_mode<synchronous>, transform_indices = @transform_2, window_bounds = array<i64: 1, 128>}, {transform_indices = @transform_3, window_bounds = array<i64: 8, 128>}]} {
    %cst = arith.constant 0.000000e+00 : f32
    %0 = vector.broadcast %cst : f32 to vector<8x128xf32>
    %c0 = arith.constant 0 : index
    %c0_0 = arith.constant 0 : index
    %c0_1 = arith.constant 0 : index
    %1 = vector.load %arg1[%c0, %c0_0, %c0_1] : memref<16x8x256xbf16, #tpu.memory_space<vmem>>, vector<1x8x256xbf16>
    %2 = vector.shape_cast %1 : vector<1x8x256xbf16> to vector<8x256xbf16>
    %c0_2 = arith.constant 0 : index
    %c0_3 = arith.constant 0 : index
    %c0_4 = arith.constant 0 : index
    %3 = vector.load %arg2[%c0_2, %c0_3, %c0_4] : memref<16x256x128xbf16, #tpu.memory_space<vmem>>, vector<1x256x128xbf16>
    %4 = vector.shape_cast %3 : vector<1x256x128xbf16> to vector<256x128xbf16>
    %cst_5 = arith.constant dense<0.000000e+00> : vector<8x128xf32>
    %5 = tpu.matmul %2, %4, %cst_5 {dimension_numbers = #tpu.dot_dimension_numbers<[1], [0], [0], [1], [0, 0, 1, 1], [], []>} : vector<8x256xbf16>, vector<256x128xbf16>, vector<8x128xf32> -> vector<8x128xf32>
    %6 = arith.addf %0, %5 : vector<8x128xf32>
    %c1 = arith.constant 1 : index
    %c0_6 = arith.constant 0 : index
    %c0_7 = arith.constant 0 : index
    %7 = vector.load %arg1[%c1, %c0_6, %c0_7] : memref<16x8x256xbf16, #tpu.memory_space<vmem>>, vector<1x8x256xbf16>
    %8 = vector.shape_cast %7 : vector<1x8x256xbf16> to vector<8x256xbf16>
    %c1_8 = arith.constant 1 : index
    %c0_9 = arith.constant 0 : index
    %c0_10 = arith.constant 0 : index
    %9 = vector.load %arg2[%c1_8, %c0_9, %c0_10] : memref<16x256x128xbf16, #tpu.memory_space<vmem>>, vector<1x256x128xbf16>
    %10 = vector.shape_cast %9 : vector<1x256x128xbf16> to vector<256x128xbf16>
    %cst_11 = arith.constant dense<0.000000e+00> : vector<8x128xf32>
    %11 = tpu.matmul %8, %10, %cst_11 {dimension_numbers = #tpu.dot_dimension_numbers<[1], [0], [0], [1], [0, 0, 1, 1], [], []>} : vector<8x256xbf16>, vector<256x128xbf16>, vector<8x128xf32> -> vector<8x128xf32>
    %12 = arith.addf %6, %11 : vector<8x128xf32>
    %c2 = arith.constant 2 : index
    %c0_12 = arith.constant 0 : index
    %c0_13 = arith.constant 0 : index
    %13 = vector.load %arg1[%c2, %c0_12, %c0_13] : memref<16x8x256xbf16, #tpu.memory_space<vmem>>, vector<1x8x256xbf16>
    %14 = vector.shape_cast %13 : vector<1x8x256xbf16> to vector<8x256xbf16>
    %c2_14 = arith.constant 2 : index
    %c0_15 = arith.constant 0 : index
    %c0_16 = arith.constant 0 : index
    %15 = vector.load %arg2[%c2_14, %c0_15, %c0_16] : memref<16x256x128xbf16, #tpu.memory_space<vmem>>, vector<1x256x128xbf16>
    %16 = vector.shape_cast %15 : vector<1x256x128xbf16> to vector<256x128xbf16>
    %cst_17 = arith.constant dense<0.000000e+00> : vector<8x128xf32>
    %17 = tpu.matmul %14, %16, %cst_17 {dimension_numbers = #tpu.dot_dimension_numbers<[1], [0], [0], [1], [0, 0, 1, 1], [], []>} : vector<8x256xbf16>, vector<256x128xbf16>, vector<8x128xf32> -> vector<8x128xf32>
    %18 = arith.addf %12, %17 : vector<8x128xf32>
    %c3 = arith.constant 3 : index
    %c0_18 = arith.constant 0 : index
    %c0_19 = arith.constant 0 : index
    %19 = vector.load %arg1[%c3, %c0_18, %c0_19] : memref<16x8x256xbf16, #tpu.memory_space<vmem>>, vector<1x8x256xbf16>
    %20 = vector.shape_cast %19 : vector<1x8x256xbf16> to vector<8x256xbf16>
    %c3_20 = arith.constant 3 : index
    %c0_21 = arith.constant 0 : index
    %c0_22 = arith.constant 0 : index
    %21 = vector.load %arg2[%c3_20, %c0_21, %c0_22] : memref<16x256x128xbf16, #tpu.memory_space<vmem>>, vector<1x256x128xbf16>
    %22 = vector.shape_cast %21 : vector<1x256x128xbf16> to vector<256x128xbf16>
    %cst_23 = arith.constant dense<0.000000e+00> : vector<8x128xf32>
    %23 = tpu.matmul %20, %22, %cst_23 {dimension_numbers = #tpu.dot_dimension_numbers<[1], [0], [0], [1], [0, 0, 1, 1], [], []>} : vector<8x256xbf16>, vector<256x128xbf16>, vector<8x128xf32> -> vector<8x128xf32>
    %24 = arith.addf %18, %23 : vector<8x128xf32>
    %c4 = arith.constant 4 : index
    %c0_24 = arith.constant 0 : index
    %c0_25 = arith.constant 0 : index
    %25 = vector.load %arg1[%c4, %c0_24, %c0_25] : memref<16x8x256xbf16, #tpu.memory_space<vmem>>, vector<1x8x256xbf16>
    %26 = vector.shape_cast %25 : vector<1x8x256xbf16> to vector<8x256xbf16>
    %c4_26 = arith.constant 4 : index
    %c0_27 = arith.constant 0 : index
    %c0_28 = arith.constant 0 : index
    %27 = vector.load %arg2[%c4_26, %c0_27, %c0_28] : memref<16x256x128xbf16, #tpu.memory_space<vmem>>, vector<1x256x128xbf16>
    %28 = vector.shape_cast %27 : vector<1x256x128xbf16> to vector<256x128xbf16>
    %cst_29 = arith.constant dense<0.000000e+00> : vector<8x128xf32>
    %29 = tpu.matmul %26, %28, %cst_29 {dimension_numbers = #tpu.dot_dimension_numbers<[1], [0], [0], [1], [0, 0, 1, 1], [], []>} : vector<8x256xbf16>, vector<256x128xbf16>, vector<8x128xf32> -> vector<8x128xf32>
    %30 = arith.addf %24, %29 : vector<8x128xf32>
    %c5 = arith.constant 5 : index
    %c0_30 = arith.constant 0 : index
    %c0_31 = arith.constant 0 : index
    %31 = vector.load %arg1[%c5, %c0_30, %c0_31] : memref<16x8x256xbf16, #tpu.memory_space<vmem>>, vector<1x8x256xbf16>
    %32 = vector.shape_cast %31 : vector<1x8x256xbf16> to vector<8x256xbf16>
    %c5_32 = arith.constant 5 : index
    %c0_33 = arith.constant 0 : index
    %c0_34 = arith.constant 0 : index
    %33 = vector.load %arg2[%c5_32, %c0_33, %c0_34] : memref<16x256x128xbf16, #tpu.memory_space<vmem>>, vector<1x256x128xbf16>
    %34 = vector.shape_cast %33 : vector<1x256x128xbf16> to vector<256x128xbf16>
    %cst_35 = arith.constant dense<0.000000e+00> : vector<8x128xf32>
    %35 = tpu.matmul %32, %34, %cst_35 {dimension_numbers = #tpu.dot_dimension_numbers<[1], [0], [0], [1], [0, 0, 1, 1], [], []>} : vector<8x256xbf16>, vector<256x128xbf16>, vector<8x128xf32> -> vector<8x128xf32>
    %36 = arith.addf %30, %35 : vector<8x128xf32>
    %c6 = arith.constant 6 : index
    %c0_36 = arith.constant 0 : index
    %c0_37 = arith.constant 0 : index
    %37 = vector.load %arg1[%c6, %c0_36, %c0_37] : memref<16x8x256xbf16, #tpu.memory_space<vmem>>, vector<1x8x256xbf16>
    %38 = vector.shape_cast %37 : vector<1x8x256xbf16> to vector<8x256xbf16>
    %c6_38 = arith.constant 6 : index
    %c0_39 = arith.constant 0 : index
    %c0_40 = arith.constant 0 : index
    %39 = vector.load %arg2[%c6_38, %c0_39, %c0_40] : memref<16x256x128xbf16, #tpu.memory_space<vmem>>, vector<1x256x128xbf16>
    %40 = vector.shape_cast %39 : vector<1x256x128xbf16> to vector<256x128xbf16>
    %cst_41 = arith.constant dense<0.000000e+00> : vector<8x128xf32>
    %41 = tpu.matmul %38, %40, %cst_41 {dimension_numbers = #tpu.dot_dimension_numbers<[1], [0], [0], [1], [0, 0, 1, 1], [], []>} : vector<8x256xbf16>, vector<256x128xbf16>, vector<8x128xf32> -> vector<8x128xf32>
    %42 = arith.addf %36, %41 : vector<8x128xf32>
    %c7 = arith.constant 7 : index
    %c0_42 = arith.constant 0 : index
    %c0_43 = arith.constant 0 : index
    %43 = vector.load %arg1[%c7, %c0_42, %c0_43] : memref<16x8x256xbf16, #tpu.memory_space<vmem>>, vector<1x8x256xbf16>
    %44 = vector.shape_cast %43 : vector<1x8x256xbf16> to vector<8x256xbf16>
    %c7_44 = arith.constant 7 : index
    %c0_45 = arith.constant 0 : index
    %c0_46 = arith.constant 0 : index
    %45 = vector.load %arg2[%c7_44, %c0_45, %c0_46] : memref<16x256x128xbf16, #tpu.memory_space<vmem>>, vector<1x256x128xbf16>
    %46 = vector.shape_cast %45 : vector<1x256x128xbf16> to vector<256x128xbf16>
    %cst_47 = arith.constant dense<0.000000e+00> : vector<8x128xf32>
    %47 = tpu.matmul %44, %46, %cst_47 {dimension_numbers = #tpu.dot_dimension_numbers<[1], [0], [0], [1], [0, 0, 1, 1], [], []>} : vector<8x256xbf16>, vector<256x128xbf16>, vector<8x128xf32> -> vector<8x128xf32>
    %48 = arith.addf %42, %47 : vector<8x128xf32>
    %c8 = arith.constant 8 : index
    %c0_48 = arith.constant 0 : index
    %c0_49 = arith.constant 0 : index
    %49 = vector.load %arg1[%c8, %c0_48, %c0_49] : memref<16x8x256xbf16, #tpu.memory_space<vmem>>, vector<1x8x256xbf16>
    %50 = vector.shape_cast %49 : vector<1x8x256xbf16> to vector<8x256xbf16>
    %c8_50 = arith.constant 8 : index
    %c0_51 = arith.constant 0 : index
    %c0_52 = arith.constant 0 : index
    %51 = vector.load %arg2[%c8_50, %c0_51, %c0_52] : memref<16x256x128xbf16, #tpu.memory_space<vmem>>, vector<1x256x128xbf16>
    %52 = vector.shape_cast %51 : vector<1x256x128xbf16> to vector<256x128xbf16>
    %cst_53 = arith.constant dense<0.000000e+00> : vector<8x128xf32>
    %53 = tpu.matmul %50, %52, %cst_53 {dimension_numbers = #tpu.dot_dimension_numbers<[1], [0], [0], [1], [0, 0, 1, 1], [], []>} : vector<8x256xbf16>, vector<256x128xbf16>, vector<8x128xf32> -> vector<8x128xf32>
    %54 = arith.addf %48, %53 : vector<8x128xf32>
    %c9 = arith.constant 9 : index
    %c0_54 = arith.constant 0 : index
    %c0_55 = arith.constant 0 : index
    %55 = vector.load %arg1[%c9, %c0_54, %c0_55] : memref<16x8x256xbf16, #tpu.memory_space<vmem>>, vector<1x8x256xbf16>
    %56 = vector.shape_cast %55 : vector<1x8x256xbf16> to vector<8x256xbf16>
    %c9_56 = arith.constant 9 : index
    %c0_57 = arith.constant 0 : index
    %c0_58 = arith.constant 0 : index
    %57 = vector.load %arg2[%c9_56, %c0_57, %c0_58] : memref<16x256x128xbf16, #tpu.memory_space<vmem>>, vector<1x256x128xbf16>
    %58 = vector.shape_cast %57 : vector<1x256x128xbf16> to vector<256x128xbf16>
    %cst_59 = arith.constant dense<0.000000e+00> : vector<8x128xf32>
    %59 = tpu.matmul %56, %58, %cst_59 {dimension_numbers = #tpu.dot_dimension_numbers<[1], [0], [0], [1], [0, 0, 1, 1], [], []>} : vector<8x256xbf16>, vector<256x128xbf16>, vector<8x128xf32> -> vector<8x128xf32>
    %60 = arith.addf %54, %59 : vector<8x128xf32>
    %c10 = arith.constant 10 : index
    %c0_60 = arith.constant 0 : index
    %c0_61 = arith.constant 0 : index
    %61 = vector.load %arg1[%c10, %c0_60, %c0_61] : memref<16x8x256xbf16, #tpu.memory_space<vmem>>, vector<1x8x256xbf16>
    %62 = vector.shape_cast %61 : vector<1x8x256xbf16> to vector<8x256xbf16>
    %c10_62 = arith.constant 10 : index
    %c0_63 = arith.constant 0 : index
    %c0_64 = arith.constant 0 : index
    %63 = vector.load %arg2[%c10_62, %c0_63, %c0_64] : memref<16x256x128xbf16, #tpu.memory_space<vmem>>, vector<1x256x128xbf16>
    %64 = vector.shape_cast %63 : vector<1x256x128xbf16> to vector<256x128xbf16>
    %cst_65 = arith.constant dense<0.000000e+00> : vector<8x128xf32>
    %65 = tpu.matmul %62, %64, %cst_65 {dimension_numbers = #tpu.dot_dimension_numbers<[1], [0], [0], [1], [0, 0, 1, 1], [], []>} : vector<8x256xbf16>, vector<256x128xbf16>, vector<8x128xf32> -> vector<8x128xf32>
    %66 = arith.addf %60, %65 : vector<8x128xf32>
    %c11 = arith.constant 11 : index
    %c0_66 = arith.constant 0 : index
    %c0_67 = arith.constant 0 : index
    %67 = vector.load %arg1[%c11, %c0_66, %c0_67] : memref<16x8x256xbf16, #tpu.memory_space<vmem>>, vector<1x8x256xbf16>
    %68 = vector.shape_cast %67 : vector<1x8x256xbf16> to vector<8x256xbf16>
    %c11_68 = arith.constant 11 : index
    %c0_69 = arith.constant 0 : index
    %c0_70 = arith.constant 0 : index
    %69 = vector.load %arg2[%c11_68, %c0_69, %c0_70] : memref<16x256x128xbf16, #tpu.memory_space<vmem>>, vector<1x256x128xbf16>
    %70 = vector.shape_cast %69 : vector<1x256x128xbf16> to vector<256x128xbf16>
    %cst_71 = arith.constant dense<0.000000e+00> : vector<8x128xf32>
    %71 = tpu.matmul %68, %70, %cst_71 {dimension_numbers = #tpu.dot_dimension_numbers<[1], [0], [0], [1], [0, 0, 1, 1], [], []>} : vector<8x256xbf16>, vector<256x128xbf16>, vector<8x128xf32> -> vector<8x128xf32>
    %72 = arith.addf %66, %71 : vector<8x128xf32>
    %c12 = arith.constant 12 : index
    %c0_72 = arith.constant 0 : index
    %c0_73 = arith.constant 0 : index
    %73 = vector.load %arg1[%c12, %c0_72, %c0_73] : memref<16x8x256xbf16, #tpu.memory_space<vmem>>, vector<1x8x256xbf16>
    %74 = vector.shape_cast %73 : vector<1x8x256xbf16> to vector<8x256xbf16>
    %c12_74 = arith.constant 12 : index
    %c0_75 = arith.constant 0 : index
    %c0_76 = arith.constant 0 : index
    %75 = vector.load %arg2[%c12_74, %c0_75, %c0_76] : memref<16x256x128xbf16, #tpu.memory_space<vmem>>, vector<1x256x128xbf16>
    %76 = vector.shape_cast %75 : vector<1x256x128xbf16> to vector<256x128xbf16>
    %cst_77 = arith.constant dense<0.000000e+00> : vector<8x128xf32>
    %77 = tpu.matmul %74, %76, %cst_77 {dimension_numbers = #tpu.dot_dimension_numbers<[1], [0], [0], [1], [0, 0, 1, 1], [], []>} : vector<8x256xbf16>, vector<256x128xbf16>, vector<8x128xf32> -> vector<8x128xf32>
    %78 = arith.addf %72, %77 : vector<8x128xf32>
    %c13 = arith.constant 13 : index
    %c0_78 = arith.constant 0 : index
    %c0_79 = arith.constant 0 : index
    %79 = vector.load %arg1[%c13, %c0_78, %c0_79] : memref<16x8x256xbf16, #tpu.memory_space<vmem>>, vector<1x8x256xbf16>
    %80 = vector.shape_cast %79 : vector<1x8x256xbf16> to vector<8x256xbf16>
    %c13_80 = arith.constant 13 : index
    %c0_81 = arith.constant 0 : index
    %c0_82 = arith.constant 0 : index
    %81 = vector.load %arg2[%c13_80, %c0_81, %c0_82] : memref<16x256x128xbf16, #tpu.memory_space<vmem>>, vector<1x256x128xbf16>
    %82 = vector.shape_cast %81 : vector<1x256x128xbf16> to vector<256x128xbf16>
    %cst_83 = arith.constant dense<0.000000e+00> : vector<8x128xf32>
    %83 = tpu.matmul %80, %82, %cst_83 {dimension_numbers = #tpu.dot_dimension_numbers<[1], [0], [0], [1], [0, 0, 1, 1], [], []>} : vector<8x256xbf16>, vector<256x128xbf16>, vector<8x128xf32> -> vector<8x128xf32>
    %84 = arith.addf %78, %83 : vector<8x128xf32>
    %c14 = arith.constant 14 : index
    %c0_84 = arith.constant 0 : index
    %c0_85 = arith.constant 0 : index
    %85 = vector.load %arg1[%c14, %c0_84, %c0_85] : memref<16x8x256xbf16, #tpu.memory_space<vmem>>, vector<1x8x256xbf16>
    %86 = vector.shape_cast %85 : vector<1x8x256xbf16> to vector<8x256xbf16>
    %c14_86 = arith.constant 14 : index
    %c0_87 = arith.constant 0 : index
    %c0_88 = arith.constant 0 : index
    %87 = vector.load %arg2[%c14_86, %c0_87, %c0_88] : memref<16x256x128xbf16, #tpu.memory_space<vmem>>, vector<1x256x128xbf16>
    %88 = vector.shape_cast %87 : vector<1x256x128xbf16> to vector<256x128xbf16>
    %cst_89 = arith.constant dense<0.000000e+00> : vector<8x128xf32>
    %89 = tpu.matmul %86, %88, %cst_89 {dimension_numbers = #tpu.dot_dimension_numbers<[1], [0], [0], [1], [0, 0, 1, 1], [], []>} : vector<8x256xbf16>, vector<256x128xbf16>, vector<8x128xf32> -> vector<8x128xf32>
    %90 = arith.addf %84, %89 : vector<8x128xf32>
    %c15 = arith.constant 15 : index
    %c0_90 = arith.constant 0 : index
    %c0_91 = arith.constant 0 : index
    %91 = vector.load %arg1[%c15, %c0_90, %c0_91] : memref<16x8x256xbf16, #tpu.memory_space<vmem>>, vector<1x8x256xbf16>
    %92 = vector.shape_cast %91 : vector<1x8x256xbf16> to vector<8x256xbf16>
    %c15_92 = arith.constant 15 : index
    %c0_93 = arith.constant 0 : index
    %c0_94 = arith.constant 0 : index
    %93 = vector.load %arg2[%c15_92, %c0_93, %c0_94] : memref<16x256x128xbf16, #tpu.memory_space<vmem>>, vector<1x256x128xbf16>
    %94 = vector.shape_cast %93 : vector<1x256x128xbf16> to vector<256x128xbf16>
    %cst_95 = arith.constant dense<0.000000e+00> : vector<8x128xf32>
    %95 = tpu.matmul %92, %94, %cst_95 {dimension_numbers = #tpu.dot_dimension_numbers<[1], [0], [0], [1], [0, 0, 1, 1], [], []>} : vector<8x256xbf16>, vector<256x128xbf16>, vector<8x128xf32> -> vector<8x128xf32>
    %96 = arith.addf %90, %95 : vector<8x128xf32>
    %c0_96 = arith.constant 0 : index
    %c0_97 = arith.constant 0 : index
    %97 = vector.load %arg3[%c0_96, %c0_97] : memref<1x128xf32, #tpu.memory_space<vmem>>, vector<1x128xf32>
    %98 = vector.broadcast %97 : vector<1x128xf32> to vector<8x128xf32>
    %99 = arith.addf %96, %98 : vector<8x128xf32>
    %c0_98 = arith.constant 0 : index
    %c0_99 = arith.constant 0 : index
    %100 = vector.load %arg4[%c0_98, %c0_99] : memref<8x128xf32, #tpu.memory_space<vmem>>, vector<8x128xf32>
    tpu.vector_store %arg4[%c0_98, %c0_99], %99 {strides = array<i32>} : memref<8x128xf32, #tpu.memory_space<vmem>>, vector<8x128xf32>,
    return
  }
  func.func @transform_0(%arg0: i32) -> (i32, i32, i32) {
    %c0_i32 = arith.constant 0 : i32
    %c0_i32_0 = arith.constant 0 : i32
    %c0_i32_1 = arith.constant 0 : i32
    return %c0_i32, %arg0, %c0_i32_0 : i32, i32, i32
  }
  func.func @transform_1(%arg0: i32) -> (i32, i32, i32) {
    %c0_i32 = arith.constant 0 : i32
    %c0_i32_0 = arith.constant 0 : i32
    %c0_i32_1 = arith.constant 0 : i32
    %c0_i32_2 = arith.constant 0 : i32
    return %c0_i32, %c0_i32_0, %c0_i32_1 : i32, i32, i32
  }
  func.func @transform_2(%arg0: i32) -> (i32, i32) {
    %c0_i32 = arith.constant 0 : i32
    %c0_i32_0 = arith.constant 0 : i32
    %c0_i32_1 = arith.constant 0 : i32
    return %c0_i32, %c0_i32_0 : i32, i32
  }
  func.func @transform_3(%arg0: i32) -> (i32, i32) {
    %c0_i32 = arith.constant 0 : i32
    %c0_i32_0 = arith.constant 0 : i32
    return %arg0, %c0_i32 : i32, i32
  }
}

</mosaic_0001>

<bundles_post_ra>
// kernel: squeeze.120
= control target key start
LH: loop header
LB: loop body
LE: loop exit
PB: predicated region body
PF: predicated region fallthrough
CT: control target
= control target key end

     0   :  { %vm515_vm0 = vcmask 1047556   ;;  %s1407_s9 = smov 112   ;;  %s1408_s10 = smov 80   ;;  %vm517_vm1 = vcmask 130048   ;;  %vm611_vm2 = vcmask 917248   ;;  %vm561_vm3 = vcmask 1048448   ;;  %s1656_s0 = inlined_call_operand.vmem [shape: bf16[16,1,16,16], index: 0, kind: input, shape index: {}]   ;;  %s1657_s1 = inlined_call_operand.vmem [shape: bf16[1,4096], index: 1, kind: output, shape index: {}]  }
   0x1   :  { %v1321_v0 = vld [vmem:[%s1656_s0 + $0x38] sm:$0xff]   ;;  %v1322_v1 = vld [vmem:[%s1656_s0 + $0x30] sm:$0xff]   ;;  %v1323_v2 = vld [vmem:[%s1656_s0 + $0x28] sm:$0xff]   ;;  %s1409_s11 = smov 64   ;;  %s1410_s12 = smov 48   ;;  %vm661_vm4 = vcmask 786048  }
   0x2   :  { %v1283_v3 = vunpack.c.l.bf16 %v1321_v0  ;;  %v1284_v4 = vunpack.c.h.bf16 %v1321_v0  ;;  %v1287_v5 = vunpack.c.l.bf16 %v1322_v1  ;;  %v1288_v6 = vunpack.c.h.bf16 %v1322_v1  ;;  %v1324_v7 = vld [vmem:[%s1656_s0 + $0x20] sm:$0xff]   ;;  %v1325_v8 = vld [vmem:[%s1656_s0 + $0x18] sm:$0xff]   ;;  %v1326_v9 = vld [vmem:[%s1656_s0 + $0x10] sm:$0xff]   ;;  %s1411_s13 = smov 32   ;;  %s1412_s14 = smov 16  }
   0x3   :  { %v1291_v10 = vunpack.c.l.bf16 %v1323_v2  ;;  %v1292_v11 = vunpack.c.h.bf16 %v1323_v2  ;;  %v1295_v12 = vunpack.c.l.bf16 %v1324_v7  ;;  %v1296_v13 = vunpack.c.h.bf16 %v1324_v7  ;;  %v1327_v14 = vld [vmem:[%s1656_s0 + $0x8] sm:$0xff]   ;;  %v1310_v15 = vld [vmem:[%s1656_s0] sm:$0xff]   ;;  %v1313_v16 = vld [vmem:[%s1656_s0 + $0x78] sm:$0xff]  }
   0x4   :  { %276 = vst [vmem:[#allocation1 + $0x78] sm:$0xff] %v1284_v4  ;;  %292 = vst [vmem:[#allocation1 + $0x70] sm:$0xff] %v1283_v3  ;;  %v1299_v17 = vunpack.c.l.bf16 %v1325_v8  ;;  %v1300_v18 = vunpack.c.h.bf16 %v1325_v8  ;;  %v1303_v19 = vunpack.c.l.bf16 %v1326_v9  ;;  %v1304_v20 = vunpack.c.h.bf16 %v1326_v9  ;;  %v1314_v21 = vld [vmem:[%s1656_s0 + $0x70] sm:$0xff]   ;;  %v1315_v22 = vld [vmem:[%s1656_s0 + $0x68] sm:$0xff]  }
   0x5   :  { %308 = vst [vmem:[#allocation1 + $0x68] sm:$0xff] %v1288_v6  ;;  %324 = vst [vmem:[#allocation1 + $0x60] sm:$0xff] %v1287_v5  ;;  %v1316_v23 = vld [vmem:[%s1656_s0 + $0x60] sm:$0xff]   ;;  %v1307_v24 = vunpack.c.l.bf16 %v1327_v14  ;;  %v1308_v25 = vunpack.c.h.bf16 %v1327_v14  ;;  %v1311_v26 = vunpack.c.l.bf16 %v1310_v15  ;;  %v1312_v27 = vunpack.c.h.bf16 %v1310_v15  ;;  %v1317_v28 = vld [vmem:[%s1656_s0 + $0x58] sm:$0xff]  }
   0x6   :  { %340 = vst [vmem:[#allocation1 + $0x58] sm:$0xff] %v1292_v11  ;;  %356 = vst [vmem:[#allocation1 + $0x50] sm:$0xff] %v1291_v10  ;;  %v1318_v29 = vld [vmem:[%s1656_s0 + $0x50] sm:$0xff]   ;;  %v1251_v30 = vunpack.c.l.bf16 %v1313_v16  ;;  %v1252_v31 = vunpack.c.h.bf16 %v1313_v16  ;;  %v1255_v32 = vunpack.c.l.bf16 %v1314_v21  ;;  %v1256_v33 = vunpack.c.h.bf16 %v1314_v21  ;;  %v1319_v34 = vld [vmem:[%s1656_s0 + $0x48] sm:$0xff]  }
   0x7   :  { %372 = vst [vmem:[#allocation1 + $0x48] sm:$0xff] %v1296_v13  ;;  %388 = vst [vmem:[#allocation1 + $0x40] sm:$0xff] %v1295_v12  ;;  %v1320_v35 = vld [vmem:[%s1656_s0 + $0x40] sm:$0xff]   ;;  %v1259_v36 = vunpack.c.l.bf16 %v1315_v22  ;;  %v1260_v37 = vunpack.c.h.bf16 %v1315_v22  ;;  %v1263_v38 = vunpack.c.l.bf16 %v1316_v23  ;;  %v1264_v39 = vunpack.c.h.bf16 %v1316_v23  ;;  %s1406_s0 = smov 96  }
   0x8   :  { %404 = vst [vmem:[#allocation1 + $0x38] sm:$0xff] %v1300_v18  ;;  %420 = vst [vmem:[#allocation1 + $0x30] sm:$0xff] %v1299_v17  ;;  %v1267_v40 = vunpack.c.l.bf16 %v1317_v28  ;;  %v1268_v41 = vunpack.c.h.bf16 %v1317_v28  ;;  %v1271_v42 = vunpack.c.l.bf16 %v1318_v29  ;;  %v1272_v43 = vunpack.c.h.bf16 %v1318_v29 }
   0x9   :  { %436 = vst [vmem:[#allocation1 + $0x28] sm:$0xff] %v1304_v20  ;;  %452 = vst [vmem:[#allocation1 + $0x20] sm:$0xff] %v1303_v19  ;;  %v1275_v44 = vunpack.c.l.bf16 %v1319_v34  ;;  %v1276_v45 = vunpack.c.h.bf16 %v1319_v34  ;;  %v1279_v46 = vunpack.c.l.bf16 %v1320_v35  ;;  %v1280_v47 = vunpack.c.h.bf16 %v1320_v35 }
   0xa   :  { %468 = vst [vmem:[#allocation1 + $0x18] sm:$0xff] %v1308_v25  ;;  %484 = vst [vmem:[#allocation1 + $0x10] sm:$0xff] %v1307_v24  ;;  %vm711_vm5 = vcmask 654848   ;;  %vm761_vm6 = vcmask 523648   ;;  %vm811_vm7 = vcmask 392448   ;;  %vm861_vm8 = vcmask 261248  }
   0xb   :  { %499 = vst [vmem:[#allocation1 + $0x8] sm:$0xff] %v1312_v27  ;;  %512 = vst [vmem:[#allocation1] sm:$0xff] %v1311_v26 }
   0xc   :  { %20 = vst [vmem:[#allocation1 + $0xf8] sm:$0xff] %v1252_v31  ;;  %36 = vst [vmem:[#allocation1 + $0xf0] sm:$0xff] %v1251_v30  ;;  %v617_v48 = vld [vmem:[#allocation1 + $0x46] ss:$8 sm:$0xf0]  }
   0xd   :  { %52 = vst [vmem:[#allocation1 + $0xe8] sm:$0xff] %v1256_v33  ;;  %68 = vst [vmem:[#allocation1 + $0xe0] sm:$0xff] %v1255_v32  ;;  %v567_v49 = vld [vmem:[#allocation1 + $0x47] ss:$8 sm:$0xf0]  }
   0xe   :  { %84 = vst [vmem:[#allocation1 + $0xd8] sm:$0xff] %v1260_v37  ;;  %100 = vst [vmem:[#allocation1 + $0xd0] sm:$0xff] %v1259_v36  ;;  %v615_v50 = vld [vmem:[#allocation1 + $0x46] ss:$8 sm:$0xf]  }
   0xf   :  { %116 = vst [vmem:[#allocation1 + $0xc8] sm:$0xff] %v1264_v39  ;;  %132 = vst [vmem:[#allocation1 + $0xc0] sm:$0xff] %v1263_v38  ;;  %v565_v51 = vld [vmem:[#allocation1 + $0x47] ss:$8 sm:$0xf]   ;;  %v619_v53 = vsel %vm515_vm0, %v617_v48, %v615_v50 }
  0x10   :  { %148 = vst [vmem:[#allocation1 + $0xb8] sm:$0xff] %v1268_v41  ;;  %164 = vst [vmem:[#allocation1 + $0xb0] sm:$0xff] %v1267_v40  ;;  %v606_v52 = vld [vmem:[#allocation1 + $0x6] ss:$8 sm:$0xf0]   ;;  %v569_v55 = vsel %vm515_vm0, %v567_v49, %v565_v51 }
  0x11   :  { %180 = vst [vmem:[#allocation1 + $0xa8] sm:$0xff] %v1272_v43  ;;  %196 = vst [vmem:[#allocation1 + $0xa0] sm:$0xff] %v1271_v42  ;;  %v556_v54 = vld [vmem:[#allocation1 + $0x7] ss:$8 sm:$0xf0]  }
  0x12   :  { %212 = vst [vmem:[#allocation1 + $0x98] sm:$0xff] %v1276_v45  ;;  %228 = vst [vmem:[#allocation1 + $0x90] sm:$0xff] %v1275_v44  ;;  %v604_v56 = vld [vmem:[#allocation1 + $0x6] ss:$8 sm:$0xf]  }
  0x13   :  { %244 = vst [vmem:[#allocation1 + $0x88] sm:$0xff] %v1280_v47  ;;  %260 = vst [vmem:[#allocation1 + $0x80] sm:$0xff] %v1279_v46  ;;  %v554_v57 = vld [vmem:[#allocation1 + $0x7] ss:$8 sm:$0xf]   ;;  %v608_v58 = vsel %vm515_vm0, %v606_v52, %v604_v56 }
  0x14   :  { %v558_v59 = vsel %vm515_vm0, %v556_v54, %v554_v57  ;;  %v643_v60 = vld [vmem:[#allocation1 + $0xc6] ss:$8 sm:$0xf0]   ;;  %v593_v61 = vld [vmem:[#allocation1 + $0xc7] ss:$8 sm:$0xf0]   ;;  %v1346_v62 = vpack.i.bf16 %v619_v53, %v608_v58 }
  0x15   :  { %v1336_v63 = vpack.i.bf16 %v569_v55, %v558_v59  ;;  %v693_v16 = vld [vmem:[#allocation1 + $0xc5] ss:$8 sm:$0xf0]   ;;  %v743_v30 = vld [vmem:[#allocation1 + $0xc4] ss:$8 sm:$0xf0]  }
  0x16   :  { %v641_v0 = vld [vmem:[#allocation1 + $0xc6] ss:$8 sm:$0xf]   ;;  %v591_v1 = vld [vmem:[#allocation1 + $0xc7] ss:$8 sm:$0xf]   ;;  %1347 = vrot.lane.b32.xlu1 %v1346_v62, %s1406_s0 }
  0x17   :  { %v645_v3 = vsel %vm515_vm0, %v643_v60, %v641_v0  ;;  %v595_v5 = vsel %vm515_vm0, %v593_v61, %v591_v1  ;;  %1337 = vrot.lane.b32.xlu0 %v1336_v63, %s1407_s9  ;;  %v691_v15 = vld [vmem:[#allocation1 + $0xc5] ss:$8 sm:$0xf]   ;;  %v741_v29 = vld [vmem:[#allocation1 + $0xc4] ss:$8 sm:$0xf]  }
  0x18   :  { %v630_v2 = vld [vmem:[#allocation1 + $0x86] ss:$8 sm:$0xf0]   ;;  %v580_v4 = vld [vmem:[#allocation1 + $0x87] ss:$8 sm:$0xf0]   ;;  %v695_v17 = vsel %vm515_vm0, %v693_v16, %v691_v15  ;;  %v745_v31 = vsel %vm515_vm0, %v743_v30, %v741_v29 }
  0x19   :  { %v680_v11 = vld [vmem:[#allocation1 + $0x85] ss:$8 sm:$0xf0]   ;;  %v730_v26 = vld [vmem:[#allocation1 + $0x84] ss:$8 sm:$0xf0]  }
  0x1a   :  { %v628_v6 = vld [vmem:[#allocation1 + $0x86] ss:$8 sm:$0xf]   ;;  %v578_v7 = vld [vmem:[#allocation1 + $0x87] ss:$8 sm:$0xf]  }
  0x1b   :  { %v632_v8 = vsel %vm515_vm0, %v630_v2, %v628_v6  ;;  %v582_v9 = vsel %vm515_vm0, %v580_v4, %v578_v7  ;;  %v678_v10 = vld [vmem:[#allocation1 + $0x85] ss:$8 sm:$0xf]   ;;  %v728_v25 = vld [vmem:[#allocation1 + $0x84] ss:$8 sm:$0xf]  }
  0x1c   :  { %v1351_v12 = vpack.i.bf16 %v645_v3, %v632_v8  ;;  %v1341_v13 = vpack.i.bf16 %v595_v5, %v582_v9  ;;  %v682_v14 = vsel %vm515_vm0, %v680_v11, %v678_v10  ;;  %v654_v18 = vld [vmem:[#allocation1 + $0x5] ss:$8 sm:$0xf]   ;;  %v732_v28 = vsel %vm515_vm0, %v730_v26, %v728_v25  ;;  %v704_v32 = vld [vmem:[#allocation1 + $0x4] ss:$8 sm:$0xf]  }
  0x1d   :  { %v656_v19 = vld [vmem:[#allocation1 + $0x5] ss:$8 sm:$0xf0]   ;;  %v1361_v20 = vpack.i.bf16 %v695_v17, %v682_v14  ;;  %v706_v33 = vld [vmem:[#allocation1 + $0x4] ss:$8 sm:$0xf0]   ;;  %v1371_v34 = vpack.i.bf16 %v745_v31, %v732_v28 }
  0x1e   :  { %1352 = vrot.lane.b32.xlu1 %v1351_v12, %s1406_s0  ;;  %1342 = vrot.lane.b32.xlu0 %v1341_v13, %s1407_s9  ;;  %v658_v21 = vsel %vm515_vm0, %v656_v19, %v654_v18  ;;  %v665_v22 = vld [vmem:[#allocation1 + $0x45] ss:$8 sm:$0xf]   ;;  %v708_v35 = vsel %vm515_vm0, %v706_v33, %v704_v32  ;;  %v715_v36 = vld [vmem:[#allocation1 + $0x44] ss:$8 sm:$0xf]  }
  0x1f   :  { %v667_v23 = vld [vmem:[#allocation1 + $0x45] ss:$8 sm:$0xf0]   ;;  %v717_v37 = vld [vmem:[#allocation1 + $0x44] ss:$8 sm:$0xf0]  }
  0x20   :  { %v669_v24 = vsel %vm515_vm0, %v667_v23, %v665_v22  ;;  %v719_v38 = vsel %vm515_vm0, %v717_v37, %v715_v36  ;;  %v778_v39 = vld [vmem:[#allocation1 + $0x83] ss:$8 sm:$0xf]   ;;  %v828_v53 = vld [vmem:[#allocation1 + $0x82] ss:$8 sm:$0xf]  }
  0x21   :  { %v1356_v27 = vpack.i.bf16 %v669_v24, %v658_v21  ;;  %v780_v40 = vld [vmem:[#allocation1 + $0x83] ss:$8 sm:$0xf0]   ;;  %v1366_v41 = vpack.i.bf16 %v719_v38, %v708_v35  ;;  %v830_v54 = vld [vmem:[#allocation1 + $0x82] ss:$8 sm:$0xf0]  }
  0x22   :  { %1362 = vrot.lane.b32.xlu1 %v1361_v20, %s1408_s10  ;;  %v782_v42 = vsel %vm515_vm0, %v780_v40, %v778_v39  ;;  %v791_v43 = vld [vmem:[#allocation1 + $0xc3] ss:$8 sm:$0xf]   ;;  %v832_v56 = vsel %vm515_vm0, %v830_v54, %v828_v53  ;;  %v841_v57 = vld [vmem:[#allocation1 + $0xc2] ss:$8 sm:$0xf]  }
  0x23   :  { %1357 = vrot.lane.b32.xlu0 %v1356_v27, %s1408_s10  ;;  %v793_v44 = vld [vmem:[#allocation1 + $0xc3] ss:$8 sm:$0xf0]   ;;  %v843_v58 = vld [vmem:[#allocation1 + $0xc2] ss:$8 sm:$0xf0]  }
  0x24   :  { %v795_v45 = vsel %vm515_vm0, %v793_v44, %v791_v43  ;;  %v754_v46 = vld [vmem:[#allocation1 + $0x3] ss:$8 sm:$0xf]   ;;  %v845_v59 = vsel %vm515_vm0, %v843_v58, %v841_v57  ;;  %v804_v60 = vld [vmem:[#allocation1 + $0x2] ss:$8 sm:$0xf]  }
  0x25   :  { %v756_v47 = vld [vmem:[#allocation1 + $0x3] ss:$8 sm:$0xf0]   ;;  %v1381_v48 = vpack.i.bf16 %v795_v45, %v782_v42  ;;  %v806_v61 = vld [vmem:[#allocation1 + $0x2] ss:$8 sm:$0xf0]   ;;  %v1391_v62 = vpack.i.bf16 %v845_v59, %v832_v56 }
  0x26   :  { %1372 = vrot.lane.b32.xlu1 %v1371_v34, %s1409_s11  ;;  %v758_v49 = vsel %vm515_vm0, %v756_v47, %v754_v46  ;;  %v765_v50 = vld [vmem:[#allocation1 + $0x43] ss:$8 sm:$0xf]   ;;  %v808_v63 = vsel %vm515_vm0, %v806_v61, %v804_v60  ;;  %v815_v0 = vld [vmem:[#allocation1 + $0x42] ss:$8 sm:$0xf]  }
  0x27   :  { %1367 = vrot.lane.b32.xlu0 %v1366_v41, %s1409_s11  ;;  %v767_v51 = vld [vmem:[#allocation1 + $0x43] ss:$8 sm:$0xf0]   ;;  %v817_v1 = vld [vmem:[#allocation1 + $0x42] ss:$8 sm:$0xf0]  }
  0x28   :  { %v769_v52 = vsel %vm515_vm0, %v767_v51, %v765_v50  ;;  %v819_v2 = vsel %vm515_vm0, %v817_v1, %v815_v0  ;;  %v878_v3 = vld [vmem:[#allocation1 + $0x81] ss:$8 sm:$0xf]   ;;  %v513_v17 = vld [vmem:[#allocation1] ss:$8 sm:$0xf]  }
  0x29   :  { %v1376_v55 = vpack.i.bf16 %v769_v52, %v758_v49  ;;  %v880_v4 = vld [vmem:[#allocation1 + $0x81] ss:$8 sm:$0xf0]   ;;  %v1386_v5 = vpack.i.bf16 %v819_v2, %v808_v63  ;;  %v514_v18 = vld [vmem:[#allocation1] ss:$8 sm:$0xf0]  }
  0x2a   :  { %1382 = vrot.lane.b32.xlu1 %v1381_v48, %s1410_s12  ;;  %v882_v6 = vsel %vm515_vm0, %v880_v4, %v878_v3  ;;  %v891_v7 = vld [vmem:[#allocation1 + $0xc1] ss:$8 sm:$0xf]   ;;  %v516_v20 = vsel %vm515_vm0, %v514_v18, %v513_v17  ;;  %v521_v21 = vld [vmem:[#allocation1 + $0x40] ss:$8 sm:$0xf]  }
  0x2b   :  { %1377 = vrot.lane.b32.xlu0 %v1376_v55, %s1410_s12  ;;  %v893_v8 = vld [vmem:[#allocation1 + $0xc1] ss:$8 sm:$0xf0]   ;;  %v523_v22 = vld [vmem:[#allocation1 + $0x40] ss:$8 sm:$0xf0]  }
  0x2c   :  { %v895_v9 = vsel %vm515_vm0, %v893_v8, %v891_v7  ;;  %v854_v10 = vld [vmem:[#allocation1 + $0x1] ss:$8 sm:$0xf]   ;;  %518 = vst.msk [vmem:[#allocation0] ss:$8 sm:$0xf] %vm517_vm1, %v516_v20   ;;  %v525_v23 = vsel %vm515_vm0, %v523_v22, %v521_v21 }
  0x2d   :  { %v856_v11 = vld [vmem:[#allocation1 + $0x1] ss:$8 sm:$0xf0]   ;;  %v1401_v12 = vpack.i.bf16 %v895_v9, %v882_v6  ;;  %519 = vst.msk [vmem:[#allocation0] ss:$8 sm:$0xf0] %vm517_vm1, %v516_v20  }
  0x2e   :  { %1392 = vrot.lane.b32.xlu1 %v1391_v62, %s1411_s13  ;;  %v858_v13 = vsel %vm515_vm0, %v856_v11, %v854_v10  ;;  %v865_v14 = vld [vmem:[#allocation1 + $0x41] ss:$8 sm:$0xf]   ;;  %v532_v24 = vld [vmem:[#allocation1 + $0x80] ss:$8 sm:$0xf]  }
  0x2f   :  { %1387 = vrot.lane.b32.xlu0 %v1386_v5, %s1411_s13  ;;  %v867_v15 = vld [vmem:[#allocation1 + $0x41] ss:$8 sm:$0xf0]   ;;  %v534_v25 = vld [vmem:[#allocation1 + $0x80] ss:$8 sm:$0xf0]  }
  0x30   :  { %v869_v16 = vsel %vm515_vm0, %v867_v15, %v865_v14  ;;  %528 = vst.msk [vmem:[#allocation0 + $0x40] ss:$8 sm:$0xf] %vm517_vm1, %v525_v23   ;;  %530 = vst.msk [vmem:[#allocation0 + $0x40] ss:$8 sm:$0xf0] %vm517_vm1, %v525_v23   ;;  %v536_v26 = vsel %vm515_vm0, %v534_v25, %v532_v24 }
  0x31   :  { %v1396_v19 = vpack.i.bf16 %v869_v16, %v858_v13  ;;  %v543_v27 = vld [vmem:[#allocation1 + $0xc0] ss:$8 sm:$0xf]   ;;  %539 = vst.msk [vmem:[#allocation0 + $0x80] ss:$8 sm:$0xf] %vm517_vm1, %v536_v26  }
  0x32   :  { %1402 = vrot.lane.b32.xlu1 %v1401_v12, %s1412_s14  ;;  %v545_v28 = vld [vmem:[#allocation1 + $0xc0] ss:$8 sm:$0xf0]   ;;  %541 = vst.msk [vmem:[#allocation0 + $0x80] ss:$8 sm:$0xf0] %vm517_vm1, %v536_v26  }
  0x33   :  { %1397 = vrot.lane.b32.xlu0 %v1396_v19, %s1412_s14  ;;  %v547_v29 = vsel %vm515_vm0, %v545_v28, %v543_v27  ;;  %v1413_v11 = vmov 0.0  }
  0x34   :  { %550 = vst.msk [vmem:[#allocation0 + $0xc0] ss:$8 sm:$0xf] %vm517_vm1, %v547_v29   ;;  %552 = vst.msk [vmem:[#allocation0 + $0xc0] ss:$8 sm:$0xf0] %vm517_vm1, %v547_v29  }
  0x88   :  { %v1348_v30 = vpop.permute.xlu1 %1347 }
  0x89   :  { %v1338_v31 = vpop.permute.xlu0 %1337  ;;  %v1350_v32 = vunpack.i.h.bf16 %v1348_v30  ;;  %v1349_v33 = vunpack.i.l.bf16 %v1348_v30 }
  0x8a   :  { %v1340_v34 = vunpack.i.h.bf16 %v1338_v31  ;;  %v1339_v35 = vunpack.i.l.bf16 %v1338_v31 }
  0x8c   :  { %562 = vst.msk [vmem:[#allocation0] ss:$8 sm:$0xf] %vm561_vm3, %v1339_v35   ;;  %563 = vst.msk [vmem:[#allocation0] ss:$8 sm:$0xf0] %vm561_vm3, %v1339_v35  }
  0x8d   :  { %574 = vst.msk [vmem:[#allocation0 + $0x40] ss:$8 sm:$0xf] %vm561_vm3, %v1340_v34   ;;  %576 = vst.msk [vmem:[#allocation0 + $0x40] ss:$8 sm:$0xf0] %vm561_vm3, %v1340_v34  }
  0x8e   :  { %612 = vst.msk [vmem:[#allocation0] ss:$8 sm:$0xf] %vm611_vm2, %v1349_v33   ;;  %613 = vst.msk [vmem:[#allocation0] ss:$8 sm:$0xf0] %vm611_vm2, %v1349_v33  }
  0x8f   :  { %624 = vst.msk [vmem:[#allocation0 + $0x40] ss:$8 sm:$0xf] %vm611_vm2, %v1350_v32   ;;  %626 = vst.msk [vmem:[#allocation0 + $0x40] ss:$8 sm:$0xf0] %vm611_vm2, %v1350_v32  }
  0x90   :  { %v1353_v36 = vpop.permute.xlu1 %1352  ;;  %v1343_v37 = vpop.permute.xlu0 %1342 }
  0x91   :  { %v1355_v38 = vunpack.i.h.bf16 %v1353_v36  ;;  %v1354_v39 = vunpack.i.l.bf16 %v1353_v36  ;;  %v1345_v40 = vunpack.i.h.bf16 %v1343_v37  ;;  %v1344_v41 = vunpack.i.l.bf16 %v1343_v37 }
  0x93   :  { %587 = vst.msk [vmem:[#allocation0 + $0x80] ss:$8 sm:$0xf] %vm561_vm3, %v1344_v41   ;;  %589 = vst.msk [vmem:[#allocation0 + $0x80] ss:$8 sm:$0xf0] %vm561_vm3, %v1344_v41  }
  0x94   :  { %600 = vst.msk [vmem:[#allocation0 + $0xc0] ss:$8 sm:$0xf] %vm561_vm3, %v1345_v40   ;;  %602 = vst.msk [vmem:[#allocation0 + $0xc0] ss:$8 sm:$0xf0] %vm561_vm3, %v1345_v40   ;;  %v1363_v42 = vpop.permute.xlu1 %1362 }
  0x95   :  { %637 = vst.msk [vmem:[#allocation0 + $0x80] ss:$8 sm:$0xf] %vm611_vm2, %v1354_v39   ;;  %639 = vst.msk [vmem:[#allocation0 + $0x80] ss:$8 sm:$0xf0] %vm611_vm2, %v1354_v39   ;;  %v1358_v43 = vpop.permute.xlu0 %1357  ;;  %v1365_v44 = vunpack.i.h.bf16 %v1363_v42  ;;  %v1364_v45 = vunpack.i.l.bf16 %v1363_v42 }
  0x96   :  { %650 = vst.msk [vmem:[#allocation0 + $0xc0] ss:$8 sm:$0xf] %vm611_vm2, %v1355_v38   ;;  %652 = vst.msk [vmem:[#allocation0 + $0xc0] ss:$8 sm:$0xf0] %vm611_vm2, %v1355_v38   ;;  %v1360_v46 = vunpack.i.h.bf16 %v1358_v43  ;;  %v1359_v47 = vunpack.i.l.bf16 %v1358_v43 }
  0x97   :  { %687 = vst.msk [vmem:[#allocation0 + $0x80] ss:$8 sm:$0xf] %vm661_vm4, %v1364_v45   ;;  %689 = vst.msk [vmem:[#allocation0 + $0x80] ss:$8 sm:$0xf0] %vm661_vm4, %v1364_v45  }
  0x98   :  { %700 = vst.msk [vmem:[#allocation0 + $0xc0] ss:$8 sm:$0xf] %vm661_vm4, %v1365_v44   ;;  %702 = vst.msk [vmem:[#allocation0 + $0xc0] ss:$8 sm:$0xf0] %vm661_vm4, %v1365_v44   ;;  %v1373_v48 = vpop.permute.xlu1 %1372 }
  0x99   :  { %674 = vst.msk [vmem:[#allocation0 + $0x40] ss:$8 sm:$0xf] %vm661_vm4, %v1360_v46   ;;  %676 = vst.msk [vmem:[#allocation0 + $0x40] ss:$8 sm:$0xf0] %vm661_vm4, %v1360_v46   ;;  %v1368_v49 = vpop.permute.xlu0 %1367  ;;  %v1375_v50 = vunpack.i.h.bf16 %v1373_v48  ;;  %v1374_v51 = vunpack.i.l.bf16 %v1373_v48 }
  0x9a   :  { %662 = vst.msk [vmem:[#allocation0] ss:$8 sm:$0xf] %vm661_vm4, %v1359_v47   ;;  %663 = vst.msk [vmem:[#allocation0] ss:$8 sm:$0xf0] %vm661_vm4, %v1359_v47   ;;  %v1370_v52 = vunpack.i.h.bf16 %v1368_v49  ;;  %v1369_v53 = vunpack.i.l.bf16 %v1368_v49 }
  0x9b   :  { %737 = vst.msk [vmem:[#allocation0 + $0x80] ss:$8 sm:$0xf] %vm711_vm5, %v1374_v51   ;;  %739 = vst.msk [vmem:[#allocation0 + $0x80] ss:$8 sm:$0xf0] %vm711_vm5, %v1374_v51  }
  0x9c   :  { %750 = vst.msk [vmem:[#allocation0 + $0xc0] ss:$8 sm:$0xf] %vm711_vm5, %v1375_v50   ;;  %752 = vst.msk [vmem:[#allocation0 + $0xc0] ss:$8 sm:$0xf0] %vm711_vm5, %v1375_v50   ;;  %v1383_v54 = vpop.permute.xlu1 %1382 }
  0x9d   :  { %712 = vst.msk [vmem:[#allocation0] ss:$8 sm:$0xf] %vm711_vm5, %v1369_v53   ;;  %713 = vst.msk [vmem:[#allocation0] ss:$8 sm:$0xf0] %vm711_vm5, %v1369_v53   ;;  %v1378_v55 = vpop.permute.xlu0 %1377  ;;  %v1385_v56 = vunpack.i.h.bf16 %v1383_v54  ;;  %v1384_v57 = vunpack.i.l.bf16 %v1383_v54 }
  0x9e   :  { %724 = vst.msk [vmem:[#allocation0 + $0x40] ss:$8 sm:$0xf] %vm711_vm5, %v1370_v52   ;;  %726 = vst.msk [vmem:[#allocation0 + $0x40] ss:$8 sm:$0xf0] %vm711_vm5, %v1370_v52   ;;  %v1380_v58 = vunpack.i.h.bf16 %v1378_v55  ;;  %v1379_v59 = vunpack.i.l.bf16 %v1378_v55 }
  0x9f   :  { %787 = vst.msk [vmem:[#allocation0 + $0x80] ss:$8 sm:$0xf] %vm761_vm6, %v1384_v57   ;;  %789 = vst.msk [vmem:[#allocation0 + $0x80] ss:$8 sm:$0xf0] %vm761_vm6, %v1384_v57  }
  0xa0   :  { %800 = vst.msk [vmem:[#allocation0 + $0xc0] ss:$8 sm:$0xf] %vm761_vm6, %v1385_v56   ;;  %802 = vst.msk [vmem:[#allocation0 + $0xc0] ss:$8 sm:$0xf0] %vm761_vm6, %v1385_v56   ;;  %v1393_v60 = vpop.permute.xlu1 %1392 }
  0xa1   :  { %762 = vst.msk [vmem:[#allocation0] ss:$8 sm:$0xf] %vm761_vm6, %v1379_v59   ;;  %763 = vst.msk [vmem:[#allocation0] ss:$8 sm:$0xf0] %vm761_vm6, %v1379_v59   ;;  %v1388_v61 = vpop.permute.xlu0 %1387  ;;  %v1395_v62 = vunpack.i.h.bf16 %v1393_v60  ;;  %v1394_v63 = vunpack.i.l.bf16 %v1393_v60 }
  0xa2   :  { %774 = vst.msk [vmem:[#allocation0 + $0x40] ss:$8 sm:$0xf] %vm761_vm6, %v1380_v58   ;;  %776 = vst.msk [vmem:[#allocation0 + $0x40] ss:$8 sm:$0xf0] %vm761_vm6, %v1380_v58   ;;  %v1390_v0 = vunpack.i.h.bf16 %v1388_v61  ;;  %v1389_v1 = vunpack.i.l.bf16 %v1388_v61 }
  0xa3   :  { %837 = vst.msk [vmem:[#allocation0 + $0x80] ss:$8 sm:$0xf] %vm811_vm7, %v1394_v63   ;;  %839 = vst.msk [vmem:[#allocation0 + $0x80] ss:$8 sm:$0xf0] %vm811_vm7, %v1394_v63  }
  0xa4   :  { %850 = vst.msk [vmem:[#allocation0 + $0xc0] ss:$8 sm:$0xf] %vm811_vm7, %v1395_v62   ;;  %852 = vst.msk [vmem:[#allocation0 + $0xc0] ss:$8 sm:$0xf0] %vm811_vm7, %v1395_v62   ;;  %v1403_v2 = vpop.permute.xlu1 %1402 }
  0xa5   :  { %812 = vst.msk [vmem:[#allocation0] ss:$8 sm:$0xf] %vm811_vm7, %v1389_v1   ;;  %813 = vst.msk [vmem:[#allocation0] ss:$8 sm:$0xf0] %vm811_vm7, %v1389_v1   ;;  %v1398_v3 = vpop.permute.xlu0 %1397  ;;  %v1405_v4 = vunpack.i.h.bf16 %v1403_v2  ;;  %v1404_v5 = vunpack.i.l.bf16 %v1403_v2 }
  0xa6   :  { %824 = vst.msk [vmem:[#allocation0 + $0x40] ss:$8 sm:$0xf] %vm811_vm7, %v1390_v0   ;;  %826 = vst.msk [vmem:[#allocation0 + $0x40] ss:$8 sm:$0xf0] %vm811_vm7, %v1390_v0   ;;  %v1400_v6 = vunpack.i.h.bf16 %v1398_v3  ;;  %v1399_v7 = vunpack.i.l.bf16 %v1398_v3 }
  0xa7   :  { %887 = vst.msk [vmem:[#allocation0 + $0x80] ss:$8 sm:$0xf] %vm861_vm8, %v1404_v5   ;;  %889 = vst.msk [vmem:[#allocation0 + $0x80] ss:$8 sm:$0xf0] %vm861_vm8, %v1404_v5  }
  0xa8   :  { %900 = vst.msk [vmem:[#allocation0 + $0xc0] ss:$8 sm:$0xf] %vm861_vm8, %v1405_v4   ;;  %902 = vst.msk [vmem:[#allocation0 + $0xc0] ss:$8 sm:$0xf0] %vm861_vm8, %v1405_v4  }
  0xa9   :  { %862 = vst.msk [vmem:[#allocation0] ss:$8 sm:$0xf] %vm861_vm8, %v1399_v7   ;;  %863 = vst.msk [vmem:[#allocation0] ss:$8 sm:$0xf0] %vm861_vm8, %v1399_v7  }
  0xaa   :  { %874 = vst.msk [vmem:[#allocation0 + $0x40] ss:$8 sm:$0xf] %vm861_vm8, %v1400_v6   ;;  %876 = vst.msk [vmem:[#allocation0 + $0x40] ss:$8 sm:$0xf0] %vm861_vm8, %v1400_v6  }
  0xae   :  { %v1016_v8 = vld [vmem:[#allocation0 + $0x80] sm:$0x3]  ;;  %v1023_v9 = vld [vmem:[#allocation0 + $0x88] sm:$0x3]  ;;  %v1030_v10 = vld [vmem:[#allocation0 + $0x90] sm:$0x3] }
  0xaf   :  { %v1017_v12 = vpack.c.bf16 %v1413_v11, %v1016_v8  ;;  %v1024_v13 = vpack.c.bf16 %v1413_v11, %v1023_v9  ;;  %v1031_v14 = vpack.c.bf16 %v1413_v11, %v1030_v10  ;;  %v1037_v15 = vld [vmem:[#allocation0 + $0x98] sm:$0x3]  ;;  %v1044_v16 = vld [vmem:[#allocation0 + $0xa0] sm:$0x3]  ;;  %v1051_v17 = vld [vmem:[#allocation0 + $0xa8] sm:$0x3] }
  0xb0   :  { %v1038_v18 = vpack.c.bf16 %v1413_v11, %v1037_v15  ;;  %v1045_v19 = vpack.c.bf16 %v1413_v11, %v1044_v16  ;;  %v1052_v20 = vpack.c.bf16 %v1413_v11, %v1051_v17  ;;  %v1058_v21 = vld [vmem:[#allocation0 + $0xb0] sm:$0x3]  ;;  %v1065_v22 = vld [vmem:[#allocation0 + $0xb8] sm:$0x3]  ;;  %v1072_v23 = vld [vmem:[#allocation0 + $0xc0] sm:$0x3] }
  0xb1   :  { %1233 = vst [vmem:[%s1657_s1 + $0x10] sm:$0x1] %v1017_v12  ;;  %1234 = vst [vmem:[%s1657_s1 + $0x11] sm:$0x1] %v1024_v13  ;;  %v1059_v24 = vpack.c.bf16 %v1413_v11, %v1058_v21  ;;  %v1066_v25 = vpack.c.bf16 %v1413_v11, %v1065_v22  ;;  %v1073_v26 = vpack.c.bf16 %v1413_v11, %v1072_v23  ;;  %v1079_v27 = vld [vmem:[#allocation0 + $0xc8] sm:$0x3] }
  0xb2   :  { %1235 = vst [vmem:[%s1657_s1 + $0x12] sm:$0x1] %v1031_v14  ;;  %v1086_v28 = vld [vmem:[#allocation0 + $0xd0] sm:$0x3]  ;;  %v1093_v29 = vld [vmem:[#allocation0 + $0xd8] sm:$0x3]  ;;  %v1080_v30 = vpack.c.bf16 %v1413_v11, %v1079_v27 }
  0xb3   :  { %1236 = vst [vmem:[%s1657_s1 + $0x13] sm:$0x1] %v1038_v18  ;;  %1237 = vst [vmem:[%s1657_s1 + $0x14] sm:$0x1] %v1045_v19  ;;  %v1087_v31 = vpack.c.bf16 %v1413_v11, %v1086_v28  ;;  %v1094_v32 = vpack.c.bf16 %v1413_v11, %v1093_v29  ;;  %v1100_v33 = vld [vmem:[#allocation0 + $0xe0] sm:$0x3] }
  0xb4   :  { %1238 = vst [vmem:[%s1657_s1 + $0x15] sm:$0x1] %v1052_v20  ;;  %v1107_v34 = vld [vmem:[#allocation0 + $0xe8] sm:$0x3]  ;;  %v1114_v35 = vld [vmem:[#allocation0 + $0xf0] sm:$0x3]  ;;  %v1101_v36 = vpack.c.bf16 %v1413_v11, %v1100_v33 }
  0xb5   :  { %1239 = vst [vmem:[%s1657_s1 + $0x16] sm:$0x1] %v1059_v24  ;;  %1240 = vst [vmem:[%s1657_s1 + $0x17] sm:$0x1] %v1066_v25  ;;  %v1108_v37 = vpack.c.bf16 %v1413_v11, %v1107_v34  ;;  %v1115_v38 = vpack.c.bf16 %v1413_v11, %v1114_v35  ;;  %v1121_v39 = vld [vmem:[#allocation0 + $0xf8] sm:$0x3] }
  0xb6   :  { %1241 = vst [vmem:[%s1657_s1 + $0x18] sm:$0x1] %v1073_v26  ;;  %v907_v40 = vld [vmem:[#allocation0] sm:$0x3]  ;;  %v912_v41 = vld [vmem:[#allocation0 + $0x8] sm:$0x3]  ;;  %v1122_v42 = vpack.c.bf16 %v1413_v11, %v1121_v39 }
  0xb7   :  { %1242 = vst [vmem:[%s1657_s1 + $0x19] sm:$0x1] %v1080_v30  ;;  %1243 = vst [vmem:[%s1657_s1 + $0x1a] sm:$0x1] %v1087_v31  ;;  %v908_v43 = vpack.c.bf16 %v1413_v11, %v907_v40  ;;  %v913_v44 = vpack.c.bf16 %v1413_v11, %v912_v41  ;;  %v918_v45 = vld [vmem:[#allocation0 + $0x10] sm:$0x3] }
  0xb8   :  { %1244 = vst [vmem:[%s1657_s1 + $0x1b] sm:$0x1] %v1094_v32  ;;  %v925_v46 = vld [vmem:[#allocation0 + $0x18] sm:$0x3]  ;;  %v932_v47 = vld [vmem:[#allocation0 + $0x20] sm:$0x3]  ;;  %v919_v48 = vpack.c.bf16 %v1413_v11, %v918_v45 }
  0xb9   :  { %1245 = vst [vmem:[%s1657_s1 + $0x1c] sm:$0x1] %v1101_v36  ;;  %1246 = vst [vmem:[%s1657_s1 + $0x1d] sm:$0x1] %v1108_v37  ;;  %v926_v49 = vpack.c.bf16 %v1413_v11, %v925_v46  ;;  %v933_v50 = vpack.c.bf16 %v1413_v11, %v932_v47  ;;  %v939_v51 = vld [vmem:[#allocation0 + $0x28] sm:$0x3] }
  0xba   :  { %1247 = vst [vmem:[%s1657_s1 + $0x1e] sm:$0x1] %v1115_v38  ;;  %v946_v52 = vld [vmem:[#allocation0 + $0x30] sm:$0x3]  ;;  %v953_v53 = vld [vmem:[#allocation0 + $0x38] sm:$0x3]  ;;  %v940_v54 = vpack.c.bf16 %v1413_v11, %v939_v51 }
  0xbb   :  { %1248 = vst [vmem:[%s1657_s1 + $0x1f] sm:$0x1] %v1122_v42  ;;  %910 = vst [vmem:[%s1657_s1] sm:$0x1] %v908_v43  ;;  %v947_v55 = vpack.c.bf16 %v1413_v11, %v946_v52  ;;  %v954_v56 = vpack.c.bf16 %v1413_v11, %v953_v53  ;;  %v960_v57 = vld [vmem:[#allocation0 + $0x40] sm:$0x3] }
  0xbc   :  { %1218 = vst [vmem:[%s1657_s1 + $0x1] sm:$0x1] %v913_v44  ;;  %v967_v58 = vld [vmem:[#allocation0 + $0x48] sm:$0x3]  ;;  %v974_v59 = vld [vmem:[#allocation0 + $0x50] sm:$0x3]  ;;  %v961_v60 = vpack.c.bf16 %v1413_v11, %v960_v57 }
  0xbd   :  { %1219 = vst [vmem:[%s1657_s1 + $0x2] sm:$0x1] %v919_v48  ;;  %1220 = vst [vmem:[%s1657_s1 + $0x3] sm:$0x1] %v926_v49  ;;  %v968_v61 = vpack.c.bf16 %v1413_v11, %v967_v58  ;;  %v975_v62 = vpack.c.bf16 %v1413_v11, %v974_v59  ;;  %v981_v63 = vld [vmem:[#allocation0 + $0x58] sm:$0x3] }
  0xbe   :  { %1221 = vst [vmem:[%s1657_s1 + $0x4] sm:$0x1] %v933_v50  ;;  %v988_v0 = vld [vmem:[#allocation0 + $0x60] sm:$0x3]  ;;  %v995_v1 = vld [vmem:[#allocation0 + $0x68] sm:$0x3]  ;;  %v982_v2 = vpack.c.bf16 %v1413_v11, %v981_v63 }
  0xbf   :  { %1222 = vst [vmem:[%s1657_s1 + $0x5] sm:$0x1] %v940_v54  ;;  %1223 = vst [vmem:[%s1657_s1 + $0x6] sm:$0x1] %v947_v55  ;;  %v989_v3 = vpack.c.bf16 %v1413_v11, %v988_v0  ;;  %v996_v4 = vpack.c.bf16 %v1413_v11, %v995_v1  ;;  %v1002_v5 = vld [vmem:[#allocation0 + $0x70] sm:$0x3] }
  0xc0   :  { %1224 = vst [vmem:[%s1657_s1 + $0x7] sm:$0x1] %v954_v56  ;;  %v1009_v6 = vld [vmem:[#allocation0 + $0x78] sm:$0x3]  ;;  %1225 = vst [vmem:[%s1657_s1 + $0x8] sm:$0x1] %v961_v60  ;;  %v1003_v7 = vpack.c.bf16 %v1413_v11, %v1002_v5 }
  0xc1   :  { %1226 = vst [vmem:[%s1657_s1 + $0x9] sm:$0x1] %v968_v61  ;;  %1227 = vst [vmem:[%s1657_s1 + $0xa] sm:$0x1] %v975_v62  ;;  %v1010_v8 = vpack.c.bf16 %v1413_v11, %v1009_v6 }
  0xc2   :  { %1228 = vst [vmem:[%s1657_s1 + $0xb] sm:$0x1] %v982_v2  ;;  %1229 = vst [vmem:[%s1657_s1 + $0xc] sm:$0x1] %v989_v3 }
  0xc3   :  { %1230 = vst [vmem:[%s1657_s1 + $0xd] sm:$0x1] %v996_v4  ;;  %1231 = vst [vmem:[%s1657_s1 + $0xe] sm:$0x1] %v1003_v7 }
  0xc4   :  { %1232 = vst [vmem:[%s1657_s1 + $0xf] sm:$0x1] %v1010_v8 }

// kernel: convnet4_forward.2
= control target key start
LH: loop header
LB: loop body
LE: loop exit
PB: predicated region body
PF: predicated region fallthrough
CT: control target
= control target key end

     0   :  { %s3509_s12 = smov 0   ;;  %s3511_s13 = smov 0   ;;  %s4780_s0 = inlined_call_operand.vmem [shape: bf16[4,27,4096], index: 0, kind: input, shape index: {}]   ;;  %s4781_s1 = inlined_call_operand.vmem [shape: bf16[16,27], index: 1, kind: input, shape index: {}]   ;;  %s4782_s2 = inlined_call_operand.vmem [shape: f32[16,1], index: 2, kind: input, shape index: {}]   ;;  %s4783_s3 = inlined_call_operand.vmem [shape: bf16[16,4096], index: 3, kind: output, shape index: {}]  }
   0x1   :  { %s3513_s14 = smov 0  }
   0x2 LB: > { %s3129_s15 = sadd.s32 4294967295, %s3485_s14   ;;  %s3526_s16 = sadd.s32 1, %s3485_s14   ;;  %s3485_s14 = sphi %s3513_s14, %s4950_s14   ;;  %s3481_s13 = sphi %s3511_s13, %s4949_s13   ;;  %s3477_s12 = sphi %s3509_s12, %s4948_s12  }
   0x3   : > { %s17_s17 = ssub.s32 %s3485_s14, %s3526_s16  ;;  %s20_s18 = sadd.s32 1, %s3481_s13 }
   0x4   : > { %p18_p0 = scmp.eq.s32.totalorder %s17_s17, 0  ;;  %p27_p1 = scmp.ne.s32.totalorder %s3481_s13, %s3477_s12 }
   0x5   : > { %p28_p2 = scmp.eq.s32.totalorder %s3485_s14, 0  ;;  %p99_p3 = scmp.eq.s32.totalorder %s3129_s15, 1 }
   0x6   : > { %s3537_s19 = scalar_select %p18_p0, %s3481_s13, %s20_s18  }
   0x7   : > { %p29_p4 = por %p28_p2, %p27_p1  ;;  %p3539_p5 = por %p99_p3, %p27_p1 }
   0x8   : > { %p3132_p6 = scmp.ge.s32.totalorder %s3485_s14, 2 }
   0xa   : > { %127 = sbr.rel (%p3132_p6) target bundleno = 85 (0x55), region = 24 }
  0x11   : > { %130 = sbr.rel (!%p29_p4) target bundleno = 85 (0x55), region = 28  ;;  %s132_s21 = sand.u32 (%p29_p4), 1, %s3481_s13  }
  0x12   : > { %s3417_s22 = sshll.u32 (%p29_p4), %s3485_s14, 6  ;;  %s3133_s23 = sshll.u32 (%p29_p4), %s132_s21, 10 }
  0x13   : > { %s3549_s26 = scalar_lea.vmem (%p29_p4), %s4780_s0, %s3417_s22  ;;  %s3554_s27 = scalar_lea.vmem (%p29_p4), [#allocation2], %s3133_s23 }
  0x14   : > { %v150_v0 = vld [vmem:[%s3549_s26] sm:$0xff] (%p29_p4)  ;;  %v152_v1 = vld [vmem:[%s3549_s26 + $0x8] sm:$0xff] (%p29_p4)  ;;  %v154_v2 = vld [vmem:[%s3549_s26 + $0x10] sm:$0xff] (%p29_p4) }
  0x15   : > { %151 = vst [vmem:[%s3554_s27] sm:$0xff] (%p29_p4), %v150_v0  ;;  %153 = vst [vmem:[%s3554_s27 + $0x8] sm:$0xff] (%p29_p4), %v152_v1  ;;  %v156_v3 = vld [vmem:[%s3549_s26 + $0x18] sm:$0xff] (%p29_p4)  ;;  %v158_v4 = vld [vmem:[%s3549_s26 + $0x20] sm:$0xff] (%p29_p4) }
  0x16   : > { %155 = vst [vmem:[%s3554_s27 + $0x10] sm:$0xff] (%p29_p4), %v154_v2  ;;  %v160_v5 = vld [vmem:[%s3549_s26 + $0x28] sm:$0xff] (%p29_p4)  ;;  %157 = vst [vmem:[%s3554_s27 + $0x18] sm:$0xff] (%p29_p4), %v156_v3  ;;  %v162_v6 = vld [vmem:[%s3549_s26 + $0x30] sm:$0xff] (%p29_p4) }
  0x17   : > { %159 = vst [vmem:[%s3554_s27 + $0x20] sm:$0xff] (%p29_p4), %v158_v4  ;;  %161 = vst [vmem:[%s3554_s27 + $0x28] sm:$0xff] (%p29_p4), %v160_v5  ;;  %v164_v7 = vld [vmem:[%s3549_s26 + $0x38] sm:$0xff] (%p29_p4)  ;;  %v166_v8 = vld [vmem:[%s3549_s26 + $0x80] sm:$0xff] (%p29_p4) }
  0x18   : > { %163 = vst [vmem:[%s3554_s27 + $0x30] sm:$0xff] %v162_v6  ;;  %165 = vst [vmem:[%s3554_s27 + $0x38] sm:$0xff] %v164_v7  ;;  %v168_v9 = vld [vmem:[%s3549_s26 + $0x88] sm:$0xff]  ;;  %v170_v10 = vld [vmem:[%s3549_s26 + $0x90] sm:$0xff] }
  0x19   : > { %167 = vst [vmem:[%s3554_s27 + $0x40] sm:$0xff] %v166_v8  ;;  %v172_v11 = vld [vmem:[%s3549_s26 + $0x98] sm:$0xff]  ;;  %169 = vst [vmem:[%s3554_s27 + $0x48] sm:$0xff] %v168_v9  ;;  %v174_v12 = vld [vmem:[%s3549_s26 + $0xa0] sm:$0xff] }
  0x1a   : > { %171 = vst [vmem:[%s3554_s27 + $0x50] sm:$0xff] %v170_v10  ;;  %173 = vst [vmem:[%s3554_s27 + $0x58] sm:$0xff] %v172_v11  ;;  %v176_v13 = vld [vmem:[%s3549_s26 + $0xa8] sm:$0xff]  ;;  %v178_v14 = vld [vmem:[%s3549_s26 + $0xb0] sm:$0xff] }
  0x1b   : > { %175 = vst [vmem:[%s3554_s27 + $0x60] sm:$0xff] %v174_v12  ;;  %177 = vst [vmem:[%s3554_s27 + $0x68] sm:$0xff] %v176_v13  ;;  %v180_v15 = vld [vmem:[%s3549_s26 + $0xb8] sm:$0xff]  ;;  %v182_v16 = vld [vmem:[%s3549_s26 + $0x100] sm:$0xff] }
  0x1c   : > { %179 = vst [vmem:[%s3554_s27 + $0x70] sm:$0xff] %v178_v14  ;;  %v184_v17 = vld [vmem:[%s3549_s26 + $0x108] sm:$0xff]  ;;  %181 = vst [vmem:[%s3554_s27 + $0x78] sm:$0xff] %v180_v15  ;;  %v186_v18 = vld [vmem:[%s3549_s26 + $0x110] sm:$0xff] }
  0x1d   : > { %183 = vst [vmem:[%s3554_s27 + $0x80] sm:$0xff] %v182_v16  ;;  %185 = vst [vmem:[%s3554_s27 + $0x88] sm:$0xff] %v184_v17  ;;  %v188_v19 = vld [vmem:[%s3549_s26 + $0x118] sm:$0xff]  ;;  %v190_v20 = vld [vmem:[%s3549_s26 + $0x120] sm:$0xff] }
  0x1e   : > { %187 = vst [vmem:[%s3554_s27 + $0x90] sm:$0xff] %v186_v18  ;;  %189 = vst [vmem:[%s3554_s27 + $0x98] sm:$0xff] %v188_v19  ;;  %v192_v21 = vld [vmem:[%s3549_s26 + $0x128] sm:$0xff]  ;;  %v194_v22 = vld [vmem:[%s3549_s26 + $0x130] sm:$0xff] }
  0x1f   : > { %191 = vst [vmem:[%s3554_s27 + $0xa0] sm:$0xff] %v190_v20  ;;  %v196_v23 = vld [vmem:[%s3549_s26 + $0x138] sm:$0xff]  ;;  %193 = vst [vmem:[%s3554_s27 + $0xa8] sm:$0xff] %v192_v21  ;;  %v198_v24 = vld [vmem:[%s3549_s26 + $0x180] sm:$0xff] }
  0x20   : > { %195 = vst [vmem:[%s3554_s27 + $0xb0] sm:$0xff] %v194_v22  ;;  %197 = vst [vmem:[%s3554_s27 + $0xb8] sm:$0xff] %v196_v23  ;;  %v200_v25 = vld [vmem:[%s3549_s26 + $0x188] sm:$0xff]  ;;  %v202_v26 = vld [vmem:[%s3549_s26 + $0x190] sm:$0xff] }
  0x21   : > { %199 = vst [vmem:[%s3554_s27 + $0xc0] sm:$0xff] %v198_v24  ;;  %201 = vst [vmem:[%s3554_s27 + $0xc8] sm:$0xff] %v200_v25  ;;  %v204_v27 = vld [vmem:[%s3549_s26 + $0x198] sm:$0xff]  ;;  %v206_v28 = vld [vmem:[%s3549_s26 + $0x1a0] sm:$0xff] }
  0x22   : > { %203 = vst [vmem:[%s3554_s27 + $0xd0] sm:$0xff] %v202_v26  ;;  %v208_v29 = vld [vmem:[%s3549_s26 + $0x1a8] sm:$0xff]  ;;  %205 = vst [vmem:[%s3554_s27 + $0xd8] sm:$0xff] %v204_v27  ;;  %v210_v30 = vld [vmem:[%s3549_s26 + $0x1b0] sm:$0xff] }
  0x23   : > { %207 = vst [vmem:[%s3554_s27 + $0xe0] sm:$0xff] %v206_v28  ;;  %209 = vst [vmem:[%s3554_s27 + $0xe8] sm:$0xff] %v208_v29  ;;  %v212_v31 = vld [vmem:[%s3549_s26 + $0x1b8] sm:$0xff]  ;;  %v214_v32 = vld [vmem:[%s3549_s26 + $0x200] sm:$0xff] }
  0x24   : > { %211 = vst [vmem:[%s3554_s27 + $0xf0] sm:$0xff] %v210_v30  ;;  %213 = vst [vmem:[%s3554_s27 + $0xf8] sm:$0xff] %v212_v31  ;;  %v216_v33 = vld [vmem:[%s3549_s26 + $0x208] sm:$0xff]  ;;  %v218_v34 = vld [vmem:[%s3549_s26 + $0x210] sm:$0xff] }
  0x25   : > { %215 = vst [vmem:[%s3554_s27 + $0x100] sm:$0xff] %v214_v32  ;;  %v220_v35 = vld [vmem:[%s3549_s26 + $0x218] sm:$0xff]  ;;  %217 = vst [vmem:[%s3554_s27 + $0x108] sm:$0xff] %v216_v33  ;;  %v222_v36 = vld [vmem:[%s3549_s26 + $0x220] sm:$0xff] }
  0x26   : > { %219 = vst [vmem:[%s3554_s27 + $0x110] sm:$0xff] %v218_v34  ;;  %221 = vst [vmem:[%s3554_s27 + $0x118] sm:$0xff] %v220_v35  ;;  %v224_v37 = vld [vmem:[%s3549_s26 + $0x228] sm:$0xff]  ;;  %v226_v38 = vld [vmem:[%s3549_s26 + $0x230] sm:$0xff] }
  0x27   : > { %223 = vst [vmem:[%s3554_s27 + $0x120] sm:$0xff] %v222_v36  ;;  %225 = vst [vmem:[%s3554_s27 + $0x128] sm:$0xff] %v224_v37  ;;  %v228_v39 = vld [vmem:[%s3549_s26 + $0x238] sm:$0xff]  ;;  %v230_v40 = vld [vmem:[%s3549_s26 + $0x280] sm:$0xff] }
  0x28   : > { %227 = vst [vmem:[%s3554_s27 + $0x130] sm:$0xff] %v226_v38  ;;  %v232_v41 = vld [vmem:[%s3549_s26 + $0x288] sm:$0xff]  ;;  %229 = vst [vmem:[%s3554_s27 + $0x138] sm:$0xff] %v228_v39  ;;  %v234_v42 = vld [vmem:[%s3549_s26 + $0x290] sm:$0xff] }
  0x29   : > { %231 = vst [vmem:[%s3554_s27 + $0x140] sm:$0xff] %v230_v40  ;;  %233 = vst [vmem:[%s3554_s27 + $0x148] sm:$0xff] %v232_v41  ;;  %v236_v43 = vld [vmem:[%s3549_s26 + $0x298] sm:$0xff]  ;;  %v238_v44 = vld [vmem:[%s3549_s26 + $0x2a0] sm:$0xff] }
  0x2a   : > { %235 = vst [vmem:[%s3554_s27 + $0x150] sm:$0xff] %v234_v42  ;;  %237 = vst [vmem:[%s3554_s27 + $0x158] sm:$0xff] %v236_v43  ;;  %v240_v45 = vld [vmem:[%s3549_s26 + $0x2a8] sm:$0xff]  ;;  %v242_v46 = vld [vmem:[%s3549_s26 + $0x2b0] sm:$0xff] }
  0x2b   : > { %239 = vst [vmem:[%s3554_s27 + $0x160] sm:$0xff] %v238_v44  ;;  %v244_v47 = vld [vmem:[%s3549_s26 + $0x2b8] sm:$0xff]  ;;  %241 = vst [vmem:[%s3554_s27 + $0x168] sm:$0xff] %v240_v45  ;;  %v246_v48 = vld [vmem:[%s3549_s26 + $0x300] sm:$0xff] }
  0x2c   : > { %243 = vst [vmem:[%s3554_s27 + $0x170] sm:$0xff] %v242_v46  ;;  %245 = vst [vmem:[%s3554_s27 + $0x178] sm:$0xff] %v244_v47  ;;  %v248_v49 = vld [vmem:[%s3549_s26 + $0x308] sm:$0xff]  ;;  %v250_v50 = vld [vmem:[%s3549_s26 + $0x310] sm:$0xff] }
  0x2d   : > { %247 = vst [vmem:[%s3554_s27 + $0x180] sm:$0xff] %v246_v48  ;;  %249 = vst [vmem:[%s3554_s27 + $0x188] sm:$0xff] %v248_v49  ;;  %v252_v51 = vld [vmem:[%s3549_s26 + $0x318] sm:$0xff]  ;;  %v254_v52 = vld [vmem:[%s3549_s26 + $0x320] sm:$0xff] }
  0x2e   : > { %251 = vst [vmem:[%s3554_s27 + $0x190] sm:$0xff] %v250_v50  ;;  %v256_v53 = vld [vmem:[%s3549_s26 + $0x328] sm:$0xff]  ;;  %253 = vst [vmem:[%s3554_s27 + $0x198] sm:$0xff] %v252_v51  ;;  %v258_v54 = vld [vmem:[%s3549_s26 + $0x330] sm:$0xff] }
  0x2f   : > { %255 = vst [vmem:[%s3554_s27 + $0x1a0] sm:$0xff] %v254_v52  ;;  %257 = vst [vmem:[%s3554_s27 + $0x1a8] sm:$0xff] %v256_v53  ;;  %v260_v55 = vld [vmem:[%s3549_s26 + $0x338] sm:$0xff]  ;;  %v262_v56 = vld [vmem:[%s3549_s26 + $0x380] sm:$0xff] }
  0x30   : > { %259 = vst [vmem:[%s3554_s27 + $0x1b0] sm:$0xff] %v258_v54  ;;  %261 = vst [vmem:[%s3554_s27 + $0x1b8] sm:$0xff] %v260_v55  ;;  %v264_v57 = vld [vmem:[%s3549_s26 + $0x388] sm:$0xff]  ;;  %v266_v58 = vld [vmem:[%s3549_s26 + $0x390] sm:$0xff] }
  0x31   : > { %263 = vst [vmem:[%s3554_s27 + $0x1c0] sm:$0xff] %v262_v56  ;;  %v268_v59 = vld [vmem:[%s3549_s26 + $0x398] sm:$0xff]  ;;  %265 = vst [vmem:[%s3554_s27 + $0x1c8] sm:$0xff] %v264_v57  ;;  %v270_v60 = vld [vmem:[%s3549_s26 + $0x3a0] sm:$0xff] }
  0x32   : > { %267 = vst [vmem:[%s3554_s27 + $0x1d0] sm:$0xff] %v266_v58  ;;  %269 = vst [vmem:[%s3554_s27 + $0x1d8] sm:$0xff] %v268_v59  ;;  %v272_v61 = vld [vmem:[%s3549_s26 + $0x3a8] sm:$0xff]  ;;  %v274_v62 = vld [vmem:[%s3549_s26 + $0x3b0] sm:$0xff] }
  0x33   : > { %271 = vst [vmem:[%s3554_s27 + $0x1e0] sm:$0xff] %v270_v60  ;;  %273 = vst [vmem:[%s3554_s27 + $0x1e8] sm:$0xff] %v272_v61  ;;  %v276_v63 = vld [vmem:[%s3549_s26 + $0x3b8] sm:$0xff]  ;;  %v278_v0 = vld [vmem:[%s3549_s26 + $0x400] sm:$0xff] }
  0x34   : > { %275 = vst [vmem:[%s3554_s27 + $0x1f0] sm:$0xff] %v274_v62  ;;  %v280_v1 = vld [vmem:[%s3549_s26 + $0x408] sm:$0xff]  ;;  %277 = vst [vmem:[%s3554_s27 + $0x1f8] sm:$0xff] %v276_v63  ;;  %v282_v2 = vld [vmem:[%s3549_s26 + $0x410] sm:$0xff] }
  0x35   : > { %279 = vst [vmem:[%s3554_s27 + $0x200] sm:$0xff] %v278_v0  ;;  %281 = vst [vmem:[%s3554_s27 + $0x208] sm:$0xff] %v280_v1  ;;  %v284_v3 = vld [vmem:[%s3549_s26 + $0x418] sm:$0xff]  ;;  %v286_v4 = vld [vmem:[%s3549_s26 + $0x420] sm:$0xff] }
  0x36   : > { %283 = vst [vmem:[%s3554_s27 + $0x210] sm:$0xff] %v282_v2  ;;  %285 = vst [vmem:[%s3554_s27 + $0x218] sm:$0xff] %v284_v3  ;;  %v288_v5 = vld [vmem:[%s3549_s26 + $0x428] sm:$0xff]  ;;  %v290_v6 = vld [vmem:[%s3549_s26 + $0x430] sm:$0xff] }
  0x37   : > { %287 = vst [vmem:[%s3554_s27 + $0x220] sm:$0xff] %v286_v4  ;;  %v292_v7 = vld [vmem:[%s3549_s26 + $0x438] sm:$0xff]  ;;  %289 = vst [vmem:[%s3554_s27 + $0x228] sm:$0xff] %v288_v5  ;;  %v294_v8 = vld [vmem:[%s3549_s26 + $0x480] sm:$0xff] }
  0x38   : > { %291 = vst [vmem:[%s3554_s27 + $0x230] sm:$0xff] %v290_v6  ;;  %293 = vst [vmem:[%s3554_s27 + $0x238] sm:$0xff] %v292_v7  ;;  %v296_v9 = vld [vmem:[%s3549_s26 + $0x488] sm:$0xff]  ;;  %v298_v10 = vld [vmem:[%s3549_s26 + $0x490] sm:$0xff] }
  0x39   : > { %295 = vst [vmem:[%s3554_s27 + $0x240] sm:$0xff] %v294_v8  ;;  %297 = vst [vmem:[%s3554_s27 + $0x248] sm:$0xff] %v296_v9  ;;  %v300_v11 = vld [vmem:[%s3549_s26 + $0x498] sm:$0xff]  ;;  %v302_v12 = vld [vmem:[%s3549_s26 + $0x4a0] sm:$0xff] }
  0x3a   : > { %299 = vst [vmem:[%s3554_s27 + $0x250] sm:$0xff] %v298_v10  ;;  %v304_v13 = vld [vmem:[%s3549_s26 + $0x4a8] sm:$0xff]  ;;  %301 = vst [vmem:[%s3554_s27 + $0x258] sm:$0xff] %v300_v11  ;;  %v306_v14 = vld [vmem:[%s3549_s26 + $0x4b0] sm:$0xff] }
  0x3b   : > { %303 = vst [vmem:[%s3554_s27 + $0x260] sm:$0xff] %v302_v12  ;;  %305 = vst [vmem:[%s3554_s27 + $0x268] sm:$0xff] %v304_v13  ;;  %v308_v15 = vld [vmem:[%s3549_s26 + $0x4b8] sm:$0xff]  ;;  %v310_v16 = vld [vmem:[%s3549_s26 + $0x500] sm:$0xff] }
  0x3c   : > { %307 = vst [vmem:[%s3554_s27 + $0x270] sm:$0xff] %v306_v14  ;;  %309 = vst [vmem:[%s3554_s27 + $0x278] sm:$0xff] %v308_v15  ;;  %v312_v17 = vld [vmem:[%s3549_s26 + $0x508] sm:$0xff]  ;;  %v314_v18 = vld [vmem:[%s3549_s26 + $0x510] sm:$0xff] }
  0x3d   : > { %311 = vst [vmem:[%s3554_s27 + $0x280] sm:$0xff] %v310_v16  ;;  %v316_v19 = vld [vmem:[%s3549_s26 + $0x518] sm:$0xff]  ;;  %313 = vst [vmem:[%s3554_s27 + $0x288] sm:$0xff] %v312_v17  ;;  %v318_v20 = vld [vmem:[%s3549_s26 + $0x520] sm:$0xff] }
  0x3e   : > { %315 = vst [vmem:[%s3554_s27 + $0x290] sm:$0xff] %v314_v18  ;;  %317 = vst [vmem:[%s3554_s27 + $0x298] sm:$0xff] %v316_v19  ;;  %v320_v21 = vld [vmem:[%s3549_s26 + $0x528] sm:$0xff]  ;;  %v322_v22 = vld [vmem:[%s3549_s26 + $0x530] sm:$0xff] }
  0x3f   : > { %319 = vst [vmem:[%s3554_s27 + $0x2a0] sm:$0xff] %v318_v20  ;;  %321 = vst [vmem:[%s3554_s27 + $0x2a8] sm:$0xff] %v320_v21  ;;  %v324_v23 = vld [vmem:[%s3549_s26 + $0x538] sm:$0xff]  ;;  %v326_v24 = vld [vmem:[%s3549_s26 + $0x580] sm:$0xff] }
  0x40   : > { %323 = vst [vmem:[%s3554_s27 + $0x2b0] sm:$0xff] %v322_v22  ;;  %v328_v25 = vld [vmem:[%s3549_s26 + $0x588] sm:$0xff]  ;;  %325 = vst [vmem:[%s3554_s27 + $0x2b8] sm:$0xff] %v324_v23  ;;  %v330_v26 = vld [vmem:[%s3549_s26 + $0x590] sm:$0xff] }
  0x41   : > { %327 = vst [vmem:[%s3554_s27 + $0x2c0] sm:$0xff] %v326_v24  ;;  %329 = vst [vmem:[%s3554_s27 + $0x2c8] sm:$0xff] %v328_v25  ;;  %v332_v27 = vld [vmem:[%s3549_s26 + $0x598] sm:$0xff]  ;;  %v334_v28 = vld [vmem:[%s3549_s26 + $0x5a0] sm:$0xff] }
  0x42   : > { %331 = vst [vmem:[%s3554_s27 + $0x2d0] sm:$0xff] %v330_v26  ;;  %333 = vst [vmem:[%s3554_s27 + $0x2d8] sm:$0xff] %v332_v27  ;;  %v336_v29 = vld [vmem:[%s3549_s26 + $0x5a8] sm:$0xff]  ;;  %v338_v30 = vld [vmem:[%s3549_s26 + $0x5b0] sm:$0xff] }
  0x43   : > { %335 = vst [vmem:[%s3554_s27 + $0x2e0] sm:$0xff] %v334_v28  ;;  %v340_v31 = vld [vmem:[%s3549_s26 + $0x5b8] sm:$0xff]  ;;  %337 = vst [vmem:[%s3554_s27 + $0x2e8] sm:$0xff] %v336_v29  ;;  %v342_v32 = vld [vmem:[%s3549_s26 + $0x600] sm:$0xff] }
  0x44   : > { %339 = vst [vmem:[%s3554_s27 + $0x2f0] sm:$0xff] %v338_v30  ;;  %341 = vst [vmem:[%s3554_s27 + $0x2f8] sm:$0xff] %v340_v31  ;;  %v344_v33 = vld [vmem:[%s3549_s26 + $0x608] sm:$0xff]  ;;  %v346_v34 = vld [vmem:[%s3549_s26 + $0x610] sm:$0xff] }
  0x45   : > { %343 = vst [vmem:[%s3554_s27 + $0x300] sm:$0xff] %v342_v32  ;;  %345 = vst [vmem:[%s3554_s27 + $0x308] sm:$0xff] %v344_v33  ;;  %v348_v35 = vld [vmem:[%s3549_s26 + $0x618] sm:$0xff]  ;;  %v350_v36 = vld [vmem:[%s3549_s26 + $0x620] sm:$0xff] }
  0x46   : > { %347 = vst [vmem:[%s3554_s27 + $0x310] sm:$0xff] %v346_v34  ;;  %v352_v37 = vld [vmem:[%s3549_s26 + $0x628] sm:$0xff]  ;;  %349 = vst [vmem:[%s3554_s27 + $0x318] sm:$0xff] %v348_v35  ;;  %v354_v38 = vld [vmem:[%s3549_s26 + $0x630] sm:$0xff] }
  0x47   : > { %351 = vst [vmem:[%s3554_s27 + $0x320] sm:$0xff] %v350_v36  ;;  %353 = vst [vmem:[%s3554_s27 + $0x328] sm:$0xff] %v352_v37  ;;  %v356_v39 = vld [vmem:[%s3549_s26 + $0x638] sm:$0xff]  ;;  %v358_v40 = vld [vmem:[%s3549_s26 + $0x680] sm:$0xff] }
  0x48   : > { %355 = vst [vmem:[%s3554_s27 + $0x330] sm:$0xff] %v354_v38  ;;  %357 = vst [vmem:[%s3554_s27 + $0x338] sm:$0xff] %v356_v39  ;;  %v360_v41 = vld [vmem:[%s3549_s26 + $0x688] sm:$0xff]  ;;  %v362_v42 = vld [vmem:[%s3549_s26 + $0x690] sm:$0xff] }
  0x49   : > { %359 = vst [vmem:[%s3554_s27 + $0x340] sm:$0xff] %v358_v40  ;;  %v364_v43 = vld [vmem:[%s3549_s26 + $0x698] sm:$0xff]  ;;  %361 = vst [vmem:[%s3554_s27 + $0x348] sm:$0xff] %v360_v41  ;;  %v366_v44 = vld [vmem:[%s3549_s26 + $0x6a0] sm:$0xff] }
  0x4a   : > { %363 = vst [vmem:[%s3554_s27 + $0x350] sm:$0xff] %v362_v42  ;;  %365 = vst [vmem:[%s3554_s27 + $0x358] sm:$0xff] %v364_v43  ;;  %v368_v45 = vld [vmem:[%s3549_s26 + $0x6a8] sm:$0xff]  ;;  %v370_v46 = vld [vmem:[%s3549_s26 + $0x6b0] sm:$0xff] }
  0x4b   : > { %367 = vst [vmem:[%s3554_s27 + $0x360] sm:$0xff] %v366_v44  ;;  %369 = vst [vmem:[%s3554_s27 + $0x368] sm:$0xff] %v368_v45  ;;  %v372_v47 = vld [vmem:[%s3549_s26 + $0x6b8] sm:$0xff]  ;;  %v374_v48 = vld [vmem:[%s3549_s26 + $0x700] sm:$0xff] }
  0x4c   : > { %371 = vst [vmem:[%s3554_s27 + $0x370] sm:$0xff] %v370_v46  ;;  %v376_v49 = vld [vmem:[%s3549_s26 + $0x708] sm:$0xff]  ;;  %373 = vst [vmem:[%s3554_s27 + $0x378] sm:$0xff] %v372_v47  ;;  %v378_v50 = vld [vmem:[%s3549_s26 + $0x710] sm:$0xff] }
  0x4d   : > { %375 = vst [vmem:[%s3554_s27 + $0x380] sm:$0xff] %v374_v48  ;;  %377 = vst [vmem:[%s3554_s27 + $0x388] sm:$0xff] %v376_v49  ;;  %v380_v51 = vld [vmem:[%s3549_s26 + $0x718] sm:$0xff]  ;;  %v382_v52 = vld [vmem:[%s3549_s26 + $0x720] sm:$0xff] }
  0x4e   : > { %379 = vst [vmem:[%s3554_s27 + $0x390] sm:$0xff] %v378_v50  ;;  %381 = vst [vmem:[%s3554_s27 + $0x398] sm:$0xff] %v380_v51  ;;  %v384_v53 = vld [vmem:[%s3549_s26 + $0x728] sm:$0xff]  ;;  %v386_v54 = vld [vmem:[%s3549_s26 + $0x730] sm:$0xff] }
  0x4f   : > { %383 = vst [vmem:[%s3554_s27 + $0x3a0] sm:$0xff] %v382_v52  ;;  %v388_v55 = vld [vmem:[%s3549_s26 + $0x738] sm:$0xff]  ;;  %385 = vst [vmem:[%s3554_s27 + $0x3a8] sm:$0xff] %v384_v53  ;;  %v390_v56 = vld [vmem:[%s3549_s26 + $0x780] sm:$0xff] }
  0x50   : > { %387 = vst [vmem:[%s3554_s27 + $0x3b0] sm:$0xff] %v386_v54  ;;  %389 = vst [vmem:[%s3554_s27 + $0x3b8] sm:$0xff] %v388_v55  ;;  %v392_v57 = vld [vmem:[%s3549_s26 + $0x788] sm:$0xff]  ;;  %v394_v58 = vld [vmem:[%s3549_s26 + $0x790] sm:$0xff] }
  0x51   : > { %391 = vst [vmem:[%s3554_s27 + $0x3c0] sm:$0xff] %v390_v56  ;;  %393 = vst [vmem:[%s3554_s27 + $0x3c8] sm:$0xff] %v392_v57  ;;  %v396_v59 = vld [vmem:[%s3549_s26 + $0x798] sm:$0xff]  ;;  %v398_v60 = vld [vmem:[%s3549_s26 + $0x7a0] sm:$0xff] }
  0x52   : > { %395 = vst [vmem:[%s3554_s27 + $0x3d0] sm:$0xff] %v394_v58  ;;  %v400_v61 = vld [vmem:[%s3549_s26 + $0x7a8] sm:$0xff]  ;;  %397 = vst [vmem:[%s3554_s27 + $0x3d8] sm:$0xff] %v396_v59  ;;  %v402_v62 = vld [vmem:[%s3549_s26 + $0x7b0] sm:$0xff] }
  0x53   : > { %399 = vst [vmem:[%s3554_s27 + $0x3e0] sm:$0xff] %v398_v60  ;;  %401 = vst [vmem:[%s3554_s27 + $0x3e8] sm:$0xff] %v400_v61  ;;  %v404_v63 = vld [vmem:[%s3549_s26 + $0x7b8] sm:$0xff] }
  0x54   : > { %403 = vst [vmem:[%s3554_s27 + $0x3f0] sm:$0xff] %v402_v62  ;;  %405 = vst [vmem:[%s3554_s27 + $0x3f8] sm:$0xff] %v404_v63 }
  0x55 PF: > { %p3136_p7 = scmp.ge.s32.totalorder %s3485_s14, 1  ;;  %p410_p8 = scmp.lt.s32.totalorder %s3485_s14, 3 }
  0x57   : > { %p411_p9 = pnand %p3136_p7, %p410_p8 }
  0x59   : > { %414 = sbr.rel (%p411_p9) target bundleno = 478 (0x1de), region = 51 }
  0x60   : > { %s417_s28 = sand.u32 1, %s3477_s12   ;;  %vm629_vm0 = vcmask 1044480   ;;  %vm630_vm1 = vcmask 1045504   ;;  %v3487_v0 = vmov 65535   ;;  %v3488_v2 = vmov 0   ;;  %v3845_v35 = vld [vmem:[%s4781_s1] sm:$0xff]  }
  0x61   : > { %s3137_s29 = sshll.u32 %s417_s28, 10  ;;  %v631_v1 = vsel %vm629_vm0, 4294967295, %v3487_v0  ;;  %713 = vmatprep.mubr.bf16.mxu0 %v3488_v2  ;;  %756 = vmatprep.mubr.bf16.mxu1 %v3488_v2  ;;  %vm625_vm2 = vcmask 220160   ;;  %s3138_s10 = sshll.u32 %s417_s28, 7 }
  0x62   : > { %3461 = vset.pattern.permute.xlu0 %v3488_v2  ;;  %s3817_s30 = scalar_lea.vmem [#allocation2], %s3137_s29  ;;  %v3826_v11 = vsel %vm630_vm1, %v631_v1, 0  ;;  %s4615_s11 = scalar_lea.vmem [#allocation3], %s3138_s10 }
  0x63   : > { %v444_v3 = vld [vmem:[%s3817_s30] sm:$0xff]  ;;  %v445_v5 = vld [vmem:[%s3817_s30 + $0x8] sm:$0xff]  ;;  %v446_v18 = vld [vmem:[%s3817_s30 + $0x10] sm:$0xff]  ;;  %s3434_s12 = sshll.u32 (%p3539_p5), %s3129_s15, 6 }
  0x64   : > { %v452_v4 = vld [vmem:[%s3817_s30 + $0x40] sm:$0xff]  ;;  %v453_v7 = vld [vmem:[%s3817_s30 + $0x48] sm:$0xff]  ;;  %v454_v21 = vld [vmem:[%s3817_s30 + $0x50] sm:$0xff]  ;;  %s3025_s20 = scalar_lea.vmem (%p3539_p5), %s4783_s3, %s3434_s12 }
  0x65   : > { %v3141_v6 = vcombine.high %v444_v3, %v452_v4  ;;  %v3140_v8 = vcombine.low %v444_v3, %v452_v4  ;;  %v460_v9 = vld [vmem:[%s3817_s30 + $0x80] sm:$0xff]  ;;  %v3143_v12 = vcombine.high %v445_v5, %v453_v7  ;;  %v3142_v13 = vcombine.low %v445_v5, %v453_v7  ;;  %v461_v15 = vld [vmem:[%s3817_s30 + $0x88] sm:$0xff]  ;;  %v447_v22 = vld [vmem:[%s3817_s30 + $0x18] sm:$0xff] }
  0x66   : > { %v468_v10 = vld [vmem:[%s3817_s30 + $0xc0] sm:$0x33]  ;;  %v469_v16 = vld [vmem:[%s3817_s30 + $0xc8] sm:$0x33]  ;;  %v455_v23 = vld [vmem:[%s3817_s30 + $0x58] sm:$0xff]  ;;  %v3145_v31 = vcombine.high %v446_v18, %v454_v21  ;;  %v3144_v37 = vcombine.low %v446_v18, %v454_v21 }
  0x67   : > { %v3157_v14 = vcombine.high %v460_v9, %v468_v10  ;;  %v3156_v17 = vcombine.low %v460_v9, %v468_v10  ;;  %681 = vmatprep.subr.bf16.mxu0 %v3141_v6  ;;  %v3159_v19 = vcombine.high %v461_v15, %v469_v16  ;;  %v3158_v20 = vcombine.low %v461_v15, %v469_v16  ;;  %v462_v26 = vld [vmem:[%s3817_s30 + $0x90] sm:$0xff]  ;;  %v463_v28 = vld [vmem:[%s3817_s30 + $0x98] sm:$0xff]  ;;  %v448_v42 = vld [vmem:[%s3817_s30 + $0x20] sm:$0xff] }
  0x68   : > { %724 = vmatprep.subr.bf16.mxu1 %v3143_v12  ;;  %682 = vmatpush1.bf16.msra.mxu0 %v3140_v8  ;;  %v470_v27 = vld [vmem:[%s3817_s30 + $0xd0] sm:$0x33]  ;;  %v471_v32 = vld [vmem:[%s3817_s30 + $0xd8] sm:$0x33]  ;;  %v3147_v33 = vcombine.high %v447_v22, %v455_v23  ;;  %v3146_v39 = vcombine.low %v447_v22, %v455_v23  ;;  %v456_v43 = vld [vmem:[%s3817_s30 + $0x60] sm:$0xff] }
  0x69   : > { %v637_v24 = vand.u32 %v3157_v14, %v3826_v11  ;;  %v634_v25 = vand.u32 %v3156_v17, %v3826_v11  ;;  %725 = vmatpush1.bf16.msra.mxu1 %v3142_v13  ;;  %v643_v29 = vand.u32 %v3159_v19, %v3826_v11  ;;  %v640_v30 = vand.u32 %v3158_v20, %v3826_v11  ;;  %v449_v45 = vld [vmem:[%s3817_s30 + $0x28] sm:$0xff]  ;;  %v464_v46 = vld [vmem:[%s3817_s30 + $0xa0] sm:$0xff]  ;;  %v450_v62 = vld [vmem:[%s3817_s30 + $0x30] sm:$0xff] }
  0x6a   : > { %v3161_v34 = vcombine.high %v462_v26, %v470_v27  ;;  %v3163_v36 = vcombine.high %v463_v28, %v471_v32  ;;  %v3160_v38 = vcombine.low %v462_v26, %v470_v27  ;;  %v3162_v41 = vcombine.low %v463_v28, %v471_v32  ;;  %v472_v47 = vld [vmem:[%s3817_s30 + $0xe0] sm:$0x33]  ;;  %v457_v48 = vld [vmem:[%s3817_s30 + $0x68] sm:$0xff]  ;;  %v458_v63 = vld [vmem:[%s3817_s30 + $0x70] sm:$0xff] }
  0x6b   : > { %683 = vmatprep.subr.bf16.mxu0 %v637_v24  ;;  %726 = vmatprep.subr.bf16.mxu1 %v643_v29  ;;  %v465_v49 = vld [vmem:[%s3817_s30 + $0xa8] sm:$0xff]  ;;  %v3149_v53 = vcombine.high %v448_v42, %v456_v43  ;;  %v3165_v54 = vcombine.high %v464_v46, %v472_v47  ;;  %v3151_v55 = vcombine.high %v449_v45, %v457_v48  ;;  %v451_v1 = vld [vmem:[%s3817_s30 + $0x38] sm:$0xff]  ;;  %v466_v3 = vld [vmem:[%s3817_s30 + $0xb0] sm:$0xff] }
  0x6c   : > { %684 = vmatpush1.bf16.msra.mxu0 %v634_v25  ;;  %v649_v40 = vand.u32 %v3161_v34, %v3826_v11  ;;  %v655_v44 = vand.u32 %v3163_v36, %v3826_v11  ;;  %v473_v50 = vld [vmem:[%s3817_s30 + $0xe8] sm:$0x33]  ;;  %v646_v51 = vand.u32 %v3160_v38, %v3826_v11  ;;  %v652_v52 = vand.u32 %v3162_v41, %v3826_v11  ;;  %v474_v4 = vld [vmem:[%s3817_s30 + $0xf0] sm:$0x33]  ;;  %v459_v5 = vld [vmem:[%s3817_s30 + $0x78] sm:$0xff] }
  0x6d   : > { %727 = vmatpush1.bf16.msra.mxu1 %v640_v30  ;;  %767 = vmatprep.subr.bf16.mxu0 %v3145_v31  ;;  %v3167_v56 = vcombine.high %v465_v49, %v473_v50  ;;  %v3148_v57 = vcombine.low %v448_v42, %v456_v43  ;;  %v3164_v58 = vcombine.low %v464_v46, %v472_v47  ;;  %v467_v6 = vld [vmem:[%s3817_s30 + $0xb8] sm:$0xff]  ;;  %v3884_v16 = vld [vmem:[%s3817_s30 + $0x100] sm:$0xff]  ;;  %v3197_v22 = vld [vmem:[%s3817_s30 + $0x188] sm:$0xff] }
  0x6e   : > { %810 = vmatprep.subr.bf16.mxu1 %v3147_v33  ;;  %v3150_v59 = vcombine.low %v449_v45, %v457_v48  ;;  %v661_v60 = vand.u32 %v3165_v54, %v3826_v11  ;;  %v3166_v61 = vcombine.low %v465_v49, %v473_v50  ;;  %v475_v7 = vld [vmem:[%s3817_s30 + $0xf8] sm:$0x33]  ;;  %v3153_v10 = vcombine.high %v450_v62, %v458_v63  ;;  %v3196_v17 = vld [vmem:[%s3817_s30 + $0x180] sm:$0xff]  ;;  %v3205_v23 = vld [vmem:[%s3817_s30 + $0x1c8] sm:$0x33] }
  0x6f   : > { %3172 = vmatmul.mubr.msk.bf16.vlgmr.msra.gmra.mrb[0].mxu0 %vm625_vm2, %v3845_v35  ;;  %v667_v0 = vand.u32 %v3167_v56, %v3826_v11  ;;  %v658_v8 = vand.u32 %v3164_v58, %v3826_v11  ;;  %v3169_v12 = vcombine.high %v466_v3, %v474_v4  ;;  %v3155_v13 = vcombine.high %v451_v1, %v459_v5  ;;  %v3204_v18 = vld [vmem:[%s3817_s30 + $0x1c0] sm:$0x33]  ;;  %v3895_v26 = vld [vmem:[%s3817_s30 + $0x108] sm:$0xff]  ;;  %v3903_v31 = vld [vmem:[%s3817_s30 + $0x110] sm:$0xff] }
  0x70   : > { %3173 = vmatmul.mubr.msk.bf16.vlgmr.msra.gmra.mrb[0].mxu1 %vm625_vm2, %v3845_v35  ;;  %768 = vmatpush1.bf16.msra.mxu0 %v3144_v37  ;;  %v664_v9 = vand.u32 %v3166_v61, %v3826_v11  ;;  %v3168_v14 = vcombine.low %v466_v3, %v474_v4  ;;  %v3171_v15 = vcombine.high %v467_v6, %v475_v7  ;;  %v3889_v21 = vld [vmem:[%s3817_s30 + $0x140] sm:$0xff]  ;;  %v3898_v27 = vld [vmem:[%s3817_s30 + $0x148] sm:$0xff]  ;;  %v3906_v32 = vld [vmem:[%s3817_s30 + $0x150] sm:$0xff] }
  0x71   : > { %811 = vmatpush1.bf16.msra.mxu1 %v3146_v39  ;;  %769 = vmatprep.subr.bf16.mxu0 %v649_v40  ;;  %v3152_v19 = vcombine.low %v450_v62, %v458_v63  ;;  %v3170_v20 = vcombine.low %v467_v6, %v475_v7  ;;  %v3154_v24 = vcombine.low %v451_v1, %v459_v5  ;;  %v3909_v33 = vld [vmem:[%s3817_s30 + $0x280] sm:$0xff]  ;;  %v3269_v40 = vld [vmem:[%s3817_s30 + $0x288] sm:$0xff]  ;;  %v3928_v45 = vld [vmem:[%s3817_s30 + $0x118] sm:$0xff] }
  0x72   : > { %812 = vmatprep.subr.bf16.mxu1 %v655_v44  ;;  %799 = vmatprep.mubr.bf16.mxu0 %v3488_v2  ;;  %v673_v25 = vand.u32 %v3169_v12, %v3826_v11  ;;  %v679_v28 = vand.u32 %v3171_v15, %v3826_v11  ;;  %v670_v29 = vand.u32 %v3168_v14, %v3826_v11  ;;  %v3918_v39 = vld [vmem:[%s3817_s30 + $0x2c0] sm:$0x33]  ;;  %v3277_v41 = vld [vmem:[%s3817_s30 + $0x2c8] sm:$0x33]  ;;  %v3931_v46 = vld [vmem:[%s3817_s30 + $0x158] sm:$0xff] }
  0x73   : > { %842 = vmatprep.mubr.bf16.mxu1 %v3488_v2  ;;  %v3229_v30 = vcombine.high %v3196_v17, %v3204_v18  ;;  %v3212_v34 = vcombine.low %v3884_v16, %v3889_v21  ;;  %v3213_v36 = vcombine.high %v3884_v16, %v3889_v21  ;;  %v3228_v37 = vcombine.low %v3196_v17, %v3204_v18  ;;  %v3270_v54 = vld [vmem:[%s3817_s30 + $0x290] sm:$0xff]  ;;  %v3271_v61 = vld [vmem:[%s3817_s30 + $0x298] sm:$0xff]  ;;  %v3273_v17 = vld [vmem:[%s3817_s30 + $0x2a8] sm:$0xff] }
  0x74   : > { %770 = vmatpush1.bf16.msra.mxu0 %v646_v51  ;;  %v3230_v38 = vcombine.low %v3197_v22, %v3205_v23  ;;  %v676_v42 = vand.u32 %v3170_v20, %v3826_v11  ;;  %v3214_v43 = vcombine.low %v3895_v26, %v3898_v27  ;;  %v3231_v44 = vcombine.high %v3197_v22, %v3205_v23  ;;  %v3198_v51 = vld [vmem:[%s3817_s30 + $0x190] sm:$0xff]  ;;  %v3279_v62 = vld [vmem:[%s3817_s30 + $0x2d8] sm:$0x33]  ;;  %v3281_v18 = vld [vmem:[%s3817_s30 + $0x2e8] sm:$0x33] }
  0x75   : > { %813 = vmatpush1.bf16.msra.mxu1 %v652_v52  ;;  %853 = vmatprep.subr.bf16.mxu0 %v3149_v53  ;;  %v3215_v47 = vcombine.high %v3895_v26, %v3898_v27  ;;  %v3216_v48 = vcombine.low %v3903_v31, %v3906_v32  ;;  %v3217_v49 = vcombine.high %v3903_v31, %v3906_v32  ;;  %v3960_v1 = vld [vmem:[%s3817_s30 + $0x198] sm:$0xff]  ;;  %v3985_v22 = vld [vmem:[%s3817_s30 + $0x120] sm:$0xff]  ;;  %v4092_v31 = vld [vmem:[%s3817_s30 + $0x170] sm:$0xff] }
  0x76   : > { %896 = vmatprep.subr.bf16.mxu1 %v3151_v55  ;;  %v1206_v50 = vand.u32 %v3229_v30, %v3826_v11  ;;  %v3300_v52 = vcombine.low %v3909_v33, %v3918_v39  ;;  %v3302_v53 = vcombine.low %v3269_v40, %v3277_v41  ;;  %v3278_v55 = vld [vmem:[%s3817_s30 + $0x2d0] sm:$0x33]  ;;  %v1203_v56 = vand.u32 %v3228_v37, %v3826_v11  ;;  %v3963_v3 = vld [vmem:[%s3817_s30 + $0x1d8] sm:$0x33]  ;;  %v3988_v23 = vld [vmem:[%s3817_s30 + $0x160] sm:$0xff] }
  0x77   : > { %3174 = vmatmul.mubr.msk.bf16.vlgmr.msra.gmra.mrb[4].mxu0 %vm625_vm2, %v3845_v35  ;;  %v3218_v58 = vcombine.low %v3928_v45, %v3931_v46  ;;  %v1212_v63 = vand.u32 %v3231_v44, %v3826_v11  ;;  %v3304_v7 = vcombine.low %v3270_v54, %v3278_v55  ;;  %v3306_v14 = vcombine.low %v3271_v61, %v3279_v62  ;;  %v3283_v16 = vld [vmem:[%s3817_s30 + $0x2f8] sm:$0x33]  ;;  %v4024_v44 = vld [vmem:[%s3817_s30 + $0x168] sm:$0xff] }
  0x78   : > { %3175 = vmatmul.mubr.msk.bf16.vlgmr.msra.gmra.mrb[4].mxu1 %vm625_vm2, %v3845_v35  ;;  %854 = vmatpush1.bf16.msra.mxu0 %v3148_v57  ;;  %v3949_v57 = vand.u32 %v3230_v38, %v3826_v11  ;;  %v3966_v4 = vand.u32 %v3300_v52, %v3826_v11  ;;  %v3969_v5 = vand.u32 %v3302_v53, %v3826_v11  ;;  %v3282_v38 = vld [vmem:[%s3817_s30 + $0x2f0] sm:$0x33] }
  0x79   : > { %897 = vmatpush1.bf16.msra.mxu1 %v3150_v59  ;;  %855 = vmatprep.subr.bf16.mxu0 %v661_v60  ;;  %v3206_v59 = vld [vmem:[%s3817_s30 + $0x1d0] sm:$0x33]  ;;  %v3303_v60 = vcombine.high %v3269_v40, %v3277_v41  ;;  %v3307_v15 = vcombine.high %v3271_v61, %v3279_v62  ;;  %v3235_v20 = vcombine.high %v3960_v1, %v3963_v3  ;;  %v3275_v40 = vld [vmem:[%s3817_s30 + $0x2b8] sm:$0xff]  ;;  %v3340_v61 = vld [vmem:[%s3817_s30 + $0x380] sm:$0xff] }
  0x7a   : > { %898 = vmatprep.subr.bf16.mxu1 %v667_v0  ;;  %885 = vmatprep.mubr.bf16.mxu0 %v3488_v2  ;;  %v3219_v0 = vcombine.high %v3928_v45, %v3931_v46  ;;  %v3232_v12 = vcombine.low %v3198_v51, %v3206_v59  ;;  %v4005_v27 = vand.u32 %v3306_v14, %v3826_v11  ;;  %v3348_v62 = vld [vmem:[%s3817_s30 + $0x3c0] sm:$0x33] }
  0x7b   : > { %928 = vmatprep.mubr.bf16.mxu1 %v3488_v2  ;;  %v3972_v6 = vand.u32 %v3303_v60, %v3826_v11  ;;  %v4002_v26 = vand.u32 %v3307_v15, %v3826_v11  ;;  %v3311_v37 = vcombine.high %v3273_v17, %v3281_v18  ;;  %v3221_v53 = vcombine.high %v3985_v22, %v3988_v23 }
  0x7c   : > { %856 = vmatpush1.bf16.msra.mxu0 %v658_v8  ;;  %v3305_v8 = vcombine.high %v3270_v54, %v3278_v55  ;;  %v3208_v54 = vld [vmem:[%s3817_s30 + $0x1e0] sm:$0x33]  ;;  %v3314_v60 = vcombine.low %v3275_v40, %v3283_v16  ;;  %v3372_v14 = vcombine.low %v3340_v61, %v3348_v62  ;;  %v3373_v15 = vcombine.high %v3340_v61, %v3348_v62  ;;  %v4118_v62 = vld [vmem:[%s3817_s30 + $0x178] sm:$0xff] }
  0x7d   : > { %899 = vmatpush1.bf16.msra.mxu1 %v664_v9  ;;  %939 = vmatprep.subr.bf16.mxu0 %v3153_v10  ;;  %v3272_v9 = vld [vmem:[%s3817_s30 + $0x2a0] sm:$0xff] }
  0x7e   : > { %982 = vmatprep.subr.bf16.mxu1 %v3155_v13  ;;  %v3280_v10 = vld [vmem:[%s3817_s30 + $0x2e0] sm:$0x33]  ;;  %v3233_v13 = vcombine.high %v3198_v51, %v3206_v59  ;;  %v4033_v51 = vand.u32 %v3311_v37, %v3826_v11  ;;  %v4089_v37 = vld [vmem:[%s3817_s30 + $0x130] sm:$0xff]  ;;  %v4095_v32 = vand.u32 %v3373_v15, %v3826_v11 }
  0x7f   : > { %3176 = vmatmul.mubr.msk.bf16.vlgmr.msra.gmra.mrb[8].mxu0 %vm625_vm2, %v3845_v35  ;;  %v3309_v30 = vcombine.high %v3272_v9, %v3280_v10  ;;  %v3225_v61 = vcombine.high %v4089_v37, %v4092_v31 }
  0x80   : > { %3177 = vmatmul.mubr.msk.bf16.vlgmr.msra.gmra.mrb[8].mxu1 %vm625_vm2, %v3845_v35  ;;  %940 = vmatpush1.bf16.msra.mxu0 %v3152_v19  ;;  %v3234_v19 = vcombine.low %v3960_v1, %v3963_v3  ;;  %v1218_v21 = vand.u32 %v3233_v13, %v3826_v11  ;;  %v3315_v1 = vcombine.high %v3275_v40, %v3283_v16  ;;  %v3341_v3 = vld [vmem:[%s3817_s30 + $0x388] sm:$0xff]  ;;  %v4109_v40 = vld [vmem:[%s3817_s30 + $0x138] sm:$0xff] }
  0x81   : > { %983 = vmatpush1.bf16.msra.mxu1 %v3154_v24  ;;  %941 = vmatprep.subr.bf16.mxu0 %v673_v25  ;;  %v3991_v24 = vand.u32 %v3305_v8, %v3826_v11  ;;  %v3994_v25 = vand.u32 %v3304_v7, %v3826_v11  ;;  %v3349_v7 = vld [vmem:[%s3817_s30 + $0x3c8] sm:$0x33] }
  0x82   : > { %984 = vmatprep.subr.bf16.mxu1 %v679_v28  ;;  %971 = vmatprep.mubr.bf16.mxu0 %v3488_v2  ;;  %v3308_v28 = vcombine.low %v3272_v9, %v3280_v10  ;;  %v4063_v9 = vand.u32 %v3314_v60, %v3826_v11  ;;  %v3201_v10 = vld [vmem:[%s3817_s30 + $0x1a8] sm:$0xff]  ;;  %v4071_v13 = vand.u32 %v3315_v1, %v3826_v11 }
  0x83   : > { %1014 = vmatprep.mubr.bf16.mxu1 %v3488_v2  ;;  %v3345_v1 = vld [vmem:[%s3817_s30 + $0x3a8] sm:$0xff] }
  0x84   : > { %942 = vmatpush1.bf16.msra.mxu0 %v670_v29  ;;  %v3274_v29 = vld [vmem:[%s3817_s30 + $0x2b0] sm:$0xff]  ;;  %v4016_v41 = vand.u32 %v3308_v28, %v3826_v11 }
  0x85   : > { %985 = vmatpush1.bf16.msra.mxu1 %v676_v42  ;;  %1250 = vmatprep.subr.bf16.mxu0 %v3213_v36  ;;  %v3310_v36 = vcombine.low %v3273_v17, %v3281_v18  ;;  %v1215_v42 = vand.u32 %v3232_v12, %v3826_v11  ;;  %v3312_v55 = vcombine.low %v3274_v29, %v3282_v38  ;;  %v3209_v12 = vld [vmem:[%s3817_s30 + $0x1e8] sm:$0x33]  ;;  %v3342_v17 = vld [vmem:[%s3817_s30 + $0x390] sm:$0xff] }
  0x86   : > { %1293 = vmatprep.subr.bf16.mxu1 %v3215_v47  ;;  %v4027_v47 = vld [vmem:[%s3817_s30 + $0x1a0] sm:$0xff]  ;;  %v3313_v59 = vcombine.high %v3274_v29, %v3282_v38  ;;  %v3350_v28 = vld [vmem:[%s3817_s30 + $0x3d0] sm:$0x33]  ;;  %v3343_v29 = vld [vmem:[%s3817_s30 + $0x398] sm:$0xff]  ;;  %v3239_v45 = vcombine.high %v3201_v10, %v3209_v12  ;;  %v3238_v38 = vcombine.low %v3201_v10, %v3209_v12 }
  0x87   : > { %3178 = vmatmul.mubr.msk.bf16.vlgmr.msra.gmra.mrb[12].mxu0 %vm625_vm2, %v3845_v35  ;;  %v4036_v52 = vand.u32 %v3310_v36, %v3826_v11  ;;  %v3237_v18 = vcombine.high %v4027_v47, %v3208_v54  ;;  %v3376_v16 = vcombine.low %v3342_v17, %v3350_v28 }
  0x88   : > { %3179 = vmatmul.mubr.msk.bf16.vlgmr.msra.gmra.mrb[12].mxu1 %vm625_vm2, %v3845_v35  ;;  %1251 = vmatpush1.bf16.msra.mxu0 %v3212_v34  ;;  %v3220_v34 = vcombine.low %v3985_v22, %v3988_v23 }
  0x89   : > { %1294 = vmatpush1.bf16.msra.mxu1 %v3214_v43  ;;  %1252 = vmatprep.subr.bf16.mxu0 %v1206_v50  ;;  %v4021_v43 = vld [vmem:[%s3817_s30 + $0x128] sm:$0xff]  ;;  %v4030_v50 = vand.u32 %v3309_v30, %v3826_v11  ;;  %v3351_v30 = vld [vmem:[%s3817_s30 + $0x3d8] sm:$0x33]  ;;  %v4135_v10 = vand.u32 %v3376_v16, %v3826_v11 }
  0x8a   : > { %1295 = vmatprep.subr.bf16.mxu1 %v1212_v63  ;;  %1282 = vmatprep.mubr.bf16.mxu0 %v3488_v2  ;;  %v1224_v63 = vand.u32 %v3235_v20, %v3826_v11  ;;  %v3222_v8 = vcombine.low %v4021_v43, %v4024_v44  ;;  %v3375_v20 = vcombine.high %v3341_v3, %v3349_v7  ;;  %v3355_v16 = vld [vmem:[%s3817_s30 + $0x3f8] sm:$0x33] }
  0x8b   : > { %1325 = vmatprep.mubr.bf16.mxu1 %v3488_v2  ;;  %v3223_v36 = vcombine.high %v4021_v43, %v4024_v44  ;;  %v3224_v43 = vcombine.low %v4089_v37, %v4092_v31  ;;  %v3226_v44 = vcombine.low %v4109_v40, %v4118_v62  ;;  %v2829_v31 = vld [vmem:[%s4782_s2 + $0x8] sm:$0xff] }
  0x8c   : > { %1253 = vmatpush1.bf16.msra.mxu0 %v1203_v56  ;;  %v1221_v56 = vand.u32 %v3234_v19, %v3826_v11  ;;  %v3374_v19 = vcombine.low %v3341_v3, %v3349_v7  ;;  %v4102_v46 = vand.u32 %v3375_v20, %v3826_v11  ;;  %v3353_v3 = vld [vmem:[%s3817_s30 + $0x3e8] sm:$0x33]  ;;  %v4129_v7 = vld [vmem:[%s3817_s30 + $0x1f0] sm:$0x33]  ;;  %v1233_v20 = vand.u32 %v3238_v38, %v3826_v11 }
  0x8d   : > { %1296 = vmatpush1.bf16.msra.mxu1 %v3949_v57  ;;  %1336 = vmatprep.subr.bf16.mxu0 %v3217_v49  ;;  %v4057_v57 = vand.u32 %v3313_v59, %v3826_v11  ;;  %v4060_v49 = vand.u32 %v3312_v55, %v3826_v11  ;;  %v3352_v55 = vld [vmem:[%s3817_s30 + $0x3e0] sm:$0x33]  ;;  %v1230_v59 = vand.u32 %v3237_v18, %v3826_v11 }
  0x8e   : > { %1379 = vmatprep.subr.bf16.mxu1 %v3219_v0  ;;  %v3236_v0 = vcombine.low %v4027_v47, %v3208_v54  ;;  %v3378_v47 = vcombine.low %v3343_v29, %v3351_v30  ;;  %v3344_v54 = vld [vmem:[%s3817_s30 + $0x3a0] sm:$0xff] }
  0x8f   : > { %3244 = vmatmul.mubr.msk.bf16.vlgmr.msra.gmra.mrb[16].mxu0 %vm625_vm2, %v3845_v35  ;;  %v3381_v18 = vcombine.high %v3344_v54, %v3352_v55 }
  0x90   : > { %3245 = vmatmul.mubr.msk.bf16.vlgmr.msra.gmra.mrb[16].mxu1 %vm625_vm2, %v3845_v35  ;;  %1337 = vmatpush1.bf16.msra.mxu0 %v3216_v48  ;;  %v4098_v48 = vand.u32 %v3372_v14, %v3826_v11  ;;  %v1227_v60 = vand.u32 %v3236_v0, %v3826_v11  ;;  %v4138_v12 = vand.u32 %v3378_v47, %v3826_v11  ;;  %v3211_v14 = vld [vmem:[%s3817_s30 + $0x1f8] sm:$0x33] }
  0x91   : > { %1380 = vmatpush1.bf16.msra.mxu1 %v3218_v58  ;;  %1338 = vmatprep.subr.bf16.mxu0 %v1218_v21  ;;  %v4105_v58 = vand.u32 %v3374_v19, %v3826_v11  ;;  %v3377_v21 = vcombine.high %v3342_v17, %v3350_v28  ;;  %v3380_v17 = vcombine.low %v3344_v54, %v3352_v55  ;;  %v3346_v19 = vld [vmem:[%s3817_s30 + $0x3b0] sm:$0xff]  ;;  %v2828_v54 = vld [vmem:[%s4782_s2] sm:$0xff] }
  0x92   : > { %1381 = vmatprep.subr.bf16.mxu1 %v1224_v63  ;;  %1368 = vmatprep.mubr.bf16.mxu0 %v3488_v2  ;;  %v3379_v63 = vcombine.high %v3343_v29, %v3351_v30  ;;  %v3227_v28 = vcombine.high %v4109_v40, %v4118_v62  ;;  %v3382_v29 = vcombine.low %v3345_v1, %v3353_v3 }
  0x93   : > { %1411 = vmatprep.mubr.bf16.mxu1 %v3488_v2  ;;  %v4132_v0 = vand.u32 %v3377_v21, %v3826_v11  ;;  %v3383_v30 = vcombine.high %v3345_v1, %v3353_v3  ;;  %v4163_v38 = vand.u32 %v3381_v18, %v3826_v11  ;;  %v4166_v47 = vand.u32 %v3380_v17, %v3826_v11  ;;  %v3260_v17 = vld [vmem:[%s3817_s30 + $0x240] sm:$0xff]  ;;  %v3253_v18 = vld [vmem:[%s3817_s30 + $0x208] sm:$0xff] }
  0x94   : > { %1339 = vmatpush1.bf16.msra.mxu0 %v1215_v42  ;;  %v4126_v42 = vld [vmem:[%s3817_s30 + $0x1b0] sm:$0xff]  ;;  %v4144_v15 = vand.u32 %v3379_v63, %v3826_v11  ;;  %2832 = vperm.xlu0 %3461, %v2828_v54  }
  0x95   : > { %1382 = vmatpush1.bf16.msra.mxu1 %v1221_v56  ;;  %1422 = vmatprep.subr.bf16.mxu0 %v3221_v53  ;;  %v1236_v56 = vand.u32 %v3239_v45, %v3826_v11  ;;  %v3203_v53 = vld [vmem:[%s3817_s30 + $0x1b8] sm:$0xff]  ;;  %v3241_v21 = vcombine.high %v4126_v42, %v4129_v7  ;;  %v4175_v23 = vand.u32 %v3383_v30, %v3826_v11 }
  0x96   : > { %1465 = vmatprep.subr.bf16.mxu1 %v3223_v36  ;;  %v3354_v36 = vld [vmem:[%s3817_s30 + $0x3f0] sm:$0x33]  ;;  %v3347_v45 = vld [vmem:[%s3817_s30 + $0x3b8] sm:$0xff]  ;;  %v3243_v22 = vcombine.high %v3203_v53, %v3211_v14 }
  0x97   : > { %3246 = vmatmul.mubr.msk.bf16.vlgmr.msra.gmra.mrb[20].mxu0 %vm625_vm2, %v3845_v35  ;;  %v3384_v55 = vcombine.low %v3346_v19, %v3354_v36  ;;  %v3385_v63 = vcombine.high %v3346_v19, %v3354_v36  ;;  %v3386_v1 = vcombine.low %v3347_v45, %v3355_v16  ;;  %v1242_v40 = vand.u32 %v3241_v21, %v3826_v11  ;;  %v3261_v19 = vld [vmem:[%s3817_s30 + $0x248] sm:$0xff] }
  0x98   : > { %3247 = vmatmul.mubr.msk.bf16.vlgmr.msra.gmra.mrb[20].mxu1 %vm625_vm2, %v3845_v35  ;;  %1423 = vmatpush1.bf16.msra.mxu0 %v3220_v34  ;;  %v4178_v34 = vand.u32 %v3382_v29, %v3826_v11  ;;  %v3286_v30 = vcombine.low %v3253_v18, %v3261_v19 }
  0x99   : > { %1466 = vmatpush1.bf16.msra.mxu1 %v3222_v8  ;;  %1424 = vmatprep.subr.bf16.mxu0 %v1230_v59  ;;  %v3387_v8 = vcombine.high %v3347_v45, %v3355_v16  ;;  %v3240_v59 = vcombine.low %v4126_v42, %v4129_v7  ;;  %v4189_v3 = vand.u32 %v3385_v63, %v3826_v11  ;;  %v3252_v7 = vld [vmem:[%s3817_s30 + $0x200] sm:$0xff]  ;;  %v3254_v45 = vld [vmem:[%s3817_s30 + $0x210] sm:$0xff] }
  0x9a   : > { %1467 = vmatprep.subr.bf16.mxu1 %v1236_v56  ;;  %1454 = vmatprep.mubr.bf16.mxu0 %v3488_v2  ;;  %v4192_v56 = vand.u32 %v3384_v55, %v3826_v11  ;;  %v4195_v37 = vand.u32 %v3386_v1, %v3826_v11  ;;  %v1248_v42 = vand.u32 %v3243_v22, %v3826_v11  ;;  %v3262_v16 = vld [vmem:[%s3817_s30 + $0x250] sm:$0xff]  ;;  %v3256_v55 = vld [vmem:[%s3817_s30 + $0x220] sm:$0xff]  ;;  %v3257_v1 = vld [vmem:[%s3817_s30 + $0x228] sm:$0xff] }
  0x9b   : > { %1497 = vmatprep.mubr.bf16.mxu1 %v3488_v2  ;;  %v4202_v62 = vand.u32 %v3387_v8, %v3826_v11  ;;  %2837 = vperm.xlu0 %3461, %v2829_v31   ;;  %v3284_v29 = vcombine.low %v3252_v7, %v3260_v17  ;;  %v3289_v21 = vcombine.high %v3254_v45, %v3262_v16  ;;  %v3264_v63 = vld [vmem:[%s3817_s30 + $0x260] sm:$0xff]  ;;  %v3258_v8 = vld [vmem:[%s3817_s30 + $0x230] sm:$0xff] }
  0x9c   : > { %1425 = vmatpush1.bf16.msra.mxu0 %v1227_v60  ;;  %v3242_v60 = vcombine.low %v3203_v53, %v3211_v14  ;;  %v3285_v14 = vcombine.high %v3252_v7, %v3260_v17  ;;  %v3288_v54 = vcombine.low %v3254_v45, %v3262_v16 }
  0x9d   : > { %1468 = vmatpush1.bf16.msra.mxu1 %v1233_v20  ;;  %1508 = vmatprep.subr.bf16.mxu0 %v3225_v61  ;;  %v1239_v61 = vand.u32 %v3240_v59, %v3826_v11  ;;  %v3301_v20 = vcombine.high %v3909_v33, %v3918_v39  ;;  %v3255_v33 = vld [vmem:[%s3817_s30 + $0x218] sm:$0xff]  ;;  %v3266_v59 = vld [vmem:[%s3817_s30 + $0x270] sm:$0xff] }
  0x9e   : > { %1551 = vmatprep.subr.bf16.mxu1 %v3227_v28  ;;  %v1245_v53 = vand.u32 %v3242_v60, %v3826_v11  ;;  %v3287_v28 = vcombine.high %v3253_v18, %v3261_v19  ;;  %v3263_v39 = vld [vmem:[%s3817_s30 + $0x258] sm:$0xff]  ;;  %v3296_v31 = vcombine.low %v3258_v8, %v3266_v59  ;;  %v3324_v60 = vld [vmem:[%s3817_s30 + $0x300] sm:$0xff]  ;;  %v3326_v18 = vld [vmem:[%s3817_s30 + $0x310] sm:$0xff] }
  0x9f   : > { %3248 = vmatmul.mubr.msk.bf16.vlgmr.msra.gmra.mrb[24].mxu0 %vm625_vm2, %v3845_v35  ;;  %v1775_v36 = vand.u32 %v3301_v20, %v3826_v11  ;;  %v3291_v11 = vcombine.high %v3255_v33, %v3263_v39  ;;  %v3290_v22 = vcombine.low %v3255_v33, %v3263_v39  ;;  %v3334_v19 = vld [vmem:[%s3817_s30 + $0x350] sm:$0xff]  ;;  %v3336_v20 = vld [vmem:[%s3817_s30 + $0x360] sm:$0xff] }
  0xa0   : > { %3249 = vmatmul.mubr.msk.bf16.vlgmr.msra.gmra.mrb[24].mxu1 %vm625_vm2, %v3845_v35  ;;  %1509 = vmatpush1.bf16.msra.mxu0 %v3224_v43  ;;  %v3292_v43 = vcombine.low %v3256_v55, %v3264_v63 }
  0xa1   : > { %1552 = vmatpush1.bf16.msra.mxu1 %v3226_v44  ;;  %1510 = vmatprep.subr.bf16.mxu0 %v1242_v40 }
  0xa2   : > { %1553 = vmatprep.subr.bf16.mxu1 %v1248_v42  ;;  %1540 = vmatprep.mubr.bf16.mxu0 %v3488_v2  ;;  %v3332_v42 = vld [vmem:[%s3817_s30 + $0x340] sm:$0xff] }
  0xa3   : > { %1583 = vmatprep.mubr.bf16.mxu1 %v3488_v2  ;;  %v3356_v7 = vcombine.low %v3324_v60, %v3332_v42 }
  0xa4   : > { %1511 = vmatpush1.bf16.msra.mxu0 %v1239_v61  ;;  %v3360_v61 = vcombine.low %v3326_v18, %v3334_v19 }
  0xa5   : > { %1554 = vmatpush1.bf16.msra.mxu1 %v1245_v53  ;;  %1819 = vmatprep.subr.bf16.mxu0 %v3285_v14  ;;  %v3328_v14 = vld [vmem:[%s3817_s30 + $0x320] sm:$0xff] }
  0xa6   : > { %1862 = vmatprep.subr.bf16.mxu1 %v3287_v28  ;;  %v3364_v28 = vcombine.low %v3328_v14, %v3336_v20 }
  0xa7   : > { %3250 = vmatmul.mubr.msk.bf16.vlgmr.msra.gmra.mrb[28].mxu0 %vm625_vm2, %v3845_v35 }
  0xa8   : > { %3251 = vmatmul.mubr.msk.bf16.vlgmr.msra.gmra.mrb[28].mxu1 %vm625_vm2, %v3845_v35  ;;  %1820 = vmatpush1.bf16.msra.mxu0 %v3284_v29 }
  0xa9   : > { %1863 = vmatpush1.bf16.msra.mxu1 %v3286_v30  ;;  %1821 = vmatprep.subr.bf16.mxu0 %v1775_v36  ;;  %v3330_v30 = vld [vmem:[%s3817_s30 + $0x330] sm:$0xff] }
  0xaa   : > { %1864 = vmatprep.subr.bf16.mxu1 %v3972_v6  ;;  %1851 = vmatprep.mubr.bf16.mxu0 %v3488_v2  ;;  %v3265_v6 = vld [vmem:[%s3817_s30 + $0x268] sm:$0xff]  ;;  %v3338_v36 = vld [vmem:[%s3817_s30 + $0x370] sm:$0xff] }
  0xab   : > { %1894 = vmatprep.mubr.bf16.mxu1 %v3488_v2  ;;  %v3294_v44 = vcombine.low %v3257_v1, %v3265_v6  ;;  %v3368_v45 = vcombine.low %v3330_v30, %v3338_v36 }
  0xac   : > { %1822 = vmatpush1.bf16.msra.mxu0 %v3966_v4  ;;  %v3293_v4 = vcombine.high %v3256_v55, %v3264_v63 }
  0xad   : > { %1865 = vmatpush1.bf16.msra.mxu1 %v3969_v5  ;;  %1905 = vmatprep.subr.bf16.mxu0 %v3289_v21  ;;  %v3295_v5 = vcombine.high %v3257_v1, %v3265_v6 }
  0xae   : > { %1948 = vmatprep.subr.bf16.mxu1 %v3291_v11 }
  0xaf   : > { %3316 = vmatmul.mubr.msk.bf16.vlgmr.msra.gmra.mrb[32].mxu0 %vm625_vm2, %v3845_v35 }
  0xb0   : > { %3317 = vmatmul.mubr.msk.bf16.vlgmr.msra.gmra.mrb[32].mxu1 %vm625_vm2, %v3845_v35  ;;  %1906 = vmatpush1.bf16.msra.mxu0 %v3288_v54 }
  0xb1   : > { %1949 = vmatpush1.bf16.msra.mxu1 %v3290_v22  ;;  %1907 = vmatprep.subr.bf16.mxu0 %v3991_v24  ;;  %v3259_v24 = vld [vmem:[%s3817_s30 + $0x238] sm:$0xff] }
  0xb2   : > { %1950 = vmatprep.subr.bf16.mxu1 %v4002_v26  ;;  %1937 = vmatprep.mubr.bf16.mxu0 %v3488_v2  ;;  %v3267_v26 = vld [vmem:[%s3817_s30 + $0x278] sm:$0xff] }
  0xb3   : > { %1980 = vmatprep.mubr.bf16.mxu1 %v3488_v2  ;;  %v3298_v40 = vcombine.low %v3259_v24, %v3267_v26 }
  0xb4   : > { %1908 = vmatpush1.bf16.msra.mxu0 %v3994_v25  ;;  %v3297_v25 = vcombine.high %v3258_v8, %v3266_v59 }
  0xb5   : > { %1951 = vmatpush1.bf16.msra.mxu1 %v4005_v27  ;;  %1991 = vmatprep.subr.bf16.mxu0 %v3293_v4  ;;  %v3299_v27 = vcombine.high %v3259_v24, %v3267_v26 }
  0xb6   : > { %2034 = vmatprep.subr.bf16.mxu1 %v3295_v5 }
  0xb7   : > { %3318 = vmatmul.mubr.msk.bf16.vlgmr.msra.gmra.mrb[36].mxu0 %vm625_vm2, %v3845_v35 }
  0xb8   : > { %3319 = vmatmul.mubr.msk.bf16.vlgmr.msra.gmra.mrb[36].mxu1 %vm625_vm2, %v3845_v35  ;;  %1992 = vmatpush1.bf16.msra.mxu0 %v3292_v43 }
  0xb9   : > { %2035 = vmatpush1.bf16.msra.mxu1 %v3294_v44  ;;  %1993 = vmatprep.subr.bf16.mxu0 %v4030_v50  ;;  %v3325_v50 = vld [vmem:[%s3817_s30 + $0x308] sm:$0xff] }
  0xba   : > { %2036 = vmatprep.subr.bf16.mxu1 %v4033_v51  ;;  %2023 = vmatprep.mubr.bf16.mxu0 %v3488_v2  ;;  %v3333_v51 = vld [vmem:[%s3817_s30 + $0x348] sm:$0xff] }
  0xbb   : > { %2066 = vmatprep.mubr.bf16.mxu1 %v3488_v2  ;;  %v3358_v17 = vcombine.low %v3325_v50, %v3333_v51 }
  0xbc   : > { %1994 = vmatpush1.bf16.msra.mxu0 %v4016_v41  ;;  %v3357_v41 = vcombine.high %v3324_v60, %v3332_v42 }
  0xbd   : > { %2037 = vmatpush1.bf16.msra.mxu1 %v4036_v52  ;;  %2077 = vmatprep.subr.bf16.mxu0 %v3297_v25  ;;  %v3359_v52 = vcombine.high %v3325_v50, %v3333_v51 }
  0xbe   : > { %2120 = vmatprep.subr.bf16.mxu1 %v3299_v27 }
  0xbf   : > { %3320 = vmatmul.mubr.msk.bf16.vlgmr.msra.gmra.mrb[40].mxu0 %vm625_vm2, %v3845_v35 }
  0xc0   : > { %3321 = vmatmul.mubr.msk.bf16.vlgmr.msra.gmra.mrb[40].mxu1 %vm625_vm2, %v3845_v35  ;;  %2078 = vmatpush1.bf16.msra.mxu0 %v3296_v31 }
  0xc1   : > { %2121 = vmatpush1.bf16.msra.mxu1 %v3298_v40  ;;  %2079 = vmatprep.subr.bf16.mxu0 %v4057_v57  ;;  %v3327_v57 = vld [vmem:[%s3817_s30 + $0x318] sm:$0xff] }
  0xc2   : > { %2122 = vmatprep.subr.bf16.mxu1 %v4071_v13  ;;  %2109 = vmatprep.mubr.bf16.mxu0 %v3488_v2  ;;  %v3335_v13 = vld [vmem:[%s3817_s30 + $0x358] sm:$0xff] }
  0xc3   : > { %2152 = vmatprep.mubr.bf16.mxu1 %v3488_v2  ;;  %v3362_v53 = vcombine.low %v3327_v57, %v3335_v13 }
  0xc4   : > { %2080 = vmatpush1.bf16.msra.mxu0 %v4060_v49  ;;  %v3361_v49 = vcombine.high %v3326_v18, %v3334_v19 }
  0xc5   : > { %2123 = vmatpush1.bf16.msra.mxu1 %v4063_v9  ;;  %2388 = vmatprep.subr.bf16.mxu0 %v3357_v41  ;;  %v3363_v9 = vcombine.high %v3327_v57, %v3335_v13 }
  0xc6   : > { %2431 = vmatprep.subr.bf16.mxu1 %v3359_v52 }
  0xc7   : > { %3322 = vmatmul.mubr.msk.bf16.vlgmr.msra.gmra.mrb[44].mxu0 %vm625_vm2, %v3845_v35 }
  0xc8   : > { %3323 = vmatmul.mubr.msk.bf16.vlgmr.msra.gmra.mrb[44].mxu1 %vm625_vm2, %v3845_v35  ;;  %2389 = vmatpush1.bf16.msra.mxu0 %v3356_v7 }
  0xc9   : > { %2432 = vmatpush1.bf16.msra.mxu1 %v3358_v17  ;;  %2390 = vmatprep.subr.bf16.mxu0 %v4095_v32  ;;  %v3329_v32 = vld [vmem:[%s3817_s30 + $0x328] sm:$0xff] }
  0xca   : > { %2433 = vmatprep.subr.bf16.mxu1 %v4102_v46  ;;  %2420 = vmatprep.mubr.bf16.mxu0 %v3488_v2  ;;  %v3337_v46 = vld [vmem:[%s3817_s30 + $0x368] sm:$0xff] }
  0xcb   : > { %2463 = vmatprep.mubr.bf16.mxu1 %v3488_v2  ;;  %v3366_v29 = vcombine.low %v3329_v32, %v3337_v46 }
  0xcc   : > { %2391 = vmatpush1.bf16.msra.mxu0 %v4098_v48  ;;  %v3365_v48 = vcombine.high %v3328_v14, %v3336_v20 }
  0xcd   : > { %2434 = vmatpush1.bf16.msra.mxu1 %v4105_v58  ;;  %2474 = vmatprep.subr.bf16.mxu0 %v3361_v49  ;;  %v3367_v58 = vcombine.high %v3329_v32, %v3337_v46 }
  0xce   : > { %2517 = vmatprep.subr.bf16.mxu1 %v3363_v9 }
  0xcf   : > { %3388 = vmatmul.mubr.msk.bf16.vlgmr.msra.gmra.mrb[48].mxu0 %vm625_vm2, %v3845_v35 }
  0xd0   : > { %3389 = vmatmul.mubr.msk.bf16.vlgmr.msra.gmra.mrb[48].mxu1 %vm625_vm2, %v3845_v35  ;;  %2475 = vmatpush1.bf16.msra.mxu0 %v3360_v61 }
  0xd1   : > { %2518 = vmatpush1.bf16.msra.mxu1 %v3362_v53  ;;  %2476 = vmatprep.subr.bf16.mxu0 %v4132_v0  ;;  %v3331_v0 = vld [vmem:[%s3817_s30 + $0x338] sm:$0xff] }
  0xd2   : > { %2519 = vmatprep.subr.bf16.mxu1 %v4144_v15  ;;  %2506 = vmatprep.mubr.bf16.mxu0 %v3488_v2  ;;  %v3339_v15 = vld [vmem:[%s3817_s30 + $0x378] sm:$0xff] }
  0xd3   : > { %2549 = vmatprep.mubr.bf16.mxu1 %v3488_v2  ;;  %v3370_v16 = vcombine.low %v3331_v0, %v3339_v15 }
  0xd4   : > { %2477 = vmatpush1.bf16.msra.mxu0 %v4135_v10  ;;  %v3369_v10 = vcombine.high %v3330_v30, %v3338_v36 }
  0xd5   : > { %2520 = vmatpush1.bf16.msra.mxu1 %v4138_v12  ;;  %2560 = vmatprep.subr.bf16.mxu0 %v3365_v48  ;;  %v3371_v12 = vcombine.high %v3331_v0, %v3339_v15 }
  0xd6   : > { %2603 = vmatprep.subr.bf16.mxu1 %v3367_v58 }
  0xd7   : > { %3390 = vmatmul.mubr.msk.bf16.vlgmr.msra.gmra.mrb[52].mxu0 %vm625_vm2, %v3845_v35 }
  0xd8   : > { %3391 = vmatmul.mubr.msk.bf16.vlgmr.msra.gmra.mrb[52].mxu1 %vm625_vm2, %v3845_v35  ;;  %2561 = vmatpush1.bf16.msra.mxu0 %v3364_v28 }
  0xd9   : > { %2604 = vmatpush1.bf16.msra.mxu1 %v3366_v29  ;;  %2562 = vmatprep.subr.bf16.mxu0 %v4163_v38 }
  0xda   : > { %2605 = vmatprep.subr.bf16.mxu1 %v4175_v23  ;;  %2592 = vmatprep.mubr.bf16.mxu0 %v3488_v2 }
  0xdb   : > { %2635 = vmatprep.mubr.bf16.mxu1 %v3488_v2 }
  0xdc   : > { %2563 = vmatpush1.bf16.msra.mxu0 %v4166_v47 }
  0xdd   : > { %2606 = vmatpush1.bf16.msra.mxu1 %v4178_v34  ;;  %2646 = vmatprep.subr.bf16.mxu0 %v3369_v10 }
  0xde   : > { %2689 = vmatprep.subr.bf16.mxu1 %v3371_v12 }
  0xdf   : > { %3392 = vmatmul.mubr.msk.bf16.vlgmr.msra.gmra.mrb[56].mxu0 %vm625_vm2, %v3845_v35 }
  0xe0   : > { %3393 = vmatmul.mubr.msk.bf16.vlgmr.msra.gmra.mrb[56].mxu1 %vm625_vm2, %v3845_v35  ;;  %2647 = vmatpush1.bf16.msra.mxu0 %v3368_v45 }
  0xe1   : > { %2690 = vmatpush1.bf16.msra.mxu1 %v3370_v16  ;;  %2648 = vmatprep.subr.bf16.mxu0 %v4189_v3 }
  0xe2   : > { %2691 = vmatprep.subr.bf16.mxu1 %v4202_v62  ;;  %2678 = vmatprep.mubr.bf16.mxu0 %v3488_v2 }
  0xe3   : > { %2721 = vmatprep.mubr.bf16.mxu1 %v3488_v2 }
  0xe4   : > { %2649 = vmatpush1.bf16.msra.mxu0 %v4192_v56 }
  0xe5   : > { %2692 = vmatpush1.bf16.msra.mxu1 %v4195_v37 }
  0xe7   : > { %3394 = vmatmul.mubr.msk.bf16.vlgmr.msra.gmra.mrb[60].mxu0 %vm625_vm2, %v3845_v35 }
  0xe8   : > { %3395 = vmatmul.mubr.msk.bf16.vlgmr.msra.gmra.mrb[60].mxu1 %vm625_vm2, %v3845_v35 }
 0x142   : > { %v4331_v38 = vpop.f32.mrb[0].mxu0 }
 0x143   : > { %v4333_v47 = vpop.f32.mrb[0].mxu1  ;;  %v4335_v23 = vpop.f32.mrb[1].mxu0 }
 0x144   : > { %v4337_v34 = vpop.f32.mrb[1].mxu1  ;;  %v4339_v3 = vpop.f32.mrb[2].mxu0 }
 0x145   : > { %v4341_v2 = vpop.f32.mrb[2].mxu1  ;;  %v4343_v56 = vpop.f32.mrb[3].mxu0 }
 0x146   : > { %v4345_v37 = vpop.f32.mrb[3].mxu1 }
 0x14a   : > { %v4347_v62 = vpop.f32.mrb[4].mxu0 }
 0x14b   : > { %v4349_v33 = vpop.f32.mrb[4].mxu1  ;;  %v4351_v35 = vpop.f32.mrb[5].mxu0 }
 0x14c   : > { %v4353_v39 = vpop.f32.mrb[5].mxu1  ;;  %v4355_v21 = vpop.f32.mrb[6].mxu0 }
 0x14d   : > { %v4357_v11 = vpop.f32.mrb[6].mxu1  ;;  %v4359_v54 = vpop.f32.mrb[7].mxu0 }
 0x14e   : > { %v4361_v22 = vpop.f32.mrb[7].mxu1 }
 0x152   : > { %v4363_v55 = vpop.f32.mrb[8].mxu0 }
 0x153   : > { %4818 = vst [vmem:[#allocation4_spill] sm:$0xff] %v4363_v55  ;;  %v4365_v63 = vpop.f32.mrb[8].mxu1  ;;  %v4367_v1 = vpop.f32.mrb[9].mxu0 }
 0x154   : > { %4819 = vst [vmem:[#allocation5_spill] sm:$0xff] %v4365_v63  ;;  %4820 = vst [vmem:[#allocation6_spill] sm:$0xff] %v4367_v1  ;;  %v4369_v6 = vpop.f32.mrb[9].mxu1  ;;  %v4371_v4 = vpop.f32.mrb[10].mxu0 }
 0x155   : > { %4821 = vst [vmem:[#allocation7_spill] sm:$0xff] %v4369_v6  ;;  %4822 = vst [vmem:[#allocation8_spill] sm:$0xff] %v4371_v4  ;;  %v4373_v5 = vpop.f32.mrb[10].mxu1  ;;  %v4375_v43 = vpop.f32.mrb[11].mxu0 }
 0x156   : > { %4823 = vst [vmem:[#allocation9_spill] sm:$0xff] %v4373_v5  ;;  %4824 = vst [vmem:[#allocation10_spill] sm:$0xff] %v4375_v43  ;;  %v4377_v44 = vpop.f32.mrb[11].mxu1 }
 0x157   : > { %4825 = vst [vmem:[#allocation11_spill] sm:$0xff] %v4377_v44 }
 0x15a   : > { %v4379_v8 = vpop.f32.mrb[12].mxu0 }
 0x15b   : > { %4826 = vst [vmem:[#allocation12_spill] sm:$0xff] %v4379_v8  ;;  %v4381_v59 = vpop.f32.mrb[12].mxu1  ;;  %v4383_v24 = vpop.f32.mrb[13].mxu0 }
 0x15c   : > { %4827 = vst [vmem:[#allocation13_spill] sm:$0xff] %v4381_v59  ;;  %4828 = vst [vmem:[#allocation14_spill] sm:$0xff] %v4383_v24  ;;  %v4385_v26 = vpop.f32.mrb[13].mxu1  ;;  %v4387_v25 = vpop.f32.mrb[14].mxu0 }
 0x15d   : > { %4829 = vst [vmem:[#allocation15_spill] sm:$0xff] %v4385_v26  ;;  %4830 = vst [vmem:[#allocation16_spill] sm:$0xff] %v4387_v25  ;;  %v4389_v27 = vpop.f32.mrb[14].mxu1  ;;  %v4391_v31 = vpop.f32.mrb[15].mxu0 }
 0x15e   : > { %4831 = vst [vmem:[#allocation17_spill] sm:$0xff] %v4389_v27  ;;  %4832 = vst [vmem:[#allocation18_spill] sm:$0xff] %v4391_v31  ;;  %v4393_v40 = vpop.f32.mrb[15].mxu1 }
 0x15f   : > { %4833 = vst [vmem:[#allocation19_spill] sm:$0xff] %v4393_v40 }
 0x162   : > { %v4395_v60 = vpop.f32.mrb[16].mxu0 }
 0x163   : > { %v4399_v50 = vpop.f32.mrb[16].mxu1  ;;  %v4401_v51 = vpop.f32.mrb[17].mxu0 }
 0x164   : > { %v4407_v7 = vpop.f32.mrb[17].mxu1  ;;  %v4409_v17 = vpop.f32.mrb[18].mxu0 }
 0x165   : > { %v4415_v57 = vpop.f32.mrb[18].mxu1  ;;  %v4417_v13 = vpop.f32.mrb[19].mxu0 }
 0x166   : > { %v4423_v61 = vpop.f32.mrb[19].mxu1 }
 0x16a   : > { %v4427_v14 = vpop.f32.mrb[20].mxu0 }
 0x16b   : > { %v4431_v32 = vpop.f32.mrb[20].mxu1  ;;  %v4433_v46 = vpop.f32.mrb[21].mxu0 }
 0x16c   : > { %v4439_v28 = vpop.f32.mrb[21].mxu1  ;;  %v4441_v29 = vpop.f32.mrb[22].mxu0 }
 0x16d   : > { %v4447_v0 = vpop.f32.mrb[22].mxu1  ;;  %v4449_v15 = vpop.f32.mrb[23].mxu0 }
 0x16e   : > { %v4455_v45 = vpop.f32.mrb[23].mxu1 }
 0x16f   : > { %4834 = vst [vmem:[#allocation20_spill] sm:$0xff] %v4455_v45 }
 0x172   : > { %v4459_v58 = vpop.f32.mrb[24].mxu0 }
 0x173   : > { %4835 = vst [vmem:[#allocation21_spill] sm:$0xff] %v4459_v58  ;;  %v4463_v30 = vpop.f32.mrb[24].mxu1  ;;  %v4465_v48 = vpop.f32.mrb[25].mxu0 }
 0x174   : > { %4836 = vst [vmem:[#allocation22_spill] sm:$0xff] %v4463_v30  ;;  %4837 = vst [vmem:[#allocation23_spill] sm:$0xff] %v4465_v48  ;;  %v4471_v20 = vpop.f32.mrb[25].mxu1  ;;  %v4473_v53 = vpop.f32.mrb[26].mxu0 }
 0x175   : > { %4838 = vst [vmem:[#allocation24_spill] sm:$0xff] %v4471_v20  ;;  %4839 = vst [vmem:[#allocation25_spill] sm:$0xff] %v4473_v53  ;;  %v4479_v9 = vpop.f32.mrb[26].mxu1  ;;  %v4481_v49 = vpop.f32.mrb[27].mxu0 }
 0x176   : > { %4840 = vst [vmem:[#allocation26_spill] sm:$0xff] %v4479_v9  ;;  %4841 = vst [vmem:[#allocation27_spill] sm:$0xff] %v4481_v49  ;;  %v4487_v19 = vpop.f32.mrb[27].mxu1 }
 0x177   : > { %4842 = vst [vmem:[#allocation28_spill] sm:$0xff] %v4487_v19 }
 0x17a   : > { %v4491_v52 = vpop.f32.mrb[28].mxu0 }
 0x17b   : > { %4843 = vst [vmem:[#allocation29_spill] sm:$0xff] %v4491_v52  ;;  %v4495_v16 = vpop.f32.mrb[28].mxu1  ;;  %v4497_v41 = vpop.f32.mrb[29].mxu0 }
 0x17c   : > { %4844 = vst [vmem:[#allocation30_spill] sm:$0xff] %v4495_v16  ;;  %4845 = vst [vmem:[#allocation31_spill] sm:$0xff] %v4497_v41  ;;  %v4503_v42 = vpop.f32.mrb[29].mxu1  ;;  %v4505_v49 = vpop.f32.mrb[30].mxu0 }
 0x17d   : > { %4846 = vst [vmem:[#allocation32_spill] sm:$0xff] %v4503_v42  ;;  %4847 = vst [vmem:[#allocation33_spill] sm:$0xff] %v4505_v49  ;;  %v4511_v52 = vpop.f32.mrb[30].mxu1  ;;  %v4513_v8 = vpop.f32.mrb[31].mxu0 }
 0x17e   : > { %4848 = vst [vmem:[#allocation34_spill] sm:$0xff] %v4511_v52  ;;  %4849 = vst [vmem:[#allocation35_spill] sm:$0xff] %v4513_v8  ;;  %v4519_v41 = vpop.f32.mrb[31].mxu1 }
 0x17f   : > { %4850 = vst [vmem:[#allocation36_spill] sm:$0xff] %v4519_v41 }
 0x182   : > { %v1853_v16 = vpop.f32.mrb[32].mxu0 }
 0x183   : > { %v1896_v18 = vpop.f32.mrb[32].mxu1  ;;  %v1855_v42 = vpop.f32.mrb[33].mxu0 }
 0x184   : > { %v1898_v26 = vpop.f32.mrb[33].mxu1  ;;  %v1857_v36 = vpop.f32.mrb[34].mxu0 }
 0x185   : > { %v1900_v49 = vpop.f32.mrb[34].mxu1  ;;  %v1859_v25 = vpop.f32.mrb[35].mxu0 }
 0x186   : > { %v1902_v59 = vpop.f32.mrb[35].mxu1 }
 0x18a   : > { %v4523_v19 = vpop.f32.mrb[36].mxu0 }
 0x18b   : > { %v4525_v44 = vpop.f32.mrb[36].mxu1  ;;  %v4527_v10 = vpop.f32.mrb[37].mxu0 }
 0x18c   : > { %v4529_v12 = vpop.f32.mrb[37].mxu1  ;;  %v4531_v8 = vpop.f32.mrb[38].mxu0 }
 0x18d   : > { %v4533_v31 = vpop.f32.mrb[38].mxu1  ;;  %v4535_v24 = vpop.f32.mrb[39].mxu0 }
 0x18e   : > { %v4537_v41 = vpop.f32.mrb[39].mxu1 }
 0x192   : > { %v4539_v40 = vpop.f32.mrb[40].mxu0 }
 0x193   : > { %4851 = vst [vmem:[#allocation37_spill] sm:$0xff] %v4539_v40  ;;  %v4541_v52 = vpop.f32.mrb[40].mxu1  ;;  %v4543_v27 = vpop.f32.mrb[41].mxu0 }
 0x194   : > { %4852 = vst [vmem:[#allocation38_spill] sm:$0xff] %v4541_v52  ;;  %4853 = vst [vmem:[#allocation39_spill] sm:$0xff] %v4543_v27  ;;  %v4545_v43 = vpop.f32.mrb[41].mxu1  ;;  %v4547_v9 = vpop.f32.mrb[42].mxu0 }
 0x195   : > { %4854 = vst [vmem:[#allocation40_spill] sm:$0xff] %v4545_v43  ;;  %4855 = vst [vmem:[#allocation41_spill] sm:$0xff] %v4547_v9  ;;  %v4549_v5 = vpop.f32.mrb[42].mxu1  ;;  %v4551_v53 = vpop.f32.mrb[43].mxu0 }
 0x196   : > { %4856 = vst [vmem:[#allocation42_spill] sm:$0xff] %v4549_v5  ;;  %4857 = vst [vmem:[#allocation43_spill] sm:$0xff] %v4551_v53  ;;  %v4553_v4 = vpop.f32.mrb[43].mxu1  ;;  %v4571_v5 = vpop.permute.xlu0 %2832 }
 0x197   : > { %4858 = vst [vmem:[#allocation44_spill] sm:$0xff] %v4553_v4 }
 0x19a   : > { %v4555_v20 = vpop.f32.mrb[44].mxu0 }
 0x19b   : > { %4859 = vst [vmem:[#allocation45_spill] sm:$0xff] %v4555_v20  ;;  %v4557_v6 = vpop.f32.mrb[44].mxu1  ;;  %v4559_v48 = vpop.f32.mrb[45].mxu0 }
 0x19c   : > { %4860 = vst [vmem:[#allocation46_spill] sm:$0xff] %v4557_v6  ;;  %4861 = vst [vmem:[#allocation47_spill] sm:$0xff] %v4559_v48  ;;  %v4561_v1 = vpop.f32.mrb[45].mxu1  ;;  %v4563_v30 = vpop.f32.mrb[46].mxu0 }
 0x19d   : > { %4862 = vst [vmem:[#allocation48_spill] sm:$0xff] %v4561_v1  ;;  %4863 = vst [vmem:[#allocation49_spill] sm:$0xff] %v4563_v30  ;;  %v4565_v27 = vpop.f32.mrb[46].mxu1  ;;  %v4567_v43 = vpop.f32.mrb[47].mxu0  ;;  %v4867_v1 = vmax.f32 %v4331_v38, %v4395_v60  ;;  %v4870_v38 = vmax.f32 %v4337_v34, %v4407_v7 }
 0x19e   : > { %4864 = vst [vmem:[#allocation50_spill] sm:$0xff] %v4565_v27  ;;  %4865 = vst [vmem:[#allocation51_spill] sm:$0xff] %v4567_v43  ;;  %v4569_v9 = vpop.f32.mrb[47].mxu1 }
 0x19f   : > { %4866 = vst [vmem:[#allocation52_spill] sm:$0xff] %v4569_v9  ;;  %v4868_v9 = vmax.f32 %v4333_v47, %v4399_v50 }
 0x1a2   : > { %v2422_v53 = vpop.f32.mrb[48].mxu0 }
 0x1a3   : > { %v2764_v4 = vmax.f32 %v1853_v16, %v2422_v53  ;;  %v2465_v63 = vpop.f32.mrb[48].mxu1  ;;  %v2424_v20 = vpop.f32.mrb[49].mxu0  ;;  %v4869_v53 = vmax.f32 %v4335_v23, %v4401_v51 }
 0x1a4   : > { %v2766_v58 = vmax.f32 %v1896_v18, %v2465_v63  ;;  %v2765_v6 = vmax.f32 %v1855_v42, %v2424_v20  ;;  %v2467_v55 = vpop.f32.mrb[49].mxu1  ;;  %v2426_v48 = vpop.f32.mrb[50].mxu0 }
 0x1a5   : > { %v2796_v30 = vmax.f32 %v4867_v1, %v2764_v4  ;;  %v2767_v52 = vmax.f32 %v1898_v26, %v2467_v55  ;;  %v2780_v27 = vmax.f32 %v1857_v36, %v2426_v48  ;;  %v2469_v40 = vpop.f32.mrb[50].mxu1  ;;  %v2428_v43 = vpop.f32.mrb[51].mxu0  ;;  %v4871_v4 = vmax.f32 %v4339_v3, %v4409_v17 }
 0x1a6   : > { %v2798_v45 = vmax.f32 %v4868_v9, %v2766_v58  ;;  %v2797_v63 = vmax.f32 %v4869_v53, %v2765_v6  ;;  %v2782_v42 = vmax.f32 %v1900_v49, %v2469_v40  ;;  %v2781_v18 = vmax.f32 %v1859_v25, %v2428_v43  ;;  %v2471_v20 = vpop.f32.mrb[51].mxu1  ;;  %v4582_v16 = vpop.permute.xlu0 %2837 }
 0x1a7   : > { %v2799_v55 = vmax.f32 %v4870_v38, %v2767_v52  ;;  %v2840_v1 = vadd.f32 %v4571_v5, %v2796_v30  ;;  %v2812_v47 = vmax.f32 %v4871_v4, %v2780_v27  ;;  %v2783_v26 = vmax.f32 %v1902_v59, %v2471_v20 }
 0x1a8   : > { %v2841_v60 = vadd.f32 %v4571_v5, %v2797_v63  ;;  %v2842_v23 = vadd.f32 %v4571_v5, %v2798_v45  ;;  %v4872_v6 = vmax.f32 %v4341_v2, %v4415_v57  ;;  %v4873_v25 = vmax.f32 %v4343_v56, %v4417_v13 }
 0x1a9   : > { %v2843_v40 = vadd.f32 %v4571_v5, %v2799_v55  ;;  %v2872_v50 = vmax.f32 %v2840_v1, 0.0  ;;  %v4874_v3 = vmax.f32 %v4345_v37, %v4423_v61  ;;  %v2856_v27 = vadd.f32 %v4582_v16, %v2812_v47 }
 0x1aa   : > { %v2814_v43 = vmax.f32 %v4872_v6, %v2782_v42  ;;  %v2813_v34 = vmax.f32 %v4873_v25, %v2781_v18  ;;  %v2873_v51 = vmax.f32 %v2841_v60, 0.0  ;;  %v2874_v52 = vmax.f32 %v2842_v23, 0.0  ;;  %v2508_v17 = vpop.f32.mrb[52].mxu0 }
 0x1ab   : > { %v2815_v59 = vmax.f32 %v4874_v3, %v2783_v26  ;;  %v2875_v56 = vmax.f32 %v2843_v40, 0.0  ;;  %v2888_v13 = vmax.f32 %v2856_v27, 0.0  ;;  %v2768_v49 = vmax.f32 %v4523_v19, %v2508_v17  ;;  %v2551_v9 = vpop.f32.mrb[52].mxu1  ;;  %v2510_v48 = vpop.f32.mrb[53].mxu0 }
 0x1ac   : > { %v2857_v2 = vadd.f32 %v4582_v16, %v2813_v34  ;;  %v2858_v7 = vadd.f32 %v4582_v16, %v2814_v43  ;;  %v3418_v58 = vpack.c.bf16 %v2873_v51, %v2872_v50  ;;  %v2770_v30 = vmax.f32 %v4525_v44, %v2551_v9  ;;  %v2553_v36 = vpop.f32.mrb[53].mxu1  ;;  %v2512_v45 = vpop.f32.mrb[54].mxu0 }
 0x1ad   : > { %v2859_v57 = vadd.f32 %v4582_v16, %v2815_v59  ;;  %v3419_v53 = vpack.c.bf16 %v2875_v56, %v2874_v52  ;;  %v4875_v42 = vmax.f32 %v4347_v62, %v4427_v14  ;;  %v2769_v20 = vmax.f32 %v4527_v10, %v2510_v48  ;;  %v2555_v38 = vpop.f32.mrb[54].mxu1  ;;  %v2514_v55 = vpop.f32.mrb[55].mxu0  ;;  %v4882_v59 = vld [vmem:[#allocation20_spill] sm:$0xff]  ;;  %v4885_v56 = vld [vmem:[#allocation38_spill] sm:$0xff]  ;;  %v4887_v48 = vld [vmem:[#allocation21_spill] sm:$0xff] }
 0x1ae   : > { %v2889_v37 = vmax.f32 %v2857_v2, 0.0  ;;  %v2890_v61 = vmax.f32 %v2858_v7, 0.0  ;;  %3000 = vst [vmem:[%s4615_s11] sm:$0xff] %v3418_v58  ;;  %v4876_v44 = vmax.f32 %v4349_v33, %v4431_v32  ;;  %v2771_v4 = vmax.f32 %v4529_v12, %v2553_v36  ;;  %v2557_v14 = vpop.f32.mrb[55].mxu1 }
 0x1af   : > { %v2891_v63 = vmax.f32 %v2859_v57, 0.0  ;;  %v2800_v18 = vmax.f32 %v4875_v42, %v2768_v49  ;;  %v2784_v62 = vmax.f32 %v4531_v8, %v2512_v45  ;;  %3001 = vst [vmem:[%s4615_s11 + $0x8] sm:$0xff] %v3419_v53  ;;  %v4877_v26 = vmax.f32 %v4351_v35, %v4433_v46  ;;  %v4889_v53 = vld [vmem:[#allocation5_spill] sm:$0xff] }
 0x1b0   : > { %v3426_v19 = vpack.c.bf16 %v2889_v37, %v2888_v13  ;;  %v2802_v1 = vmax.f32 %v4876_v44, %v2770_v30  ;;  %v2786_v23 = vmax.f32 %v4533_v31, %v2555_v38  ;;  %v4878_v33 = vmax.f32 %v4353_v39, %v4439_v28 }
 0x1b1   : > { %v3427_v10 = vpack.c.bf16 %v2891_v63, %v2890_v61  ;;  %v2844_v47 = vadd.f32 %v4571_v5, %v2800_v18  ;;  %v2801_v60 = vmax.f32 %v4877_v26, %v2769_v20  ;;  %v4879_v8 = vmax.f32 %v4355_v21, %v4441_v29  ;;  %v4890_v63 = vld [vmem:[#allocation22_spill] sm:$0xff]  ;;  %v4892_v20 = vld [vmem:[#allocation39_spill] sm:$0xff] }
 0x1b2   : > { %3008 = vst [vmem:[%s4615_s11 + $0x40] sm:$0xff] %v3426_v19  ;;  %v2846_v6 = vadd.f32 %v4571_v5, %v2802_v1  ;;  %v2803_v32 = vmax.f32 %v4878_v33, %v2771_v4  ;;  %v2785_v43 = vmax.f32 %v4535_v24, %v2514_v55  ;;  %v4880_v31 = vmax.f32 %v4357_v11, %v4447_v0  ;;  %v2594_v24 = vpop.f32.mrb[56].mxu0  ;;  %v4884_v0 = vld [vmem:[#allocation37_spill] sm:$0xff]  ;;  %v4893_v1 = vld [vmem:[#allocation40_spill] sm:$0xff]  ;;  %v4895_v26 = vld [vmem:[#allocation6_spill] sm:$0xff] }
 0x1b3   : > { %v2816_v12 = vmax.f32 %v4879_v8, %v2784_v62  ;;  %3009 = vst [vmem:[%s4615_s11 + $0x48] sm:$0xff] %v3427_v10  ;;  %v2876_v25 = vmax.f32 %v2844_v47, 0.0  ;;  %v2845_v35 = vadd.f32 %v4571_v5, %v2801_v60  ;;  %v2787_v34 = vmax.f32 %v4537_v41, %v2557_v14  ;;  %v2637_v41 = vpop.f32.mrb[56].mxu1  ;;  %v2596_v52 = vpop.f32.mrb[57].mxu0  ;;  %v4894_v62 = vld [vmem:[#allocation41_spill] sm:$0xff]  ;;  %v4896_v60 = vld [vmem:[#allocation23_spill] sm:$0xff] }
 0x1b4   : > { %v2818_v46 = vmax.f32 %v4880_v31, %v2786_v23  ;;  %v2878_v40 = vmax.f32 %v2846_v6, 0.0  ;;  %v2847_v39 = vadd.f32 %v4571_v5, %v2803_v32  ;;  %v4881_v21 = vmax.f32 %v4359_v54, %v4449_v15  ;;  %v2639_v15 = vpop.f32.mrb[57].mxu1  ;;  %v2598_v57 = vpop.f32.mrb[58].mxu0  ;;  %v4898_v33 = vld [vmem:[#allocation42_spill] sm:$0xff] }
 0x1b5   : > { %v2860_v28 = vadd.f32 %v4582_v16, %v2816_v12  ;;  %v2877_v50 = vmax.f32 %v2845_v35, 0.0  ;;  %v4883_v27 = vmax.f32 %v4361_v22, %v4882_v59  ;;  %v2772_v51 = vmax.f32 %v4884_v0, %v2594_v24  ;;  %v4886_v22 = vld [vmem:[#allocation4_spill] sm:$0xff]  ;;  %v2641_v61 = vpop.f32.mrb[58].mxu1  ;;  %v2600_v30 = vpop.f32.mrb[59].mxu0  ;;  %v4906_v24 = vld [vmem:[#allocation26_spill] sm:$0xff]  ;;  %v4908_v59 = vld [vmem:[#allocation43_spill] sm:$0xff] }
 0x1b6   : > { %v2817_v29 = vmax.f32 %v4881_v21, %v2785_v43  ;;  %v2862_v3 = vadd.f32 %v4582_v16, %v2818_v46  ;;  %v2879_v2 = vmax.f32 %v2847_v39, 0.0  ;;  %v2774_v54 = vmax.f32 %v4885_v56, %v2637_v41  ;;  %v2643_v55 = vpop.f32.mrb[59].mxu1  ;;  %v4899_v43 = vld [vmem:[#allocation7_spill] sm:$0xff]  ;;  %v4902_v46 = vld [vmem:[#allocation8_spill] sm:$0xff] }
 0x1b7   : > { %v2819_v11 = vmax.f32 %v4883_v27, %v2787_v34  ;;  %v2892_v7 = vmax.f32 %v2860_v28, 0.0  ;;  %v3420_v13 = vpack.c.bf16 %v2877_v50, %v2876_v25  ;;  %v4888_v58 = vmax.f32 %v4886_v22, %v4887_v48  ;;  %v4900_v25 = vld [vmem:[#allocation24_spill] sm:$0xff]  ;;  %v4903_v34 = vld [vmem:[#allocation25_spill] sm:$0xff]  ;;  %v4914_v22 = vld [vmem:[#allocation46_spill] sm:$0xff] }
 0x1b8   : > { %v2861_v17 = vadd.f32 %v4582_v16, %v2817_v29  ;;  %v2894_v49 = vmax.f32 %v2862_v3, 0.0  ;;  %v3421_v36 = vpack.c.bf16 %v2879_v2, %v2878_v40  ;;  %v4891_v42 = vmax.f32 %v4889_v53, %v4890_v63  ;;  %v4905_v29 = vld [vmem:[#allocation9_spill] sm:$0xff]  ;;  %v4909_v41 = vld [vmem:[#allocation44_spill] sm:$0xff] }
 0x1b9   : > { %v2863_v9 = vadd.f32 %v4582_v16, %v2819_v11  ;;  %v2804_v37 = vmax.f32 %v4888_v58, %v2772_v51  ;;  %v2773_v38 = vmax.f32 %v4892_v20, %v2596_v52  ;;  %3002 = vst [vmem:[%s4615_s11 + $0x10] sm:$0xff] %v3420_v13  ;;  %v2775_v4 = vmax.f32 %v4893_v1, %v2639_v15  ;;  %v4910_v2 = vld [vmem:[#allocation45_spill] sm:$0xff]  ;;  %v4912_v13 = vld [vmem:[#allocation27_spill] sm:$0xff] }
 0x1ba   : > { %v2893_v45 = vmax.f32 %v2861_v17, 0.0  ;;  %v2806_v18 = vmax.f32 %v4891_v42, %v2774_v54  ;;  %v2788_v14 = vmax.f32 %v4894_v62, %v2598_v57  ;;  %3003 = vst [vmem:[%s4615_s11 + $0x18] sm:$0xff] %v3421_v36  ;;  %v4897_v23 = vmax.f32 %v4895_v26, %v4896_v60  ;;  %v2680_v11 = vpop.f32.mrb[60].mxu0  ;;  %v4911_v57 = vld [vmem:[#allocation10_spill] sm:$0xff]  ;;  %v4915_v36 = vld [vmem:[#allocation11_spill] sm:$0xff]  ;;  %v4918_v42 = vld [vmem:[#allocation12_spill] sm:$0xff] }
 0x1bb   : > { %v2895_v19 = vmax.f32 %v2863_v9, 0.0  ;;  %v2848_v44 = vadd.f32 %v4571_v5, %v2804_v37  ;;  %v2790_v32 = vmax.f32 %v4898_v33, %v2641_v61  ;;  %v4901_v35 = vmax.f32 %v4899_v43, %v4900_v25  ;;  %v2723_v17 = vpop.f32.mrb[60].mxu1  ;;  %v2682_v56 = vpop.f32.mrb[61].mxu0  ;;  %v4921_v62 = vld [vmem:[#allocation13_spill] sm:$0xff]  ;;  %v4924_v33 = vld [vmem:[#allocation47_spill] sm:$0xff]  ;;  %v4925_v43 = vld [vmem:[#allocation48_spill] sm:$0xff] }
 0x1bc   : > { %v3428_v10 = vpack.c.bf16 %v2893_v45, %v2892_v7  ;;  %v2850_v47 = vadd.f32 %v4571_v5, %v2806_v18  ;;  %v2805_v6 = vmax.f32 %v4897_v23, %v2773_v38  ;;  %v4904_v40 = vmax.f32 %v4902_v46, %v4903_v34  ;;  %v2725_v58 = vpop.f32.mrb[61].mxu1  ;;  %v2684_v37 = vpop.f32.mrb[62].mxu0  ;;  %v4916_v45 = vld [vmem:[#allocation28_spill] sm:$0xff]  ;;  %v4919_v18 = vld [vmem:[#allocation29_spill] sm:$0xff]  ;;  %v4927_v34 = vld [vmem:[#allocation14_spill] sm:$0xff] }
 0x1bd   : > { %v3429_v8 = vpack.c.bf16 %v2895_v19, %v2894_v49  ;;  %v2880_v12 = vmax.f32 %v2848_v44, 0.0  ;;  %v2807_v31 = vmax.f32 %v4901_v35, %v2775_v4  ;;  %v4907_v50 = vmax.f32 %v4905_v29, %v4906_v24  ;;  %v2686_v19 = vpop.f32.mrb[63].mxu0  ;;  %v4926_v35 = vld [vmem:[#allocation49_spill] sm:$0xff] }
 0x1be   : > { %v2820_v39 = vmax.f32 %v4904_v40, %v2788_v14  ;;  %3010 = vst [vmem:[%s4615_s11 + $0x50] sm:$0xff] %v3428_v10  ;;  %v2882_v28 = vmax.f32 %v2850_v47, 0.0  ;;  %v2849_v21 = vadd.f32 %v4571_v5, %v2805_v6  ;;  %v2789_v27 = vmax.f32 %v4908_v59, %v2600_v30  ;;  %v4922_v14 = vld [vmem:[#allocation30_spill] sm:$0xff]  ;;  %v4928_v40 = vld [vmem:[#allocation31_spill] sm:$0xff]  ;;  %v4932_v59 = vld [vmem:[#allocation32_spill] sm:$0xff] }
 0x1bf   : > { %v2822_v3 = vmax.f32 %v4907_v50, %v2790_v32  ;;  %3011 = vst [vmem:[%s4615_s11 + $0x58] sm:$0xff] %v3429_v8  ;;  %v2851_v0 = vadd.f32 %v4571_v5, %v2807_v31  ;;  %v2791_v52 = vmax.f32 %v4909_v41, %v2643_v55  ;;  %v2776_v7 = vmax.f32 %v4910_v2, %v2680_v11  ;;  %v2727_v55 = vpop.f32.mrb[62].mxu1 }
 0x1c0   : > { %v2864_v51 = vadd.f32 %v4582_v16, %v2820_v39  ;;  %v2881_v54 = vmax.f32 %v2849_v21, 0.0  ;;  %v4913_v49 = vmax.f32 %v4911_v57, %v4912_v13  ;;  %v2778_v48 = vmax.f32 %v4914_v22, %v2723_v17  ;;  %v2729_v26 = vpop.f32.mrb[63].mxu1  ;;  %v4930_v21 = vld [vmem:[#allocation50_spill] sm:$0xff]  ;;  %v4937_v17 = vld [vmem:[#allocation17_spill] sm:$0xff]  ;;  %v4940_v57 = vld [vmem:[#allocation51_spill] sm:$0xff] }
 0x1c1   : > { %v2866_v15 = vadd.f32 %v4582_v16, %v2822_v3  ;;  %v2883_v61 = vmax.f32 %v2851_v0, 0.0  ;;  %v4917_v53 = vmax.f32 %v4915_v36, %v4916_v45  ;;  %v4920_v20 = vmax.f32 %v4918_v42, %v4919_v18  ;;  %v4931_v3 = vld [vmem:[#allocation15_spill] sm:$0xff]  ;;  %v4934_v0 = vld [vmem:[#allocation16_spill] sm:$0xff] }
 0x1c2   : > { %v2821_v9 = vmax.f32 %v4913_v49, %v2789_v27  ;;  %v2896_v30 = vmax.f32 %v2864_v51, 0.0  ;;  %v3422_v44 = vpack.c.bf16 %v2881_v54, %v2880_v12  ;;  %v4923_v10 = vmax.f32 %v4921_v62, %v4922_v14  ;;  %v4935_v51 = vld [vmem:[#allocation33_spill] sm:$0xff]  ;;  %v4943_v36 = vld [vmem:[#allocation35_spill] sm:$0xff]  ;;  %v4946_v18 = vld [vmem:[#allocation36_spill] sm:$0xff] }
 0x1c3   : > { %v2823_v63 = vmax.f32 %v4917_v53, %v2791_v52  ;;  %v2808_v38 = vmax.f32 %v4920_v20, %v2776_v7  ;;  %v2898_v1 = vmax.f32 %v2866_v15, 0.0  ;;  %v3423_v60 = vpack.c.bf16 %v2883_v61, %v2882_v28  ;;  %v4945_v42 = vld [vmem:[#allocation19_spill] sm:$0xff] }
 0x1c4   : > { %v2865_v4 = vadd.f32 %v4582_v16, %v2821_v9  ;;  %v2810_v47 = vmax.f32 %v4923_v10, %v2778_v48  ;;  %v2777_v32 = vmax.f32 %v4924_v33, %v2682_v56  ;;  %3004 = vst [vmem:[%s4615_s11 + $0x20] sm:$0xff] %v3422_v44  ;;  %v2779_v25 = vmax.f32 %v4925_v43, %v2725_v58  ;;  %v4938_v56 = vld [vmem:[#allocation34_spill] sm:$0xff]  ;;  %v4941_v48 = vld [vmem:[#allocation52_spill] sm:$0xff]  ;;  %v3056_v43 = vld [vmem:[%s4615_s11 + $0x48] sm:$0xff] (%p3539_p5) }
 0x1c5   : > { %v2867_v23 = vadd.f32 %v4582_v16, %v2823_v63  ;;  %v2852_v6 = vadd.f32 %v4571_v5, %v2808_v38  ;;  %v2792_v31 = vmax.f32 %v4926_v35, %v2684_v37  ;;  %3005 = vst [vmem:[%s4615_s11 + $0x28] sm:$0xff] %v3423_v60  ;;  %v4929_v39 = vmax.f32 %v4927_v34, %v4928_v40  ;;  %v3042_v60 = vld [vmem:[%s4615_s11 + $0x10] sm:$0xff] (%p3539_p5) }
 0x1c6   : > { %v2897_v8 = vmax.f32 %v2865_v4, 0.0  ;;  %v2854_v12 = vadd.f32 %v4571_v5, %v2810_v47  ;;  %v2794_v29 = vmax.f32 %v4930_v21, %v2727_v55  ;;  %v4933_v27 = vmax.f32 %v4931_v3, %v4932_v59  ;;  %3043 = vst [vmem:[%s3025_s20 + $0x10] sm:$0xff] (%p3539_p5), %v3042_v60  ;;  %v3060_v35 = vld [vmem:[%s4615_s11 + $0x58] sm:$0xff] (%p3539_p5)  ;;  %3057 = vst [vmem:[%s3025_s20 + $0x88] sm:$0xff] (%p3539_p5), %v3056_v43 }
 0x1c7   : > { %v2899_v46 = vmax.f32 %v2867_v23, 0.0  ;;  %v2809_v28 = vmax.f32 %v4929_v39, %v2777_v32  ;;  %v2884_v50 = vmax.f32 %v2852_v6, 0.0  ;;  %v4936_v41 = vmax.f32 %v4934_v0, %v4935_v51  ;;  %v3044_v23 = vld [vmem:[%s4615_s11 + $0x18] sm:$0xff] (%p3539_p5)  ;;  %3061 = vst [vmem:[%s3025_s20 + $0x98] sm:$0xff] (%p3539_p5), %v3060_v35 }
 0x1c8   : > { %v3430_v24 = vpack.c.bf16 %v2897_v8, %v2896_v30  ;;  %v2811_v11 = vmax.f32 %v4933_v27, %v2779_v25  ;;  %v4939_v54 = vmax.f32 %v4937_v17, %v4938_v56  ;;  %v2793_v13 = vmax.f32 %v4940_v57, %v2686_v19  ;;  %v4942_v30 = vld [vmem:[#allocation18_spill] sm:$0xff]  ;;  %3045 = vst [vmem:[%s3025_s20 + $0x18] sm:$0xff] (%p3539_p5), %v3044_v23 }
 0x1c9   : > { %v2824_v52 = vmax.f32 %v4936_v41, %v2792_v31  ;;  %v3431_v2 = vpack.c.bf16 %v2899_v46, %v2898_v1  ;;  %v2853_v7 = vadd.f32 %v4571_v5, %v2809_v28  ;;  %v2886_v49 = vmax.f32 %v2854_v12, 0.0  ;;  %v3054_v12 = vld [vmem:[%s4615_s11 + $0x40] sm:$0xff] (%p3539_p5)  ;;  %v3058_v25 = vld [vmem:[%s4615_s11 + $0x50] sm:$0xff] (%p3539_p5) }
 0x1ca   : > { %v2826_v15 = vmax.f32 %v4939_v54, %v2794_v29  ;;  %3012 = vst [vmem:[%s4615_s11 + $0x60] sm:$0xff] %v3430_v24  ;;  %v2855_v9 = vadd.f32 %v4571_v5, %v2811_v11  ;;  %v2795_v58 = vmax.f32 %v4941_v48, %v2729_v26  ;;  %v4944_v45 = vmax.f32 %v4942_v30, %v4943_v36  ;;  %v3040_v26 = vld [vmem:[%s4615_s11 + $0x8] sm:$0xff] (%p3539_p5) }
 0x1cb   : > { %v2868_v22 = vadd.f32 %v4582_v16, %v2824_v52  ;;  %3013 = vst [vmem:[%s4615_s11 + $0x68] sm:$0xff] %v3431_v2  ;;  %v2885_v37 = vmax.f32 %v2853_v7, 0.0  ;;  %v4947_v20 = vmax.f32 %v4945_v42, %v4946_v18  ;;  %v3046_v6 = vld [vmem:[%s4615_s11 + $0x20] sm:$0xff] (%p3539_p5)  ;;  %3041 = vst [vmem:[%s3025_s20 + $0x8] sm:$0xff] (%p3539_p5), %v3040_v26 }
 0x1cc   : > { %v2870_v61 = vadd.f32 %v4582_v16, %v2826_v15  ;;  %v2825_v53 = vmax.f32 %v4944_v45, %v2793_v13  ;;  %v2887_v63 = vmax.f32 %v2855_v9, 0.0  ;;  %v3048_v33 = vld [vmem:[%s4615_s11 + $0x28] sm:$0xff] (%p3539_p5)  ;;  %3047 = vst [vmem:[%s3025_s20 + $0x20] sm:$0xff] (%p3539_p5), %v3046_v6  ;;  %3055 = vst [vmem:[%s3025_s20 + $0x80] sm:$0xff] (%p3539_p5), %v3054_v12 }
 0x1cd   : > { %v2827_v5 = vmax.f32 %v4947_v20, %v2795_v58  ;;  %v3424_v38 = vpack.c.bf16 %v2885_v37, %v2884_v50  ;;  %v2900_v55 = vmax.f32 %v2868_v22, 0.0  ;;  %3049 = vst [vmem:[%s3025_s20 + $0x28] sm:$0xff] (%p3539_p5), %v3048_v33  ;;  %3059 = vst [vmem:[%s3025_s20 + $0x90] sm:$0xff] (%p3539_p5), %v3058_v25 }
 0x1ce   : > { %v2869_v19 = vadd.f32 %v4582_v16, %v2825_v53  ;;  %v3425_v44 = vpack.c.bf16 %v2887_v63, %v2886_v49  ;;  %v2902_v1 = vmax.f32 %v2870_v61, 0.0 }
 0x1cf   : > { %v2871_v4 = vadd.f32 %v4582_v16, %v2827_v5  ;;  %3006 = vst [vmem:[%s4615_s11 + $0x30] sm:$0xff] %v3424_v38  ;;  %3022 = sbr.rel (!%p3539_p5) target bundleno = 478 (0x1de), region = 59  ;;  %v3038_v16 = vld [vmem:[%s4615_s11] sm:$0xff] (%p3539_p5) }
 0x1d0   : > { %v2901_v62 = vmax.f32 %v2869_v19, 0.0  ;;  %3007 = vst [vmem:[%s4615_s11 + $0x38] sm:$0xff] %v3425_v44  ;;  %3039 = vst [vmem:[%s3025_s20] sm:$0xff] (%p3539_p5), %v3038_v16 }
 0x1d1   : > { %v2903_v14 = vmax.f32 %v2871_v4, 0.0  ;;  %v3062_v31 = vld [vmem:[%s4615_s11 + $0x60] sm:$0xff] (%p3539_p5) }
 0x1d2   : > { %v3432_v10 = vpack.c.bf16 %v2901_v62, %v2900_v55  ;;  %v3064_v46 = vld [vmem:[%s4615_s11 + $0x68] sm:$0xff] (%p3539_p5)  ;;  %3063 = vst [vmem:[%s3025_s20 + $0xa0] sm:$0xff] (%p3539_p5), %v3062_v31 }
 0x1d3   : > { %v3433_v47 = vpack.c.bf16 %v2903_v14, %v2902_v1  ;;  %3065 = vst [vmem:[%s3025_s20 + $0xa8] sm:$0xff] (%p3539_p5), %v3064_v46 }
 0x1d4   : > { %3014 = vst [vmem:[%s4615_s11 + $0x70] sm:$0xff] %v3432_v10 }
 0x1d5   : > { %3015 = vst [vmem:[%s4615_s11 + $0x78] sm:$0xff] %v3433_v47 }
 0x1d6   : > { %v3050_v32 = vld [vmem:[%s4615_s11 + $0x30] sm:$0xff] }
 0x1d7   : > { %v3052_v8 = vld [vmem:[%s4615_s11 + $0x38] sm:$0xff]  ;;  %3051 = vst [vmem:[%s3025_s20 + $0x30] sm:$0xff] %v3050_v32 }
 0x1d8   : > { %3053 = vst [vmem:[%s3025_s20 + $0x38] sm:$0xff] %v3052_v8 }
 0x1db   : > { %v3066_v34 = vld [vmem:[%s4615_s11 + $0x70] sm:$0xff] }
 0x1dc   : > { %3067 = vst [vmem:[%s3025_s20 + $0xb0] sm:$0xff] %v3066_v34  ;;  %v3068_v40 = vld [vmem:[%s4615_s11 + $0x78] sm:$0xff] }
 0x1dd   : > { %3069 = vst [vmem:[%s3025_s20 + $0xb8] sm:$0xff] %v3068_v40 }
 0x1de PF: > { %p10_p10 = scmp.ge.s32.totalorder %s3526_s16, 4   ;;  %s4948_s12 = smov %s3481_s13 }
 0x1df   : > { %s4949_s13 = smov %s3537_s19  ;;  %s4950_s14 = smov %s3526_s16 }
 0x1e0   :  { %12 = sbr.rel (!%p10_p10) target bundleno = 2 (0x2), region = 116 }

// kernel: convnet4_forward.3
= control target key start
LH: loop header
LB: loop body
LE: loop exit
PB: predicated region body
PF: predicated region fallthrough
CT: control target
= control target key end

     0   :  { %8 = vsyncpa [#allocation4], 0  ;;  %s5692_s0 = inlined_call_operand.vmem [shape: bf16[16,16,256], index: 0, kind: input, shape index: {}]   ;;  %s5693_s1 = inlined_call_operand.vmem [shape: bf16[16,256,128], index: 1, kind: input, shape index: {}]   ;;  %s5694_s2 = inlined_call_operand.vmem [shape: f32[1,128], index: 2, kind: input, shape index: {}]   ;;  %s5695_s3 = inlined_call_operand.hbm [shape: f32[16,128], index: 3, kind: output, shape index: {}]  }
   0x1   :  { %10 = vsyncpa [#allocation4 + $0x1], 0  ;;  %s4775_s12 = smov 0   ;;  %s4777_s13 = smov 0  }
   0x2   :  { %s4779_s14 = smov 0   ;;  %s4781_s15 = smov 0  }
   0x3 LB: > { %s3212_s16 = sadd.s32 4294967295, %s4752_s15   ;;  %s3213_s17 = sadd.s32 4294967294, %s4752_s15   ;;  %s4752_s15 = sphi %s4781_s15, %s5701_s15   ;;  %s4748_s14 = sphi %s4779_s14, %s5700_s14   ;;  %s4744_s13 = sphi %s4777_s13, %s5699_s13   ;;  %s4740_s12 = sphi %s4775_s12, %s5698_s12  }
   0x4   : > { %s4798_s18 = sadd.s32 1, %s4752_s15   ;;  %s23_s19 = sadd.s32 1, %s4748_s14 }
   0x5   : > { %s20_s20 = ssub.s32 %s4752_s15, %s4798_s18  ;;  %p30_p0 = scmp.ne.s32.totalorder %s4748_s14, %s4744_s13 }
   0x6   : > { %p21_p1 = scmp.eq.s32.totalorder %s20_s20, 0  ;;  %p31_p2 = scmp.eq.s32.totalorder %s4752_s15, 0 }
   0x7   : > { %p102_p3 = scmp.eq.s32.totalorder %s3212_s16, 1  ;;  %p107_p4 = scmp.ne.s32.totalorder %s4744_s13, %s4740_s12 }
   0x8   : > { %s4811_s21 = scalar_select %p21_p1, %s4748_s14, %s23_s19  }
   0x9   : > { %p32_p5 = por %p31_p2, %p30_p0  ;;  %p4813_p6 = por %p102_p3, %p30_p0 }
   0xa   : > { %p108_p7 = scmp.eq.s32.totalorder %s3213_s17, 1  ;;  %p3215_p9 = scmp.ge.s32.totalorder %s4752_s15, 2 }
   0xc   : > { %p4817_p8 = por %p108_p7, %p107_p4  ;;  %130 = sbr.rel (%p3215_p9) target bundleno = 31 (0x1f), region = 24 }
  0x13   : > { %133 = sbr.rel (!%p32_p5) target bundleno = 31 (0x1f), region = 28  ;;  %s135_s24 = sand.u32 (%p32_p5), 1, %s4748_s14  }
  0x14   : > { %s4010_s25 = sshll.u32 (%p32_p5), %s4752_s15, 3  ;;  %s3216_s26 = sshll.u32 (%p32_p5), %s135_s24, 7 }
  0x15   : > { %s4829_s29 = scalar_lea.vmem (%p32_p5), %s5692_s0, %s4010_s25  ;;  %s137_s30 = scalar_lea.vmem (%p32_p5), [#allocation2], %s3216_s26 }
  0x16   : > { %v198_v0 = vld [vmem:[%s4829_s29] sm:$0xff] (%p32_p5)  ;;  %v200_v1 = vld [vmem:[%s4829_s29 + $0x10] sm:$0xff] (%p32_p5) }
  0x17   : > { %v202_v2 = vld [vmem:[%s4829_s29 + $0x20] sm:$0xff] (%p32_p5)  ;;  %199 = vst [vmem:[%s137_s30] sm:$0xff] (%p32_p5), %v198_v0  ;;  %201 = vst [vmem:[%s137_s30 + $0x8] sm:$0xff] (%p32_p5), %v200_v1  ;;  %v204_v3 = vld [vmem:[%s4829_s29 + $0x30] sm:$0xff] (%p32_p5) }
  0x18   : > { %203 = vst [vmem:[%s137_s30 + $0x10] sm:$0xff] (%p32_p5), %v202_v2  ;;  %v206_v4 = vld [vmem:[%s4829_s29 + $0x40] sm:$0xff] (%p32_p5)  ;;  %v208_v5 = vld [vmem:[%s4829_s29 + $0x50] sm:$0xff] (%p32_p5)  ;;  %205 = vst [vmem:[%s137_s30 + $0x18] sm:$0xff] (%p32_p5), %v204_v3 }
  0x19   : > { %207 = vst [vmem:[%s137_s30 + $0x20] sm:$0xff] (%p32_p5), %v206_v4  ;;  %209 = vst [vmem:[%s137_s30 + $0x28] sm:$0xff] (%p32_p5), %v208_v5  ;;  %v210_v6 = vld [vmem:[%s4829_s29 + $0x60] sm:$0xff] (%p32_p5)  ;;  %v212_v7 = vld [vmem:[%s4829_s29 + $0x70] sm:$0xff] (%p32_p5) }
  0x1a   : > { %v214_v8 = vld [vmem:[%s4829_s29 + $0x80] sm:$0xff]  ;;  %211 = vst [vmem:[%s137_s30 + $0x30] sm:$0xff] %v210_v6  ;;  %213 = vst [vmem:[%s137_s30 + $0x38] sm:$0xff] %v212_v7  ;;  %v216_v9 = vld [vmem:[%s4829_s29 + $0x90] sm:$0xff] }
  0x1b   : > { %215 = vst [vmem:[%s137_s30 + $0x40] sm:$0xff] %v214_v8  ;;  %v218_v10 = vld [vmem:[%s4829_s29 + $0xa0] sm:$0xff]  ;;  %v220_v11 = vld [vmem:[%s4829_s29 + $0xb0] sm:$0xff]  ;;  %217 = vst [vmem:[%s137_s30 + $0x48] sm:$0xff] %v216_v9 }
  0x1c   : > { %219 = vst [vmem:[%s137_s30 + $0x50] sm:$0xff] %v218_v10  ;;  %221 = vst [vmem:[%s137_s30 + $0x58] sm:$0xff] %v220_v11  ;;  %v222_v12 = vld [vmem:[%s4829_s29 + $0xc0] sm:$0xff]  ;;  %v224_v13 = vld [vmem:[%s4829_s29 + $0xd0] sm:$0xff] }
  0x1d   : > { %v226_v14 = vld [vmem:[%s4829_s29 + $0xe0] sm:$0xff]  ;;  %223 = vst [vmem:[%s137_s30 + $0x60] sm:$0xff] %v222_v12  ;;  %225 = vst [vmem:[%s137_s30 + $0x68] sm:$0xff] %v224_v13  ;;  %v228_v15 = vld [vmem:[%s4829_s29 + $0xf0] sm:$0xff] }
  0x1e   : > { %227 = vst [vmem:[%s137_s30 + $0x70] sm:$0xff] %v226_v14  ;;  %229 = vst [vmem:[%s137_s30 + $0x78] sm:$0xff] %v228_v15 }
  0x1f PF: > { %p3219_p10 = scmp.ge.s32.totalorder %s4752_s15, 1  ;;  %p234_p11 = scmp.lt.s32.totalorder %s4752_s15, 3 }
  0x21   : > { %p235_p12 = pnand %p3219_p10, %p234_p11 }
  0x22   : > { %v4402_v16 = vld [vmem:[%s5693_s1 + $0xc0] sm:$0xff] (!%p235_p12)   ;;  %v4406_v20 = vld [vmem:[%s5693_s1 + $0xc8] sm:$0xff] (!%p235_p12)   ;;  %v4410_v24 = vld [vmem:[%s5693_s1 + $0xd0] sm:$0xff] (!%p235_p12)   ;;  %s4922_s25 = sand.u32 (!%p235_p12), 1, %s4744_s13   ;;  %s4007_s29 = sshll.u32 (!%p235_p12), %s3212_s16, 7 }
  0x23   : > { %238 = sbr.rel (%p235_p12) target bundleno = 527 (0x20f), region = 66  ;;  %v4403_v17 = vld [vmem:[%s5693_s1 + $0x40] sm:$0xff] (!%p235_p12)   ;;  %4011 = vmatprep.subr.bf16.mxu0 (!%p235_p12), %v4402_v16  ;;  %v4407_v21 = vld [vmem:[%s5693_s1 + $0x48] sm:$0xff] (!%p235_p12)   ;;  %v4411_v25 = vld [vmem:[%s5693_s1 + $0x50] sm:$0xff] (!%p235_p12)   ;;  %s3220_s5 = sshll.u32 (!%p235_p12), %s4922_s25, 7 }
  0x24   : > { %v4404_v18 = vld [vmem:[%s5693_s1 + $0x80] sm:$0xff] (!%p235_p12)   ;;  %4033 = vmatprep.subr.bf16.mxu1 (!%p235_p12), %v4403_v17  ;;  %v4408_v22 = vld [vmem:[%s5693_s1 + $0x88] sm:$0xff] (!%p235_p12)   ;;  %v4412_v26 = vld [vmem:[%s5693_s1 + $0x90] sm:$0xff] (!%p235_p12)   ;;  %s4949_s26 = scalar_lea.vmem (!%p235_p12), [#allocation2], %s3220_s5  ;;  %s5648_s7 = scalar_lea.hbm (!%p235_p12), %s5695_s3, %s4007_s29 }
  0x25   : > { %v4405_v19 = vld [vmem:[%s5693_s1] sm:$0xff] (!%p235_p12)   ;;  %4012 = vmatpush3.bf16.msra.mxu0 (!%p235_p12), %v4404_v18  ;;  %v4409_v23 = vld [vmem:[%s5693_s1 + $0x8] sm:$0xff] (!%p235_p12)   ;;  %v4413_v27 = vld [vmem:[%s5693_s1 + $0x10] sm:$0xff] (!%p235_p12)   ;;  %s3135_s8 = scalar_lea.sflag (!%p235_p12), [#allocation4], %s4922_s25  ;;  %s4754_s16 = smov (!%p235_p12), [#allocation3]  }
  0x26   : > { %4034 = vmatpush3.bf16.msra.mxu1 (!%p235_p12), %v4405_v19  ;;  %4013 = vmatprep.subr.bf16.mxu0 (!%p235_p12), %v4406_v20  ;;  %v4414_v28 = vld [vmem:[%s5693_s1 + $0xd8] sm:$0xff] (!%p235_p12)   ;;  %v4418_v32 = vld [vmem:[%s5693_s1 + $0xe0] sm:$0xff] (!%p235_p12)   ;;  %v4422_v36 = vld [vmem:[%s5693_s1 + $0xe8] sm:$0xff] (!%p235_p12)   ;;  %s4694_s10 = sshll.u32 (!%p235_p12), %s4754_s16, 4  ;;  %s4695_s10 = int_to_ptr.vmem [resolvable:$false] %s4694_s10 }
  0x27   : > { %4035 = vmatprep.subr.bf16.mxu1 (!%p235_p12), %v4407_v21  ;;  %v4415_v29 = vld [vmem:[%s5693_s1 + $0x58] sm:$0xff] (!%p235_p12)   ;;  %v4419_v33 = vld [vmem:[%s5693_s1 + $0x60] sm:$0xff] (!%p235_p12)   ;;  %v4423_v37 = vld [vmem:[%s5693_s1 + $0x68] sm:$0xff] (!%p235_p12)   ;;  %s4696_s11 = scalar_lea.vmem (!%p235_p12), %s4695_s10, 256 }
  0x28   : > { %v4416_v30 = vld [vmem:[%s5693_s1 + $0x98] sm:$0xff] (!%p235_p12)   ;;  %v4420_v34 = vld [vmem:[%s5693_s1 + $0xa0] sm:$0xff] (!%p235_p12)   ;;  %v4424_v38 = vld [vmem:[%s5693_s1 + $0xa8] sm:$0xff] (!%p235_p12)  }
  0x29   : > { %4014 = vmatpush3.bf16.msra.mxu0 (!%p235_p12), %v4408_v22  ;;  %v4417_v31 = vld [vmem:[%s5693_s1 + $0x18] sm:$0xff] (!%p235_p12)   ;;  %v4421_v35 = vld [vmem:[%s5693_s1 + $0x20] sm:$0xff] (!%p235_p12)   ;;  %v4425_v39 = vld [vmem:[%s5693_s1 + $0x28] sm:$0xff] (!%p235_p12)  }
  0x2a   : > { %4036 = vmatpush3.bf16.msra.mxu1 %v4409_v23  ;;  %4015 = vmatprep.subr.bf16.mxu0 %v4410_v24  ;;  %v4426_v40 = vld [vmem:[%s5693_s1 + $0xf0] sm:$0xff]   ;;  %v4430_v44 = vld [vmem:[%s5693_s1 + $0xf8] sm:$0xff]   ;;  %v3222_v48 = vld [vmem:[%s4949_s26 + $0x8] sm:$0xff] }
  0x2b   : > { %4037 = vmatprep.subr.bf16.mxu1 %v4411_v25  ;;  %v4427_v41 = vld [vmem:[%s5693_s1 + $0x70] sm:$0xff]   ;;  %v4431_v45 = vld [vmem:[%s5693_s1 + $0x78] sm:$0xff]   ;;  %v265_v49 = vld [vmem:[%s4949_s26] sm:$0xff]  ;;  %v3255_v50 = vcombine.low %v3222_v48, %v3222_v48  ;;  %v3256_v51 = vcombine.high %v3222_v48, %v3222_v48 }
  0x2c   : > { %v4428_v42 = vld [vmem:[%s5693_s1 + $0xb0] sm:$0xff]   ;;  %v4432_v46 = vld [vmem:[%s5693_s1 + $0xb8] sm:$0xff]   ;;  %v3273_v52 = vcombine.low %v265_v49, %v265_v49  ;;  %v3274_v53 = vcombine.high %v265_v49, %v265_v49  ;;  %v4438_v54 = vld [vmem:[%s5693_s1 + $0x140] sm:$0xff]  }
  0x2d   : > { %4016 = vmatpush3.bf16.msra.mxu0 %v4412_v26  ;;  %v4429_v43 = vld [vmem:[%s5693_s1 + $0x30] sm:$0xff]   ;;  %v4433_v47 = vld [vmem:[%s5693_s1 + $0x38] sm:$0xff]   ;;  %v4439_v55 = vld [vmem:[%s5693_s1 + $0x1c0] sm:$0xff]   ;;  %468 = vmatprep.mubr.bf16.mxu0 %v3256_v51 }
  0x2e   : > { %4038 = vmatpush3.bf16.msra.mxu1 %v4413_v27  ;;  %4017 = vmatprep.subr.bf16.mxu0 %v4414_v28  ;;  %v4440_v56 = vld [vmem:[%s5693_s1 + $0x100] sm:$0xff]   ;;  %v4442_v58 = vld [vmem:[%s5693_s1 + $0x148] sm:$0xff]   ;;  %v4446_v62 = vld [vmem:[%s5693_s1 + $0x150] sm:$0xff]  }
  0x2f   : > { %4039 = vmatprep.subr.bf16.mxu1 %v4415_v29  ;;  %611 = vmatprep.mubr.bf16.mxu1 %v3274_v53  ;;  %v4441_v57 = vld [vmem:[%s5693_s1 + $0x180] sm:$0xff]   ;;  %v4443_v59 = vld [vmem:[%s5693_s1 + $0x1c8] sm:$0xff]   ;;  %v4447_v63 = vld [vmem:[%s5693_s1 + $0x1d0] sm:$0xff]  }
  0x30   : > { %v4444_v60 = vld [vmem:[%s5693_s1 + $0x108] sm:$0xff]   ;;  %v4448_v0 = vld [vmem:[%s5693_s1 + $0x110] sm:$0xff]   ;;  %v4450_v2 = vld [vmem:[%s5693_s1 + $0x158] sm:$0xff]  }
  0x31   : > { %4018 = vmatpush3.bf16.msra.mxu0 %v4416_v30  ;;  %v4445_v61 = vld [vmem:[%s5693_s1 + $0x188] sm:$0xff]   ;;  %v4449_v1 = vld [vmem:[%s5693_s1 + $0x190] sm:$0xff]   ;;  %v4451_v3 = vld [vmem:[%s5693_s1 + $0x1d8] sm:$0xff]  }
  0x32   : > { %4040 = vmatpush3.bf16.msra.mxu1 %v4417_v31  ;;  %4019 = vmatprep.subr.bf16.mxu0 %v4418_v32  ;;  %v4452_v4 = vld [vmem:[%s5693_s1 + $0x118] sm:$0xff]   ;;  %v4454_v6 = vld [vmem:[%s5693_s1 + $0x160] sm:$0xff]   ;;  %v4458_v10 = vld [vmem:[%s5693_s1 + $0x168] sm:$0xff]  }
  0x33   : > { %4041 = vmatprep.subr.bf16.mxu1 %v4419_v33  ;;  %v4453_v5 = vld [vmem:[%s5693_s1 + $0x198] sm:$0xff]   ;;  %v4455_v7 = vld [vmem:[%s5693_s1 + $0x1e0] sm:$0xff]   ;;  %v4459_v11 = vld [vmem:[%s5693_s1 + $0x1e8] sm:$0xff]  }
  0x34   : > { %v4456_v8 = vld [vmem:[%s5693_s1 + $0x120] sm:$0xff]   ;;  %v4460_v12 = vld [vmem:[%s5693_s1 + $0x128] sm:$0xff]   ;;  %v4462_v14 = vld [vmem:[%s5693_s1 + $0x170] sm:$0xff]  }
  0x35   : > { %4020 = vmatpush3.bf16.msra.mxu0 %v4420_v34  ;;  %v4457_v9 = vld [vmem:[%s5693_s1 + $0x1a0] sm:$0xff]   ;;  %v4461_v13 = vld [vmem:[%s5693_s1 + $0x1a8] sm:$0xff]   ;;  %v4463_v15 = vld [vmem:[%s5693_s1 + $0x1f0] sm:$0xff]  }
  0x36   : > { %4042 = vmatpush3.bf16.msra.mxu1 %v4421_v35  ;;  %4021 = vmatprep.subr.bf16.mxu0 %v4422_v36  ;;  %v4464_v16 = vld [vmem:[%s5693_s1 + $0x130] sm:$0xff]   ;;  %v4466_v18 = vld [vmem:[%s5693_s1 + $0x178] sm:$0xff]   ;;  %v4474_v28 = vld [vmem:[%s5693_s1 + $0x240] sm:$0xff]  }
  0x37   : > { %4043 = vmatprep.subr.bf16.mxu1 %v4423_v37  ;;  %v4465_v17 = vld [vmem:[%s5693_s1 + $0x1b0] sm:$0xff]   ;;  %v4467_v19 = vld [vmem:[%s5693_s1 + $0x1f8] sm:$0xff]   ;;  %v4475_v29 = vld [vmem:[%s5693_s1 + $0x2c0] sm:$0xff]  }
  0x38   : > { %v4468_v20 = vld [vmem:[%s5693_s1 + $0x138] sm:$0xff]   ;;  %v3291_v22 = vld [vmem:[%s4949_s26 + $0x10] sm:$0xff]  ;;  %v4476_v30 = vld [vmem:[%s5693_s1 + $0x200] sm:$0xff]  }
  0x39   : > { %4022 = vmatpush3.bf16.msra.mxu0 %v4424_v38  ;;  %v4469_v21 = vld [vmem:[%s5693_s1 + $0x1b8] sm:$0xff]   ;;  %v3324_v23 = vcombine.low %v3291_v22, %v3291_v22  ;;  %v3325_v24 = vcombine.high %v3291_v22, %v3291_v22  ;;  %v4477_v31 = vld [vmem:[%s5693_s1 + $0x280] sm:$0xff]   ;;  %v4478_v32 = vld [vmem:[%s5693_s1 + $0x248] sm:$0xff]  }
  0x3a   : > { %4044 = vmatpush3.bf16.msra.mxu1 %v4425_v39  ;;  %4023 = vmatprep.subr.bf16.mxu0 %v4426_v40  ;;  %v3342_v25 = vld [vmem:[%s4949_s26 + $0x18] sm:$0xff]  ;;  %v4479_v33 = vld [vmem:[%s5693_s1 + $0x2c8] sm:$0xff]   ;;  %v4482_v36 = vld [vmem:[%s5693_s1 + $0x250] sm:$0xff]  }
  0x3b   : > { %4045 = vmatprep.subr.bf16.mxu1 %v4427_v41  ;;  %v3375_v26 = vcombine.low %v3342_v25, %v3342_v25  ;;  %v3376_v27 = vcombine.high %v3342_v25, %v3342_v25  ;;  %v4480_v34 = vld [vmem:[%s5693_s1 + $0x208] sm:$0xff]   ;;  %v4483_v37 = vld [vmem:[%s5693_s1 + $0x2d0] sm:$0xff]   ;;  %v4486_v40 = vld [vmem:[%s5693_s1 + $0x258] sm:$0xff]  }
  0x3c   : > { %v4481_v35 = vld [vmem:[%s5693_s1 + $0x288] sm:$0xff]   ;;  %v4484_v38 = vld [vmem:[%s5693_s1 + $0x210] sm:$0xff]   ;;  %v4487_v41 = vld [vmem:[%s5693_s1 + $0x2d8] sm:$0xff]  }
  0x3d   : > { %4024 = vmatpush3.bf16.msra.mxu0 %v4428_v42  ;;  %v4485_v39 = vld [vmem:[%s5693_s1 + $0x290] sm:$0xff]   ;;  %v4488_v42 = vld [vmem:[%s5693_s1 + $0x218] sm:$0xff]   ;;  %v4494_v48 = vld [vmem:[%s5693_s1 + $0x268] sm:$0xff]  }
  0x3e   : > { %4046 = vmatpush3.bf16.msra.mxu1 %v4429_v43  ;;  %4025 = vmatprep.subr.bf16.mxu0 %v4430_v44  ;;  %v4489_v43 = vld [vmem:[%s5693_s1 + $0x298] sm:$0xff]   ;;  %v4490_v44 = vld [vmem:[%s5693_s1 + $0x260] sm:$0xff]   ;;  %v4495_v49 = vld [vmem:[%s5693_s1 + $0x2e8] sm:$0xff]  }
  0x3f   : > { %4047 = vmatprep.subr.bf16.mxu1 %v4431_v45  ;;  %v4491_v45 = vld [vmem:[%s5693_s1 + $0x2e0] sm:$0xff]   ;;  %v4497_v51 = vld [vmem:[%s5693_s1 + $0x2a8] sm:$0xff]   ;;  %v4499_v53 = vld [vmem:[%s5693_s1 + $0x2f0] sm:$0xff]  }
  0x40   : > { %v4530_v22 = vld [vmem:[%s5693_s1 + $0x368] sm:$0xff]  }
  0x41   : > { %4026 = vmatpush3.bf16.msra.mxu0 %v4432_v46  ;;  %v4492_v46 = vld [vmem:[%s5693_s1 + $0x220] sm:$0xff]   ;;  %v4533_v25 = vld [vmem:[%s5693_s1 + $0x3a8] sm:$0xff]  }
  0x42   : > { %4048 = vmatpush3.bf16.msra.mxu1 %v4433_v47  ;;  %4055 = vmatprep.subr.bf16.mxu0 %v4438_v54  ;;  %v4493_v47 = vld [vmem:[%s5693_s1 + $0x2a0] sm:$0xff]   ;;  %v4500_v54 = vld [vmem:[%s5693_s1 + $0x230] sm:$0xff]  }
  0x43   : > { %4077 = vmatprep.subr.bf16.mxu1 %v4439_v55  ;;  %v4501_v55 = vld [vmem:[%s5693_s1 + $0x2b0] sm:$0xff]  }
  0x44   : > { %469 = vmatmul.mubr.bf16.vlgmr.msra.gmra.mrb[0].mxu0 %v3255_v50  ;;  %v4496_v50 = vld [vmem:[%s5693_s1 + $0x228] sm:$0xff]  }
  0x45   : > { %612 = vmatmul.mubr.bf16.vlgmr.msra.gmra.mrb[0].mxu1 %v3273_v52  ;;  %4056 = vmatpush3.bf16.msra.mxu0 %v4440_v56  ;;  %v4498_v52 = vld [vmem:[%s5693_s1 + $0x270] sm:$0xff]   ;;  %v4502_v56 = vld [vmem:[%s5693_s1 + $0x278] sm:$0xff]  }
  0x46   : > { %4078 = vmatpush3.bf16.msra.mxu1 %v4441_v57  ;;  %4057 = vmatprep.subr.bf16.mxu0 %v4442_v58  ;;  %v4503_v57 = vld [vmem:[%s5693_s1 + $0x2f8] sm:$0xff]  }
  0x47   : > { %4079 = vmatprep.subr.bf16.mxu1 %v4443_v59  ;;  %789 = vmatprep.mubr.bf16.mxu0 %v3325_v24  ;;  %v4504_v58 = vld [vmem:[%s5693_s1 + $0x238] sm:$0xff]   ;;  %v4532_v24 = vld [vmem:[%s5693_s1 + $0x328] sm:$0xff]  }
  0x48   : > { %968 = vmatprep.mubr.bf16.mxu1 %v3376_v27  ;;  %v4505_v59 = vld [vmem:[%s5693_s1 + $0x2b8] sm:$0xff]   ;;  %v4535_v27 = vld [vmem:[%s5693_s1 + $0x3f0] sm:$0xff]  }
  0x49   : > { %4058 = vmatpush3.bf16.msra.mxu0 %v4444_v60  ;;  %v3393_v60 = vld [vmem:[%s4949_s26 + $0x20] sm:$0xff] }
  0x4a   : > { %4080 = vmatpush3.bf16.msra.mxu1 %v4445_v61  ;;  %4059 = vmatprep.subr.bf16.mxu0 %v4446_v62  ;;  %v3444_v61 = vld [vmem:[%s4949_s26 + $0x28] sm:$0xff]  ;;  %v3426_v62 = vcombine.low %v3393_v60, %v3393_v60 }
  0x4b   : > { %4081 = vmatprep.subr.bf16.mxu1 %v4447_v63  ;;  %v3427_v63 = vcombine.high %v3393_v60, %v3393_v60  ;;  %v4566_v60 = vld [vmem:[%s5693_s1 + $0x468] sm:$0xff]  }
  0x4d   : > { %4060 = vmatpush3.bf16.msra.mxu0 %v4448_v0  ;;  %v3477_v0 = vcombine.low %v3444_v61, %v3444_v61 }
  0x4e   : > { %4082 = vmatpush3.bf16.msra.mxu1 %v4449_v1  ;;  %4061 = vmatprep.subr.bf16.mxu0 %v4450_v2  ;;  %v3478_v1 = vcombine.high %v3444_v61, %v3444_v61  ;;  %v4510_v2 = vld [vmem:[%s5693_s1 + $0x340] sm:$0xff]   ;;  %v4567_v61 = vld [vmem:[%s5693_s1 + $0x4e8] sm:$0xff]  }
  0x4f   : > { %4083 = vmatprep.subr.bf16.mxu1 %v4451_v3  ;;  %v4511_v3 = vld [vmem:[%s5693_s1 + $0x3c0] sm:$0xff]  }
  0x51   : > { %4062 = vmatpush3.bf16.msra.mxu0 %v4452_v4  ;;  %v4512_v4 = vld [vmem:[%s5693_s1 + $0x300] sm:$0xff]  }
  0x52   : > { %4084 = vmatpush3.bf16.msra.mxu1 %v4453_v5  ;;  %4063 = vmatprep.subr.bf16.mxu0 %v4454_v6  ;;  %v4513_v5 = vld [vmem:[%s5693_s1 + $0x380] sm:$0xff]   ;;  %v4514_v6 = vld [vmem:[%s5693_s1 + $0x348] sm:$0xff]  }
  0x53   : > { %4085 = vmatprep.subr.bf16.mxu1 %v4455_v7  ;;  %v4515_v7 = vld [vmem:[%s5693_s1 + $0x3c8] sm:$0xff]  }
  0x55   : > { %4064 = vmatpush3.bf16.msra.mxu0 %v4456_v8  ;;  %v4516_v8 = vld [vmem:[%s5693_s1 + $0x308] sm:$0xff]  }
  0x56   : > { %4086 = vmatpush3.bf16.msra.mxu1 %v4457_v9  ;;  %4065 = vmatprep.subr.bf16.mxu0 %v4458_v10  ;;  %v4517_v9 = vld [vmem:[%s5693_s1 + $0x388] sm:$0xff]   ;;  %v4518_v10 = vld [vmem:[%s5693_s1 + $0x350] sm:$0xff]  }
  0x57   : > { %4087 = vmatprep.subr.bf16.mxu1 %v4459_v11  ;;  %v4519_v11 = vld [vmem:[%s5693_s1 + $0x3d0] sm:$0xff]  }
  0x59   : > { %4066 = vmatpush3.bf16.msra.mxu0 %v4460_v12  ;;  %v4520_v12 = vld [vmem:[%s5693_s1 + $0x310] sm:$0xff]  }
  0x5a   : > { %4088 = vmatpush3.bf16.msra.mxu1 %v4461_v13  ;;  %4067 = vmatprep.subr.bf16.mxu0 %v4462_v14  ;;  %v4521_v13 = vld [vmem:[%s5693_s1 + $0x390] sm:$0xff]   ;;  %v4522_v14 = vld [vmem:[%s5693_s1 + $0x358] sm:$0xff]  }
  0x5b   : > { %4089 = vmatprep.subr.bf16.mxu1 %v4463_v15  ;;  %v4523_v15 = vld [vmem:[%s5693_s1 + $0x3d8] sm:$0xff]  }
  0x5d   : > { %4068 = vmatpush3.bf16.msra.mxu0 %v4464_v16  ;;  %v4524_v16 = vld [vmem:[%s5693_s1 + $0x318] sm:$0xff]  }
  0x5e   : > { %4090 = vmatpush3.bf16.msra.mxu1 %v4465_v17  ;;  %4069 = vmatprep.subr.bf16.mxu0 %v4466_v18  ;;  %v4525_v17 = vld [vmem:[%s5693_s1 + $0x398] sm:$0xff]   ;;  %v4526_v18 = vld [vmem:[%s5693_s1 + $0x360] sm:$0xff]  }
  0x5f   : > { %4091 = vmatprep.subr.bf16.mxu1 %v4467_v19  ;;  %v4527_v19 = vld [vmem:[%s5693_s1 + $0x3e0] sm:$0xff]  }
  0x61   : > { %4070 = vmatpush3.bf16.msra.mxu0 %v4468_v20  ;;  %v4528_v20 = vld [vmem:[%s5693_s1 + $0x320] sm:$0xff]  }
  0x62   : > { %4092 = vmatpush3.bf16.msra.mxu1 %v4469_v21  ;;  %4099 = vmatprep.subr.bf16.mxu0 %v4474_v28  ;;  %v4529_v21 = vld [vmem:[%s5693_s1 + $0x3a0] sm:$0xff]   ;;  %v4536_v28 = vld [vmem:[%s5693_s1 + $0x330] sm:$0xff]  }
  0x63   : > { %4121 = vmatprep.subr.bf16.mxu1 %v4475_v29  ;;  %v4537_v29 = vld [vmem:[%s5693_s1 + $0x3b0] sm:$0xff]  }
  0x64   : > { %790 = vmatmul.mubr.bf16.vlgmr.msra.gmra.mrb[4].mxu0 %v3324_v23  ;;  %v4531_v23 = vld [vmem:[%s5693_s1 + $0x3e8] sm:$0xff]  }
  0x65   : > { %969 = vmatmul.mubr.bf16.vlgmr.msra.gmra.mrb[4].mxu1 %v3375_v26  ;;  %4100 = vmatpush3.bf16.msra.mxu0 %v4476_v30  ;;  %v4534_v26 = vld [vmem:[%s5693_s1 + $0x370] sm:$0xff]   ;;  %v4538_v30 = vld [vmem:[%s5693_s1 + $0x378] sm:$0xff]  }
  0x66   : > { %4122 = vmatpush3.bf16.msra.mxu1 %v4477_v31  ;;  %4101 = vmatprep.subr.bf16.mxu0 %v4478_v32  ;;  %v4539_v31 = vld [vmem:[%s5693_s1 + $0x3f8] sm:$0xff]  }
  0x67   : > { %4123 = vmatprep.subr.bf16.mxu1 %v4479_v33  ;;  %1147 = vmatprep.mubr.bf16.mxu0 %v3427_v63  ;;  %v4540_v32 = vld [vmem:[%s5693_s1 + $0x338] sm:$0xff]   ;;  %v4569_v63 = vld [vmem:[%s5693_s1 + $0x4a8] sm:$0xff]  }
  0x68   : > { %1326 = vmatprep.mubr.bf16.mxu1 %v3478_v1  ;;  %v4541_v33 = vld [vmem:[%s5693_s1 + $0x3b8] sm:$0xff]   ;;  %v4571_v1 = vld [vmem:[%s5693_s1 + $0x4f0] sm:$0xff]  }
  0x69   : > { %4102 = vmatpush3.bf16.msra.mxu0 %v4480_v34  ;;  %v3495_v34 = vld [vmem:[%s4949_s26 + $0x30] sm:$0xff] }
  0x6a   : > { %4124 = vmatpush3.bf16.msra.mxu1 %v4481_v35  ;;  %4103 = vmatprep.subr.bf16.mxu0 %v4482_v36  ;;  %v3546_v35 = vld [vmem:[%s4949_s26 + $0x38] sm:$0xff]  ;;  %v3528_v36 = vcombine.low %v3495_v34, %v3495_v34 }
  0x6b   : > { %4125 = vmatprep.subr.bf16.mxu1 %v4483_v37  ;;  %v3529_v37 = vcombine.high %v3495_v34, %v3495_v34  ;;  %v4602_v34 = vld [vmem:[%s5693_s1 + $0x568] sm:$0xff]  }
  0x6d   : > { %4104 = vmatpush3.bf16.msra.mxu0 %v4484_v38  ;;  %v3579_v38 = vcombine.low %v3546_v35, %v3546_v35 }
  0x6e   : > { %4126 = vmatpush3.bf16.msra.mxu1 %v4485_v39  ;;  %4105 = vmatprep.subr.bf16.mxu0 %v4486_v40  ;;  %v4546_v39 = vld [vmem:[%s5693_s1 + $0x440] sm:$0xff]   ;;  %v3580_v40 = vcombine.high %v3546_v35, %v3546_v35  ;;  %v4603_v35 = vld [vmem:[%s5693_s1 + $0x5e8] sm:$0xff]  }
  0x6f   : > { %4127 = vmatprep.subr.bf16.mxu1 %v4487_v41  ;;  %v4547_v41 = vld [vmem:[%s5693_s1 + $0x4c0] sm:$0xff]  }
  0x71   : > { %4106 = vmatpush3.bf16.msra.mxu0 %v4488_v42  ;;  %v4548_v42 = vld [vmem:[%s5693_s1 + $0x400] sm:$0xff]  }
  0x72   : > { %4128 = vmatpush3.bf16.msra.mxu1 %v4489_v43  ;;  %4107 = vmatprep.subr.bf16.mxu0 %v4490_v44  ;;  %v4549_v43 = vld [vmem:[%s5693_s1 + $0x480] sm:$0xff]   ;;  %v4550_v44 = vld [vmem:[%s5693_s1 + $0x448] sm:$0xff]  }
  0x73   : > { %4129 = vmatprep.subr.bf16.mxu1 %v4491_v45  ;;  %v4551_v45 = vld [vmem:[%s5693_s1 + $0x4c8] sm:$0xff]  }
  0x75   : > { %4108 = vmatpush3.bf16.msra.mxu0 %v4492_v46  ;;  %v4552_v46 = vld [vmem:[%s5693_s1 + $0x408] sm:$0xff]  }
  0x76   : > { %4130 = vmatpush3.bf16.msra.mxu1 %v4493_v47  ;;  %4109 = vmatprep.subr.bf16.mxu0 %v4494_v48  ;;  %v4553_v47 = vld [vmem:[%s5693_s1 + $0x488] sm:$0xff]   ;;  %v4554_v48 = vld [vmem:[%s5693_s1 + $0x450] sm:$0xff]  }
  0x77   : > { %4131 = vmatprep.subr.bf16.mxu1 %v4495_v49  ;;  %v4555_v49 = vld [vmem:[%s5693_s1 + $0x4d0] sm:$0xff]  }
  0x79   : > { %4110 = vmatpush3.bf16.msra.mxu0 %v4496_v50  ;;  %v4556_v50 = vld [vmem:[%s5693_s1 + $0x410] sm:$0xff]  }
  0x7a   : > { %4132 = vmatpush3.bf16.msra.mxu1 %v4497_v51  ;;  %4111 = vmatprep.subr.bf16.mxu0 %v4498_v52  ;;  %v4557_v51 = vld [vmem:[%s5693_s1 + $0x490] sm:$0xff]   ;;  %v4558_v52 = vld [vmem:[%s5693_s1 + $0x458] sm:$0xff]  }
  0x7b   : > { %4133 = vmatprep.subr.bf16.mxu1 %v4499_v53  ;;  %v4559_v53 = vld [vmem:[%s5693_s1 + $0x4d8] sm:$0xff]  }
  0x7d   : > { %4112 = vmatpush3.bf16.msra.mxu0 %v4500_v54  ;;  %v4560_v54 = vld [vmem:[%s5693_s1 + $0x418] sm:$0xff]  }
  0x7e   : > { %4134 = vmatpush3.bf16.msra.mxu1 %v4501_v55  ;;  %4113 = vmatprep.subr.bf16.mxu0 %v4502_v56  ;;  %v4561_v55 = vld [vmem:[%s5693_s1 + $0x498] sm:$0xff]   ;;  %v4562_v56 = vld [vmem:[%s5693_s1 + $0x460] sm:$0xff]  }
  0x7f   : > { %4135 = vmatprep.subr.bf16.mxu1 %v4503_v57  ;;  %v4563_v57 = vld [vmem:[%s5693_s1 + $0x4e0] sm:$0xff]  }
  0x81   : > { %4114 = vmatpush3.bf16.msra.mxu0 %v4504_v58  ;;  %v4564_v58 = vld [vmem:[%s5693_s1 + $0x420] sm:$0xff]  }
  0x82   : > { %4136 = vmatpush3.bf16.msra.mxu1 %v4505_v59  ;;  %4143 = vmatprep.subr.bf16.mxu0 %v4510_v2  ;;  %v4565_v59 = vld [vmem:[%s5693_s1 + $0x4a0] sm:$0xff]   ;;  %v4572_v2 = vld [vmem:[%s5693_s1 + $0x430] sm:$0xff]  }
  0x83   : > { %4165 = vmatprep.subr.bf16.mxu1 %v4511_v3  ;;  %v4573_v3 = vld [vmem:[%s5693_s1 + $0x4b0] sm:$0xff]  }
  0x84   : > { %1148 = vmatmul.mubr.bf16.vlgmr.msra.gmra.mrb[8].mxu0 %v3426_v62  ;;  %v4568_v62 = vld [vmem:[%s5693_s1 + $0x428] sm:$0xff]  }
  0x85   : > { %1327 = vmatmul.mubr.bf16.vlgmr.msra.gmra.mrb[8].mxu1 %v3477_v0  ;;  %4144 = vmatpush3.bf16.msra.mxu0 %v4512_v4  ;;  %v4570_v0 = vld [vmem:[%s5693_s1 + $0x470] sm:$0xff]   ;;  %v4574_v4 = vld [vmem:[%s5693_s1 + $0x478] sm:$0xff]  }
  0x86   : > { %4166 = vmatpush3.bf16.msra.mxu1 %v4513_v5  ;;  %4145 = vmatprep.subr.bf16.mxu0 %v4514_v6  ;;  %v4575_v5 = vld [vmem:[%s5693_s1 + $0x4f8] sm:$0xff]  }
  0x87   : > { %4167 = vmatprep.subr.bf16.mxu1 %v4515_v7  ;;  %1505 = vmatprep.mubr.bf16.mxu0 %v3529_v37  ;;  %v4576_v6 = vld [vmem:[%s5693_s1 + $0x438] sm:$0xff]   ;;  %v4605_v37 = vld [vmem:[%s5693_s1 + $0x5a8] sm:$0xff]  }
  0x88   : > { %1684 = vmatprep.mubr.bf16.mxu1 %v3580_v40  ;;  %v4577_v7 = vld [vmem:[%s5693_s1 + $0x4b8] sm:$0xff]   ;;  %v4608_v40 = vld [vmem:[%s5693_s1 + $0x530] sm:$0xff]  }
  0x89   : > { %4146 = vmatpush3.bf16.msra.mxu0 %v4516_v8  ;;  %v3597_v8 = vld [vmem:[%s4949_s26 + $0x40] sm:$0xff] }
  0x8a   : > { %4168 = vmatpush3.bf16.msra.mxu1 %v4517_v9  ;;  %4147 = vmatprep.subr.bf16.mxu0 %v4518_v10  ;;  %v3630_v9 = vcombine.low %v3597_v8, %v3597_v8  ;;  %v3631_v10 = vcombine.high %v3597_v8, %v3597_v8  ;;  %v4638_v8 = vld [vmem:[%s5693_s1 + $0x668] sm:$0xff]  }
  0x8b   : > { %4169 = vmatprep.subr.bf16.mxu1 %v4519_v11  ;;  %v3648_v11 = vld [vmem:[%s4949_s26 + $0x48] sm:$0xff] }
  0x8d   : > { %4148 = vmatpush3.bf16.msra.mxu0 %v4520_v12  ;;  %v3681_v12 = vcombine.low %v3648_v11, %v3648_v11 }
  0x8e   : > { %4170 = vmatpush3.bf16.msra.mxu1 %v4521_v13  ;;  %4149 = vmatprep.subr.bf16.mxu0 %v4522_v14  ;;  %v3682_v13 = vcombine.high %v3648_v11, %v3648_v11  ;;  %v4582_v14 = vld [vmem:[%s5693_s1 + $0x540] sm:$0xff]   ;;  %v4641_v11 = vld [vmem:[%s5693_s1 + $0x6a8] sm:$0xff]  }
  0x8f   : > { %4171 = vmatprep.subr.bf16.mxu1 %v4523_v15  ;;  %v4583_v15 = vld [vmem:[%s5693_s1 + $0x5c0] sm:$0xff]  }
  0x91   : > { %4150 = vmatpush3.bf16.msra.mxu0 %v4524_v16  ;;  %v4584_v16 = vld [vmem:[%s5693_s1 + $0x500] sm:$0xff]  }
  0x92   : > { %4172 = vmatpush3.bf16.msra.mxu1 %v4525_v17  ;;  %4151 = vmatprep.subr.bf16.mxu0 %v4526_v18  ;;  %v4585_v17 = vld [vmem:[%s5693_s1 + $0x580] sm:$0xff]   ;;  %v4586_v18 = vld [vmem:[%s5693_s1 + $0x548] sm:$0xff]  }
  0x93   : > { %4173 = vmatprep.subr.bf16.mxu1 %v4527_v19  ;;  %v4587_v19 = vld [vmem:[%s5693_s1 + $0x5c8] sm:$0xff]  }
  0x95   : > { %4152 = vmatpush3.bf16.msra.mxu0 %v4528_v20  ;;  %v4588_v20 = vld [vmem:[%s5693_s1 + $0x508] sm:$0xff]  }
  0x96   : > { %4174 = vmatpush3.bf16.msra.mxu1 %v4529_v21  ;;  %4153 = vmatprep.subr.bf16.mxu0 %v4530_v22  ;;  %v4589_v21 = vld [vmem:[%s5693_s1 + $0x588] sm:$0xff]   ;;  %v4590_v22 = vld [vmem:[%s5693_s1 + $0x550] sm:$0xff]  }
  0x97   : > { %4175 = vmatprep.subr.bf16.mxu1 %v4531_v23  ;;  %v4591_v23 = vld [vmem:[%s5693_s1 + $0x5d0] sm:$0xff]  }
  0x99   : > { %4154 = vmatpush3.bf16.msra.mxu0 %v4532_v24  ;;  %v4592_v24 = vld [vmem:[%s5693_s1 + $0x510] sm:$0xff]  }
  0x9a   : > { %4176 = vmatpush3.bf16.msra.mxu1 %v4533_v25  ;;  %4155 = vmatprep.subr.bf16.mxu0 %v4534_v26  ;;  %v4593_v25 = vld [vmem:[%s5693_s1 + $0x590] sm:$0xff]   ;;  %v4594_v26 = vld [vmem:[%s5693_s1 + $0x558] sm:$0xff]  }
  0x9b   : > { %4177 = vmatprep.subr.bf16.mxu1 %v4535_v27  ;;  %v4595_v27 = vld [vmem:[%s5693_s1 + $0x5d8] sm:$0xff]  }
  0x9d   : > { %4156 = vmatpush3.bf16.msra.mxu0 %v4536_v28  ;;  %v4596_v28 = vld [vmem:[%s5693_s1 + $0x518] sm:$0xff]  }
  0x9e   : > { %4178 = vmatpush3.bf16.msra.mxu1 %v4537_v29  ;;  %4157 = vmatprep.subr.bf16.mxu0 %v4538_v30  ;;  %v4597_v29 = vld [vmem:[%s5693_s1 + $0x598] sm:$0xff]   ;;  %v4598_v30 = vld [vmem:[%s5693_s1 + $0x560] sm:$0xff]  }
  0x9f   : > { %4179 = vmatprep.subr.bf16.mxu1 %v4539_v31  ;;  %v4599_v31 = vld [vmem:[%s5693_s1 + $0x5e0] sm:$0xff]  }
  0xa1   : > { %4158 = vmatpush3.bf16.msra.mxu0 %v4540_v32  ;;  %v4600_v32 = vld [vmem:[%s5693_s1 + $0x520] sm:$0xff]  }
  0xa2   : > { %4180 = vmatpush3.bf16.msra.mxu1 %v4541_v33  ;;  %4187 = vmatprep.subr.bf16.mxu0 %v4546_v39  ;;  %v4601_v33 = vld [vmem:[%s5693_s1 + $0x5a0] sm:$0xff]   ;;  %v4607_v39 = vld [vmem:[%s5693_s1 + $0x5f0] sm:$0xff]  }
  0xa3   : > { %4209 = vmatprep.subr.bf16.mxu1 %v4547_v41  ;;  %v4609_v41 = vld [vmem:[%s5693_s1 + $0x5b0] sm:$0xff]  }
  0xa4   : > { %1506 = vmatmul.mubr.bf16.vlgmr.msra.gmra.mrb[12].mxu0 %v3528_v36  ;;  %v4604_v36 = vld [vmem:[%s5693_s1 + $0x528] sm:$0xff]  }
  0xa5   : > { %1685 = vmatmul.mubr.bf16.vlgmr.msra.gmra.mrb[12].mxu1 %v3579_v38  ;;  %4188 = vmatpush3.bf16.msra.mxu0 %v4548_v42  ;;  %v4606_v38 = vld [vmem:[%s5693_s1 + $0x570] sm:$0xff]   ;;  %v4610_v42 = vld [vmem:[%s5693_s1 + $0x578] sm:$0xff]  }
  0xa6   : > { %4210 = vmatpush3.bf16.msra.mxu1 %v4549_v43  ;;  %4189 = vmatprep.subr.bf16.mxu0 %v4550_v44  ;;  %v4611_v43 = vld [vmem:[%s5693_s1 + $0x5f8] sm:$0xff]  }
  0xa7   : > { %4211 = vmatprep.subr.bf16.mxu1 %v4551_v45  ;;  %1863 = vmatprep.mubr.bf16.mxu0 %v3631_v10  ;;  %v4612_v44 = vld [vmem:[%s5693_s1 + $0x538] sm:$0xff]   ;;  %v4640_v10 = vld [vmem:[%s5693_s1 + $0x628] sm:$0xff]  }
  0xa8   : > { %2042 = vmatprep.mubr.bf16.mxu1 %v3682_v13  ;;  %v4613_v45 = vld [vmem:[%s5693_s1 + $0x5b8] sm:$0xff]   ;;  %v4643_v13 = vld [vmem:[%s5693_s1 + $0x6f0] sm:$0xff]  }
  0xa9   : > { %4190 = vmatpush3.bf16.msra.mxu0 %v4552_v46  ;;  %v3699_v46 = vld [vmem:[%s4949_s26 + $0x50] sm:$0xff] }
  0xaa   : > { %4212 = vmatpush3.bf16.msra.mxu1 %v4553_v47  ;;  %4191 = vmatprep.subr.bf16.mxu0 %v4554_v48  ;;  %v3750_v47 = vld [vmem:[%s4949_s26 + $0x58] sm:$0xff]  ;;  %v3732_v48 = vcombine.low %v3699_v46, %v3699_v46 }
  0xab   : > { %4213 = vmatprep.subr.bf16.mxu1 %v4555_v49  ;;  %v3733_v49 = vcombine.high %v3699_v46, %v3699_v46  ;;  %v4673_v46 = vld [vmem:[%s5693_s1 + $0x7a0] sm:$0xff]  }
  0xad   : > { %4192 = vmatpush3.bf16.msra.mxu0 %v4556_v50  ;;  %v3783_v50 = vcombine.low %v3750_v47, %v3750_v47 }
  0xae   : > { %4214 = vmatpush3.bf16.msra.mxu1 %v4557_v51  ;;  %4193 = vmatprep.subr.bf16.mxu0 %v4558_v52  ;;  %v3784_v51 = vcombine.high %v3750_v47, %v3750_v47  ;;  %v4618_v52 = vld [vmem:[%s5693_s1 + $0x640] sm:$0xff]  }
  0xaf   : > { %4215 = vmatprep.subr.bf16.mxu1 %v4559_v53  ;;  %v4619_v53 = vld [vmem:[%s5693_s1 + $0x6c0] sm:$0xff]  }
  0xb1   : > { %4194 = vmatpush3.bf16.msra.mxu0 %v4560_v54  ;;  %v4620_v54 = vld [vmem:[%s5693_s1 + $0x600] sm:$0xff]  }
  0xb2   : > { %4216 = vmatpush3.bf16.msra.mxu1 %v4561_v55  ;;  %4195 = vmatprep.subr.bf16.mxu0 %v4562_v56  ;;  %v4621_v55 = vld [vmem:[%s5693_s1 + $0x680] sm:$0xff]   ;;  %v4622_v56 = vld [vmem:[%s5693_s1 + $0x648] sm:$0xff]  }
  0xb3   : > { %4217 = vmatprep.subr.bf16.mxu1 %v4563_v57  ;;  %v4623_v57 = vld [vmem:[%s5693_s1 + $0x6c8] sm:$0xff]  }
  0xb5   : > { %4196 = vmatpush3.bf16.msra.mxu0 %v4564_v58  ;;  %v4624_v58 = vld [vmem:[%s5693_s1 + $0x608] sm:$0xff]  }
  0xb6   : > { %4218 = vmatpush3.bf16.msra.mxu1 %v4565_v59  ;;  %4197 = vmatprep.subr.bf16.mxu0 %v4566_v60  ;;  %v4625_v59 = vld [vmem:[%s5693_s1 + $0x688] sm:$0xff]   ;;  %v4626_v60 = vld [vmem:[%s5693_s1 + $0x650] sm:$0xff]  }
  0xb7   : > { %4219 = vmatprep.subr.bf16.mxu1 %v4567_v61  ;;  %v4627_v61 = vld [vmem:[%s5693_s1 + $0x6d0] sm:$0xff]  }
  0xb9   : > { %4198 = vmatpush3.bf16.msra.mxu0 %v4568_v62  ;;  %v4628_v62 = vld [vmem:[%s5693_s1 + $0x610] sm:$0xff]  }
  0xba   : > { %4220 = vmatpush3.bf16.msra.mxu1 %v4569_v63  ;;  %4199 = vmatprep.subr.bf16.mxu0 %v4570_v0  ;;  %v4629_v63 = vld [vmem:[%s5693_s1 + $0x690] sm:$0xff]   ;;  %v4630_v0 = vld [vmem:[%s5693_s1 + $0x658] sm:$0xff]  }
  0xbb   : > { %4221 = vmatprep.subr.bf16.mxu1 %v4571_v1  ;;  %v4631_v1 = vld [vmem:[%s5693_s1 + $0x6d8] sm:$0xff]  }
  0xbd   : > { %4200 = vmatpush3.bf16.msra.mxu0 %v4572_v2  ;;  %v4632_v2 = vld [vmem:[%s5693_s1 + $0x618] sm:$0xff]  }
  0xbe   : > { %4222 = vmatpush3.bf16.msra.mxu1 %v4573_v3  ;;  %4201 = vmatprep.subr.bf16.mxu0 %v4574_v4  ;;  %v4633_v3 = vld [vmem:[%s5693_s1 + $0x698] sm:$0xff]   ;;  %v4634_v4 = vld [vmem:[%s5693_s1 + $0x660] sm:$0xff]  }
  0xbf   : > { %4223 = vmatprep.subr.bf16.mxu1 %v4575_v5  ;;  %v4635_v5 = vld [vmem:[%s5693_s1 + $0x6e0] sm:$0xff]  }
  0xc1   : > { %4202 = vmatpush3.bf16.msra.mxu0 %v4576_v6  ;;  %v4636_v6 = vld [vmem:[%s5693_s1 + $0x620] sm:$0xff]  }
  0xc2   : > { %4224 = vmatpush3.bf16.msra.mxu1 %v4577_v7  ;;  %4231 = vmatprep.subr.bf16.mxu0 %v4582_v14  ;;  %v4637_v7 = vld [vmem:[%s5693_s1 + $0x6a0] sm:$0xff]   ;;  %v4644_v14 = vld [vmem:[%s5693_s1 + $0x630] sm:$0xff]  }
  0xc3   : > { %4253 = vmatprep.subr.bf16.mxu1 %v4583_v15  ;;  %v4645_v15 = vld [vmem:[%s5693_s1 + $0x6b0] sm:$0xff]  }
  0xc4   : > { %1864 = vmatmul.mubr.bf16.vlgmr.msra.gmra.mrb[16].mxu0 %v3630_v9  ;;  %v4639_v9 = vld [vmem:[%s5693_s1 + $0x6e8] sm:$0xff]  }
  0xc5   : > { %2043 = vmatmul.mubr.bf16.vlgmr.msra.gmra.mrb[16].mxu1 %v3681_v12  ;;  %4232 = vmatpush3.bf16.msra.mxu0 %v4584_v16  ;;  %v4642_v12 = vld [vmem:[%s5693_s1 + $0x670] sm:$0xff]   ;;  %v4646_v16 = vld [vmem:[%s5693_s1 + $0x678] sm:$0xff]  }
  0xc6   : > { %4254 = vmatpush3.bf16.msra.mxu1 %v4585_v17  ;;  %4233 = vmatprep.subr.bf16.mxu0 %v4586_v18  ;;  %v4647_v17 = vld [vmem:[%s5693_s1 + $0x6f8] sm:$0xff]  }
  0xc7   : > { %4255 = vmatprep.subr.bf16.mxu1 %v4587_v19  ;;  %2221 = vmatprep.mubr.bf16.mxu0 %v3733_v49  ;;  %v4648_v18 = vld [vmem:[%s5693_s1 + $0x638] sm:$0xff]   ;;  %v4674_v49 = vld [vmem:[%s5693_s1 + $0x768] sm:$0xff]  }
  0xc8   : > { %2400 = vmatprep.mubr.bf16.mxu1 %v3784_v51  ;;  %v4649_v19 = vld [vmem:[%s5693_s1 + $0x6b8] sm:$0xff]  }
  0xc9   : > { %4234 = vmatpush3.bf16.msra.mxu0 %v4588_v20  ;;  %v3801_v20 = vld [vmem:[%s4949_s26 + $0x60] sm:$0xff] }
  0xca   : > { %4256 = vmatpush3.bf16.msra.mxu1 %v4589_v21  ;;  %4235 = vmatprep.subr.bf16.mxu0 %v4590_v22  ;;  %v3852_v21 = vld [vmem:[%s4949_s26 + $0x68] sm:$0xff]  ;;  %v3834_v22 = vcombine.low %v3801_v20, %v3801_v20 }
  0xcb   : > { %4257 = vmatprep.subr.bf16.mxu1 %v4591_v23  ;;  %v3835_v23 = vcombine.high %v3801_v20, %v3801_v20 }
  0xcd   : > { %4236 = vmatpush3.bf16.msra.mxu0 %v4592_v24  ;;  %v3885_v24 = vcombine.low %v3852_v21, %v3852_v21 }
  0xce   : > { %4258 = vmatpush3.bf16.msra.mxu1 %v4593_v25  ;;  %4237 = vmatprep.subr.bf16.mxu0 %v4594_v26  ;;  %v4654_v25 = vld [vmem:[%s5693_s1 + $0x740] sm:$0xff]   ;;  %v3886_v26 = vcombine.high %v3852_v21, %v3852_v21 }
  0xcf   : > { %4259 = vmatprep.subr.bf16.mxu1 %v4595_v27  ;;  %v4655_v27 = vld [vmem:[%s5693_s1 + $0x7c0] sm:$0xff]  }
  0xd1   : > { %4238 = vmatpush3.bf16.msra.mxu0 %v4596_v28  ;;  %v4656_v28 = vld [vmem:[%s5693_s1 + $0x700] sm:$0xff]  }
  0xd2   : > { %4260 = vmatpush3.bf16.msra.mxu1 %v4597_v29  ;;  %4239 = vmatprep.subr.bf16.mxu0 %v4598_v30  ;;  %v4657_v29 = vld [vmem:[%s5693_s1 + $0x780] sm:$0xff]   ;;  %v4658_v30 = vld [vmem:[%s5693_s1 + $0x748] sm:$0xff]  }
  0xd3   : > { %4261 = vmatprep.subr.bf16.mxu1 %v4599_v31  ;;  %v4659_v31 = vld [vmem:[%s5693_s1 + $0x7c8] sm:$0xff]  }
  0xd5   : > { %4240 = vmatpush3.bf16.msra.mxu0 %v4600_v32  ;;  %v4660_v32 = vld [vmem:[%s5693_s1 + $0x708] sm:$0xff]  }
  0xd6   : > { %4262 = vmatpush3.bf16.msra.mxu1 %v4601_v33  ;;  %4241 = vmatprep.subr.bf16.mxu0 %v4602_v34  ;;  %v4661_v33 = vld [vmem:[%s5693_s1 + $0x788] sm:$0xff]   ;;  %v4662_v34 = vld [vmem:[%s5693_s1 + $0x750] sm:$0xff]  }
  0xd7   : > { %4263 = vmatprep.subr.bf16.mxu1 %v4603_v35  ;;  %v4663_v35 = vld [vmem:[%s5693_s1 + $0x7d0] sm:$0xff]  }
  0xd9   : > { %4242 = vmatpush3.bf16.msra.mxu0 %v4604_v36  ;;  %v4664_v36 = vld [vmem:[%s5693_s1 + $0x710] sm:$0xff]  }
  0xda   : > { %4264 = vmatpush3.bf16.msra.mxu1 %v4605_v37  ;;  %4243 = vmatprep.subr.bf16.mxu0 %v4606_v38  ;;  %v4665_v37 = vld [vmem:[%s5693_s1 + $0x790] sm:$0xff]   ;;  %v4666_v38 = vld [vmem:[%s5693_s1 + $0x758] sm:$0xff]  }
  0xdb   : > { %4265 = vmatprep.subr.bf16.mxu1 %v4607_v39  ;;  %v4667_v39 = vld [vmem:[%s5693_s1 + $0x7d8] sm:$0xff]  }
  0xdd   : > { %4244 = vmatpush3.bf16.msra.mxu0 %v4608_v40  ;;  %v4668_v40 = vld [vmem:[%s5693_s1 + $0x718] sm:$0xff]  }
  0xde   : > { %4266 = vmatpush3.bf16.msra.mxu1 %v4609_v41  ;;  %4245 = vmatprep.subr.bf16.mxu0 %v4610_v42  ;;  %v4669_v41 = vld [vmem:[%s5693_s1 + $0x798] sm:$0xff]   ;;  %v4670_v42 = vld [vmem:[%s5693_s1 + $0x760] sm:$0xff]  }
  0xdf   : > { %4267 = vmatprep.subr.bf16.mxu1 %v4611_v43  ;;  %v4671_v43 = vld [vmem:[%s5693_s1 + $0x7e0] sm:$0xff]  }
  0xe1   : > { %4246 = vmatpush3.bf16.msra.mxu0 %v4612_v44  ;;  %v4672_v44 = vld [vmem:[%s5693_s1 + $0x720] sm:$0xff]  }
  0xe2   : > { %4268 = vmatpush3.bf16.msra.mxu1 %v4613_v45  ;;  %4275 = vmatprep.subr.bf16.mxu0 %v4618_v52  ;;  %v4675_v52 = vld [vmem:[%s5693_s1 + $0x7e8] sm:$0xff]  }
  0xe3   : > { %4297 = vmatprep.subr.bf16.mxu1 %v4619_v53 }
  0xe4   : > { %2222 = vmatmul.mubr.bf16.vlgmr.msra.gmra.mrb[20].mxu0 %v3732_v48 }
  0xe5   : > { %2401 = vmatmul.mubr.bf16.vlgmr.msra.gmra.mrb[20].mxu1 %v3783_v50  ;;  %4276 = vmatpush3.bf16.msra.mxu0 %v4620_v54 }
  0xe6   : > { %4298 = vmatpush3.bf16.msra.mxu1 %v4621_v55  ;;  %4277 = vmatprep.subr.bf16.mxu0 %v4622_v56  ;;  %v4676_v56 = vld [vmem:[%s5693_s1 + $0x728] sm:$0xff]  }
  0xe7   : > { %4299 = vmatprep.subr.bf16.mxu1 %v4623_v57  ;;  %2579 = vmatprep.mubr.bf16.mxu0 %v3835_v23 }
  0xe8   : > { %2758 = vmatprep.mubr.bf16.mxu1 %v3886_v26 }
  0xe9   : > { %4278 = vmatpush3.bf16.msra.mxu0 %v4624_v58 }
  0xea   : > { %4300 = vmatpush3.bf16.msra.mxu1 %v4625_v59  ;;  %4279 = vmatprep.subr.bf16.mxu0 %v4626_v60  ;;  %v4677_v59 = vld [vmem:[%s5693_s1 + $0x7a8] sm:$0xff]  }
  0xeb   : > { %4301 = vmatprep.subr.bf16.mxu1 %v4627_v61  ;;  %v4678_v61 = vld [vmem:[%s5693_s1 + $0x770] sm:$0xff]  }
  0xed   : > { %4280 = vmatpush3.bf16.msra.mxu0 %v4628_v62  ;;  %v4679_v62 = vld [vmem:[%s5693_s1 + $0x7f0] sm:$0xff]  }
  0xee   : > { %4302 = vmatpush3.bf16.msra.mxu1 %v4629_v63  ;;  %4281 = vmatprep.subr.bf16.mxu0 %v4630_v0  ;;  %v4680_v63 = vld [vmem:[%s5693_s1 + $0x730] sm:$0xff]  }
  0xef   : > { %4303 = vmatprep.subr.bf16.mxu1 %v4631_v1  ;;  %v4681_v0 = vld [vmem:[%s5693_s1 + $0x7b0] sm:$0xff]   ;;  %v4682_v1 = vld [vmem:[%s5693_s1 + $0x778] sm:$0xff]  }
  0xf1   : > { %4282 = vmatpush3.bf16.msra.mxu0 %v4632_v2  ;;  %v4683_v2 = vld [vmem:[%s5693_s1 + $0x7f8] sm:$0xff]  }
  0xf2   : > { %4304 = vmatpush3.bf16.msra.mxu1 %v4633_v3  ;;  %4283 = vmatprep.subr.bf16.mxu0 %v4634_v4  ;;  %v4684_v3 = vld [vmem:[%s5693_s1 + $0x738] sm:$0xff]  }
  0xf3   : > { %4305 = vmatprep.subr.bf16.mxu1 %v4635_v5  ;;  %v4685_v4 = vld [vmem:[%s5693_s1 + $0x7b8] sm:$0xff]   ;;  %v3903_v5 = vld [vmem:[%s4949_s26 + $0x70] sm:$0xff] }
  0xf5   : > { %4284 = vmatpush3.bf16.msra.mxu0 %v4636_v6  ;;  %v3954_v6 = vld [vmem:[%s4949_s26 + $0x78] sm:$0xff]  ;;  %s3221_s26 = sshll.u32 %s4922_s25, 3 }
  0xf6   : > { %4306 = vmatpush3.bf16.msra.mxu1 %v4637_v7  ;;  %4285 = vmatprep.subr.bf16.mxu0 %v4638_v8  ;;  %v3936_v7 = vcombine.low %v3903_v5, %v3903_v5  ;;  %v3937_v8 = vcombine.high %v3903_v5, %v3903_v5  ;;  %s263_s30 = scalar_lea.vmem [#allocation3], %s3221_s26 }
  0xf7   : > { %4307 = vmatprep.subr.bf16.mxu1 %v4639_v9  ;;  %v3987_v9 = vcombine.low %v3954_v6, %v3954_v6  ;;  %s3148_s4 = sshll.u32 %s263_s30, 4  ;;  %s5650_s4 = int_to_ptr.vmem [resolvable:$true] %s3148_s4 }
  0xf8   : > { %s4690_s9 = scalar_lea.vmem %s5650_s4, 128  ;;  %p4697_p2 = scmp.lt.s32.totalorder %s5650_s4, %s4695_s10 }
  0xf9   : > { %4286 = vmatpush3.bf16.msra.mxu0 %v4640_v10  ;;  %v3988_v10 = vcombine.high %v3954_v6, %v3954_v6  ;;  %p4691_p13 = scmp.ne.s32.totalorder %s5650_s4, %s4690_s9  ;;  %p4698_p3 = scmp.lt.s32.totalorder %s4696_s11, %s4690_s9 }
  0xfa   : > { %4308 = vmatpush3.bf16.msra.mxu1 %v4641_v11  ;;  %4287 = vmatprep.subr.bf16.mxu0 %v4642_v12 }
  0xfb   : > { %4309 = vmatprep.subr.bf16.mxu1 %v4643_v13  ;;  %p4692_p0 = pnand %p4691_p13, %p4813_p6  ;;  %p4699_p4 = por %p4698_p3, %p4697_p2 }
  0xfd   : > { %4288 = vmatpush3.bf16.msra.mxu0 %v4644_v14  ;;  %p4693_p1 = pneg %p4692_p0 }
  0xfe   : > { %4310 = vmatpush3.bf16.msra.mxu1 %v4645_v15  ;;  %4289 = vmatprep.subr.bf16.mxu0 %v4646_v16 }
  0xff   : > { %4311 = vmatprep.subr.bf16.mxu1 %v4647_v17  ;;  %p4700_p5 = pnand %p4699_p4, %p4693_p1 }
 0x101   : > { %4290 = vmatpush3.bf16.msra.mxu0 %v4648_v18 }
 0x102   : > { %4312 = vmatpush3.bf16.msra.mxu1 %v4649_v19  ;;  %4319 = vmatprep.subr.bf16.mxu0 %v4654_v25 }
 0x103   : > { %4341 = vmatprep.subr.bf16.mxu1 %v4655_v27 }
 0x104   : > { %2580 = vmatmul.mubr.bf16.vlgmr.msra.gmra.mrb[24].mxu0 %v3834_v22 }
 0x105   : > { %2759 = vmatmul.mubr.bf16.vlgmr.msra.gmra.mrb[24].mxu1 %v3885_v24  ;;  %4320 = vmatpush3.bf16.msra.mxu0 %v4656_v28 }
 0x106   : > { %4342 = vmatpush3.bf16.msra.mxu1 %v4657_v29  ;;  %4321 = vmatprep.subr.bf16.mxu0 %v4658_v30 }
 0x107   : > { %4343 = vmatprep.subr.bf16.mxu1 %v4659_v31  ;;  %2937 = vmatprep.mubr.bf16.mxu0 %v3937_v8 }
 0x108   : > { %3116 = vmatprep.mubr.bf16.mxu1 %v3988_v10 }
 0x109   : > { %4322 = vmatpush3.bf16.msra.mxu0 %v4660_v32 }
 0x10a   : > { %4344 = vmatpush3.bf16.msra.mxu1 %v4661_v33  ;;  %4323 = vmatprep.subr.bf16.mxu0 %v4662_v34 }
 0x10b   : > { %4345 = vmatprep.subr.bf16.mxu1 %v4663_v35 }
 0x10d   : > { %4324 = vmatpush3.bf16.msra.mxu0 %v4664_v36 }
 0x10e   : > { %4346 = vmatpush3.bf16.msra.mxu1 %v4665_v37  ;;  %4325 = vmatprep.subr.bf16.mxu0 %v4666_v38 }
 0x10f   : > { %4347 = vmatprep.subr.bf16.mxu1 %v4667_v39 }
 0x111   : > { %4326 = vmatpush3.bf16.msra.mxu0 %v4668_v40 }
 0x112   : > { %4348 = vmatpush3.bf16.msra.mxu1 %v4669_v41  ;;  %4327 = vmatprep.subr.bf16.mxu0 %v4670_v42 }
 0x113   : > { %4349 = vmatprep.subr.bf16.mxu1 %v4671_v43 }
 0x115   : > { %4328 = vmatpush3.bf16.msra.mxu0 %v4672_v44 }
 0x116   : > { %4350 = vmatpush3.bf16.msra.mxu1 %v4673_v46  ;;  %4329 = vmatprep.subr.bf16.mxu0 %v4674_v49 }
 0x117   : > { %v4027_v45 = vpop.f32.mrb[0].mxu0  ;;  %4351 = vmatprep.subr.bf16.mxu1 %v4675_v52 }
 0x118   : > { %v4049_v47 = vpop.f32.mrb[0].mxu1  ;;  %v4028_v48 = vpop.f32.mrb[1].mxu0 }
 0x119   : > { %v4029_v50 = vadd.f32 %v4028_v48, %v4027_v45  ;;  %v4050_v51 = vpop.f32.mrb[1].mxu1  ;;  %v4030_v54 = vpop.f32.mrb[2].mxu0  ;;  %4330 = vmatpush3.bf16.msra.mxu0 %v4676_v56 }
 0x11a   : > { %v4051_v53 = vadd.f32 %v4050_v51, %v4049_v47  ;;  %v4052_v55 = vpop.f32.mrb[2].mxu1  ;;  %v4031_v57 = vpop.f32.mrb[3].mxu0  ;;  %4352 = vmatpush3.bf16.msra.mxu1 %v4677_v59  ;;  %4331 = vmatprep.subr.bf16.mxu0 %v4678_v61 }
 0x11b   : > { %v4053_v60 = vpop.f32.mrb[3].mxu1  ;;  %4353 = vmatprep.subr.bf16.mxu1 %v4679_v62 }
 0x11c   : > { %v614_v58 = vadd.f32 %v4051_v53, %v4029_v50 }
 0x11d   : > { %4332 = vmatpush3.bf16.msra.mxu0 %v4680_v63 }
 0x11e   : > { %4354 = vmatpush3.bf16.msra.mxu1 %v4681_v0  ;;  %4333 = vmatprep.subr.bf16.mxu0 %v4682_v1 }
 0x11f   : > { %4355 = vmatprep.subr.bf16.mxu1 %v4683_v2 }
 0x121   : > { %4334 = vmatpush3.bf16.msra.mxu0 %v4684_v3 }
 0x122   : > { %4356 = vmatpush3.bf16.msra.mxu1 %v4685_v4 }
 0x124   : > { %2938 = vmatmul.mubr.bf16.vlgmr.msra.gmra.mrb[28].mxu0 %v3936_v7 }
 0x125   : > { %3117 = vmatmul.mubr.bf16.vlgmr.msra.gmra.mrb[28].mxu1 %v3987_v9 }
 0x137   : > { %v4071_v11 = vpop.f32.mrb[4].mxu0 }
 0x138   : > { %v4093_v12 = vpop.f32.mrb[4].mxu1  ;;  %v4072_v13 = vpop.f32.mrb[5].mxu0 }
 0x139   : > { %v4094_v14 = vpop.f32.mrb[5].mxu1  ;;  %v4073_v15 = vadd.f32 %v4072_v13, %v4071_v11  ;;  %v4074_v17 = vpop.f32.mrb[6].mxu0 }
 0x13a   : > { %v4095_v16 = vadd.f32 %v4094_v14, %v4093_v12  ;;  %v4096_v18 = vpop.f32.mrb[6].mxu1  ;;  %v4075_v19 = vpop.f32.mrb[7].mxu0 }
 0x13b   : > { %v4097_v20 = vpop.f32.mrb[7].mxu1  ;;  %v797_v21 = vadd.f32 %v4073_v15, %v614_v58 }
 0x13d   : > { %v976_v22 = vadd.f32 %v4095_v16, %v797_v21 }
 0x157   : > { %v4115_v23 = vpop.f32.mrb[8].mxu0 }
 0x158   : > { %v4137_v24 = vpop.f32.mrb[8].mxu1  ;;  %v4116_v25 = vpop.f32.mrb[9].mxu0 }
 0x159   : > { %v4117_v26 = vadd.f32 %v4116_v25, %v4115_v23  ;;  %v4138_v27 = vpop.f32.mrb[9].mxu1  ;;  %v4118_v28 = vpop.f32.mrb[10].mxu0 }
 0x15a   : > { %v4139_v29 = vadd.f32 %v4138_v27, %v4137_v24  ;;  %v4140_v30 = vpop.f32.mrb[10].mxu1  ;;  %v4119_v31 = vpop.f32.mrb[11].mxu0 }
 0x15b   : > { %v1155_v32 = vadd.f32 %v4117_v26, %v976_v22  ;;  %v4141_v33 = vpop.f32.mrb[11].mxu1  ;;  %v4005_v30 = vld [vmem:[%s5694_s2] ss:$0 sm:$0xff] }
 0x15d   : > { %v1334_v34 = vadd.f32 %v4139_v29, %v1155_v32 }
 0x177   : > { %v4159_v35 = vpop.f32.mrb[12].mxu0 }
 0x178   : > { %v4181_v36 = vpop.f32.mrb[12].mxu1  ;;  %v4160_v37 = vpop.f32.mrb[13].mxu0 }
 0x179   : > { %v4161_v38 = vadd.f32 %v4160_v37, %v4159_v35  ;;  %v4182_v39 = vpop.f32.mrb[13].mxu1  ;;  %v4162_v40 = vpop.f32.mrb[14].mxu0 }
 0x17a   : > { %v4183_v41 = vadd.f32 %v4182_v39, %v4181_v36  ;;  %v4184_v42 = vpop.f32.mrb[14].mxu1  ;;  %v4163_v43 = vpop.f32.mrb[15].mxu0 }
 0x17b   : > { %v1513_v44 = vadd.f32 %v4161_v38, %v1334_v34  ;;  %v4185_v45 = vpop.f32.mrb[15].mxu1 }
 0x17d   : > { %v1692_v46 = vadd.f32 %v4183_v41, %v1513_v44 }
 0x197   : > { %v4203_v47 = vpop.f32.mrb[16].mxu0 }
 0x198   : > { %v4225_v48 = vpop.f32.mrb[16].mxu1  ;;  %v4204_v49 = vpop.f32.mrb[17].mxu0 }
 0x199   : > { %v4226_v50 = vpop.f32.mrb[17].mxu1  ;;  %v4205_v51 = vadd.f32 %v4204_v49, %v4203_v47  ;;  %v4206_v53 = vpop.f32.mrb[18].mxu0 }
 0x19a   : > { %v4227_v52 = vadd.f32 %v4226_v50, %v4225_v48  ;;  %v4228_v54 = vpop.f32.mrb[18].mxu1  ;;  %v4207_v55 = vpop.f32.mrb[19].mxu0 }
 0x19b   : > { %v4229_v56 = vpop.f32.mrb[19].mxu1  ;;  %v1871_v57 = vadd.f32 %v4205_v51, %v1692_v46 }
 0x19d   : > { %v2050_v58 = vadd.f32 %v4227_v52, %v1871_v57 }
 0x1b7   : > { %v4247_v59 = vpop.f32.mrb[20].mxu0 }
 0x1b8   : > { %v4269_v60 = vpop.f32.mrb[20].mxu1  ;;  %v4248_v61 = vpop.f32.mrb[21].mxu0 }
 0x1b9   : > { %v4249_v62 = vadd.f32 %v4248_v61, %v4247_v59  ;;  %v4270_v63 = vpop.f32.mrb[21].mxu1  ;;  %v4250_v0 = vpop.f32.mrb[22].mxu0 }
 0x1ba   : > { %v4271_v1 = vadd.f32 %v4270_v63, %v4269_v60  ;;  %v4272_v2 = vpop.f32.mrb[22].mxu1  ;;  %v4251_v3 = vpop.f32.mrb[23].mxu0 }
 0x1bb   : > { %v2229_v4 = vadd.f32 %v4249_v62, %v2050_v58  ;;  %v4273_v5 = vpop.f32.mrb[23].mxu1 }
 0x1bd   : > { %v2408_v6 = vadd.f32 %v4271_v1, %v2229_v4 }
 0x1d7   : > { %v4291_v7 = vpop.f32.mrb[24].mxu0 }
 0x1d8   : > { %v4313_v8 = vpop.f32.mrb[24].mxu1  ;;  %v4292_v9 = vpop.f32.mrb[25].mxu0 }
 0x1d9   : > { %v4293_v10 = vadd.f32 %v4292_v9, %v4291_v7  ;;  %v4314_v11 = vpop.f32.mrb[25].mxu1  ;;  %v4294_v12 = vpop.f32.mrb[26].mxu0 }
 0x1da   : > { %v4315_v13 = vadd.f32 %v4314_v11, %v4313_v8  ;;  %v4316_v14 = vpop.f32.mrb[26].mxu1  ;;  %v4295_v15 = vpop.f32.mrb[27].mxu0 }
 0x1db   : > { %v2587_v16 = vadd.f32 %v4293_v10, %v2408_v6  ;;  %v4317_v17 = vpop.f32.mrb[27].mxu1 }
 0x1dd   : > { %v2766_v18 = vadd.f32 %v4315_v13, %v2587_v16 }
 0x1f7   : > { %v4335_v19 = vpop.f32.mrb[28].mxu0 }
 0x1f8   : > { %v4357_v20 = vpop.f32.mrb[28].mxu1  ;;  %v4336_v21 = vpop.f32.mrb[29].mxu0 }
 0x1f9   : > { %v4337_v22 = vadd.f32 %v4336_v21, %v4335_v19  ;;  %v4358_v23 = vpop.f32.mrb[29].mxu1  ;;  %v4338_v24 = vpop.f32.mrb[30].mxu0 }
 0x1fa   : > { %v4359_v25 = vadd.f32 %v4358_v23, %v4357_v20  ;;  %v4360_v26 = vpop.f32.mrb[30].mxu1  ;;  %v4339_v27 = vpop.f32.mrb[31].mxu0 }
 0x1fb   : > { %v2945_v28 = vadd.f32 %v4337_v22, %v2766_v18  ;;  %v4361_v29 = vpop.f32.mrb[31].mxu1 }
 0x1fd   : > { %v3124_v31 = vadd.f32 %v4359_v25, %v2945_v28 }
 0x1ff   : > { %v3132_v32 = vadd.f32 %v4005_v30, %v3124_v31 }
 0x201   : > { %3133 = vst [vmem:[%s263_s30] sm:$0xff] %v3132_v32 }
 0x202   : > { %4703 = shalt.err (!%p4700_p5)
}
 0x203   : > { %s4704_s25 = scalar_lea.hbm %s5648_s7, 128  ;;  %s4708_s20 = scalar_lea.hbm %s5695_s3, 256 }
 0x204   : > { %p4705_p7 = scmp.ne.s32.totalorder %s5648_s7, %s4704_s25  ;;  %p4709_p12 = scmp.lt.u32.totalorder %s5648_s7, %s5695_s3 }
 0x205   : > { %p4710_p13 = scmp.lt.u32.totalorder %s4708_s20, %s4704_s25  ;;  %p4712_p1 = scmp.lt.u32.totalorder %s4704_s25, %s5648_s7 }
 0x206   : > { %p4706_p10 = pnand %p4705_p7, %p4813_p6 }
 0x207   : > { %p4711_p0 = por %p4710_p13, %p4709_p12 }
 0x208   : > { %p4707_p11 = pneg %p4706_p10 }
 0x209   : > { %p4713_p2 = por %p4712_p1, %p4711_p0 }
 0x20b   : > { %p4714_p3 = pnand %p4713_p2, %p4707_p11 }
 0x20d   : > { %4717 = shalt.err (!%p4714_p3)
}
 0x20e   : > { %4363 = dma.vmem_to_hbm [thread:$0]  (%p4813_p6), %s5650_s4, 128, %s5648_s7, %s3135_s8  }
 0x20f PF: > { %s3160_s27 = sand.u32 1, %s4740_s12   ;;  %p4366_p4 = pnand %p3215_p9, %p4817_p8 }
 0x210   : > { %s3161_s28 = scalar_lea.sflag [#allocation4], %s3160_s27 }
 0x211   : > { %4735 = dma.done.wait (!%p4366_p4), %s3161_s28, 128  }
 0x212   : > { %4737 = vsyncadd (!%p4366_p4), %s3161_s28, 4294967168  ;;  %p13_p5 = scmp.ge.s32.totalorder %s4798_s18, 4   ;;  %s5698_s12 = smov %s4744_s13 }
 0x213   : > { %s5699_s13 = smov %s4748_s14  ;;  %s5700_s14 = smov %s4811_s21 }
 0x214   : > { %s5701_s15 = smov %s4798_s18  ;;  %15 = sbr.rel (!%p13_p5) target bundleno = 3 (0x3), region = 140 }
 0x21b   :  { %3166 = vsyncpa [#allocation4], 1 }
 0x21c   :  { %3168 = vsyncpa [#allocation4 + $0x1], 1 }

</bundles_post_ra>
